<compile_context>
chip_gen: v7x
topology: tpu7x:2x2x1
jax: 0.10.0
libtpu: 0.0.40
codegen_flags: <defaults>
</compile_context>

<pallas_src>
import jax
import jax.numpy as jnp
from jax.experimental import pallas as pl
from jax.experimental.pallas import tpu as pltpu
import numpy as np


# ----------------------------------------------------------------------------
# Single fused kernel: DMA overlap + input projections + merged backward LSTMs
# + scores + log_softmax
# ----------------------------------------------------------------------------
def _simpledot_kernel(embq_ref, rel_hbm_ref,
                      wq_ref, bq_ref, whhq_ref,
                      wr_ref, br_ref, whhr_ref,
                      o_ref,
                      rel_vmem, xgq_ref, xgr_ref, rel_sem):
    Tq, B, G4 = xgq_ref.shape
    Tr, R, _ = xgr_ref.shape
    H = whhq_ref.shape[0]

    # 1) Kick off the relation-embedding DMA (HBM -> VMEM scratch) so it
    #    overlaps with the question-branch input projection below.
    rel_cp = pltpu.make_async_copy(rel_hbm_ref, rel_vmem, rel_sem)
    rel_cp.start()

    # 2) Question input projection: one bf16 [Tq*B,768] x [768,4H] matmul with
    #    f32 accumulation (diminisher already folded into the weights on host).
    xgq = jnp.dot(embq_ref[...], wq_ref[...],
                  preferred_element_type=jnp.float32) + bq_ref[...]
    xgq_ref[...] = xgq.reshape(Tq, B, G4)     # one reshape, outside the loop

    # 3) Wait for the relation data, then its projection (layout-compatible
    #    reshape: Tr*R rows are already grouped 8 per timestep).
    rel_cp.wait()
    xgr = jnp.dot(rel_vmem[...], wr_ref[...],
                  preferred_element_type=jnp.float32) + br_ref[...]
    xgr_ref[...] = xgr.reshape(Tr, R, G4)

    whh_q = whhq_ref[...]                     # [H, 4H]
    whh_r = whhr_ref[...]                     # [H, 4H]

    def lstm_step(xg_t, h, c, whh):
        # single [N,H] x [H,4H] recurrent matmul per step, then per-gate lane
        # slices of the [N,4H] result (PyTorch gate order i, f, g, o).
        g = xg_t + jnp.dot(h, whh, preferred_element_type=jnp.float32)
        i_g = jax.nn.sigmoid(g[:, 0 * H:1 * H])
        f_g = jax.nn.sigmoid(g[:, 1 * H:2 * H])
        c_g = jnp.tanh(g[:, 2 * H:3 * H])
        o_g = jax.nn.sigmoid(g[:, 3 * H:4 * H])
        c = f_g * c + i_g * c_g
        h = o_g * jnp.tanh(c)
        return h, c

    h_q = jnp.zeros((B, H), jnp.float32)
    c_q = jnp.zeros((B, H), jnp.float32)
    h_r = jnp.zeros((R, H), jnp.float32)
    c_r = jnp.zeros((R, H), jnp.float32)

    # Merged, fully static backward walk: the (independent) question steps are
    # interleaved with the relation steps so the VLIW scheduler hides one
    # branch's MXU/EUP latency under the other.
    for s in range(max(Tq, Tr)):
        if s < Tr:
            h_r, c_r = lstm_step(xgr_ref[Tr - 1 - s], h_r, c_r, whh_r)
        if s < Tq:
            h_q, c_q = lstm_step(xgq_ref[Tq - 1 - s], h_q, c_q, whh_q)

    # scores: contract over H directly (no explicit transpose), then log_softmax.
    scores = jax.lax.dot_general(
        h_q, h_r, (((1,), (1,)), ((), ())),
        preferred_element_type=jnp.float32)                    # [B, R]
    m = jnp.max(scores, axis=1, keepdims=True)
    lse = jnp.log(jnp.sum(jnp.exp(scores - m), axis=1, keepdims=True))
    logp = scores - m - lse

    # Lane-dense store: pad relation axis up to the 128-wide output block.
    pad = o_ref.shape[-1] - R
    if pad > 0:
        logp = jnp.concatenate(
            [logp, jnp.zeros((B, pad), jnp.float32)], axis=1)
    o_ref[...] = logp.astype(o_ref.dtype)


def simpledot_forward(embeds, relations, params, out_pad=128):
    T, B, D = embeds.shape
    Tr, R, _ = relations.shape
    H = params["whh_q"].shape[0]

    # --- host-side algebraic fusion + dtype prep (tiny, one-time) ------------
    # diminisher folded into the LSTM input projection; big matmul operands in
    # bf16 (f32 accumulation inside the kernel), biases / recurrent weights f32.
    wq_f = (params["w_dim"] @ params["wih_q"]).astype(jnp.bfloat16)   # [768, 4H]
    bq_f = params["b_dim"] @ params["wih_q"] + params["b_q"]          # [1, 4H]
    wr_f = (params["w_dim"] @ params["wih_r"]).astype(jnp.bfloat16)   # [768, 4H]
    br_f = params["b_dim"] @ params["wih_r"] + params["b_r"]          # [1, 4H]

    # host-side 2-D reshapes: DMA'd blocks become (8,128)-friendly.
    embeds2d = embeds.reshape(T * B, D).astype(jnp.bfloat16)
    relations2d = relations.reshape(Tr * R, D).astype(jnp.bfloat16)

    vmem = pltpu.MemorySpace.VMEM
    out_padded = pl.pallas_call(
        _simpledot_kernel,
        out_shape=jax.ShapeDtypeStruct((B, out_pad), jnp.float32),
        in_specs=[
            pl.BlockSpec(memory_space=vmem),      # embeds2d
            pl.BlockSpec(memory_space=pl.ANY),    # relations2d (stays in HBM)
            pl.BlockSpec(memory_space=vmem),      # wq_f
            pl.BlockSpec(memory_space=vmem),      # bq_f
            pl.BlockSpec(memory_space=vmem),      # whh_q [H,4H]
            pl.BlockSpec(memory_space=vmem),      # wr_f
            pl.BlockSpec(memory_space=vmem),      # br_f
            pl.BlockSpec(memory_space=vmem),      # whh_r [H,4H]
        ],
        out_specs=pl.BlockSpec(memory_space=vmem),
        scratch_shapes=[
            pltpu.VMEM((Tr * R, D), jnp.bfloat16),       # relation staging buffer
            pltpu.VMEM((T, B, 4 * H), jnp.float32),      # question gate projections
            pltpu.VMEM((Tr, R, 4 * H), jnp.float32),     # relation gate projections
            pltpu.SemaphoreType.DMA(()),                 # relation DMA completion
        ],
    )(embeds2d, relations2d, wq_f, bq_f, params["whh_q"],
      wr_f, br_f, params["whh_r"])

    return out_padded[:, :R]   # [B, R] log-probabilities


# ----------------------------------------------------------------------------
# Pure-JAX reference (unfused, f32 everywhere) for correctness check
# ----------------------------------------------------------------------------
def _ref_lstm_bw(x, wih_t, whh_t, b):
    T, N, E = x.shape
    H = whh_t.shape[0]

    def step(carry, xt):
        h, c = carry
        g = xt @ wih_t + h @ whh_t + b
        i = jax.nn.sigmoid(g[:, :H])
        f = jax.nn.sigmoid(g[:, H:2 * H])
        gg = jnp.tanh(g[:, 2 * H:3 * H])
        o = jax.nn.sigmoid(g[:, 3 * H:])
        c = f * c + i * gg
        h = o * jnp.tanh(c)
        return (h, c), None

    (h, _), _ = jax.lax.scan(
        step, (jnp.zeros((N, H), jnp.float32), jnp.zeros((N, H), jnp.float32)),
        x[::-1]
    )
    return h


def simpledot_reference(embeds, relations, params):
    q_emb = embeds @ params["w_dim"] + params["b_dim"]
    r_emb = relations @ params["w_dim"] + params["b_dim"]
    last_q = _ref_lstm_bw(q_emb, params["wih_q"], params["whh_q"], params["b_q"])
    last_r = _ref_lstm_bw(r_emb, params["wih_r"], params["whh_r"], params["b_r"])
    s = last_q @ last_r.T
    return jax.nn.log_softmax(s, axis=1)


# ----------------------------------------------------------------------------
# Main
# ----------------------------------------------------------------------------
if __name__ == "__main__":
    EMB_IN = 768   # fixed by nn.Linear(768, emb_dim)
    EMB = 32       # emb_dim
    HID = 16       # hidden_dim
    T, B = 8, 2    # question tokens, batch
    T_REL, R = 30, 8  # max_rel_len, number of relations (synthetic)

    key = jax.random.PRNGKey(0)
    ks = jax.random.split(key, 12)

    params = {
        "w_dim": (jax.random.normal(ks[0], (EMB_IN, EMB), jnp.float32) * 0.02),
        "b_dim": (jax.random.normal(ks[1], (1, EMB), jnp.float32) * 0.02),
        # backward-direction LSTM weights (question), stored transposed: [E,4H]/[H,4H]
        "wih_q": (jax.random.normal(ks[2], (EMB, 4 * HID), jnp.float32) * 0.1),
        "whh_q": (jax.random.normal(ks[3], (HID, 4 * HID), jnp.float32) * 0.1),
        "b_q": (jax.random.normal(ks[4], (1, 4 * HID), jnp.float32) * 0.1),
        # backward-direction LSTM weights (relation)
        "wih_r": (jax.random.normal(ks[5], (EMB, 4 * HID), jnp.float32) * 0.1),
        "whh_r": (jax.random.normal(ks[6], (HID, 4 * HID), jnp.float32) * 0.1),
        "b_r": (jax.random.normal(ks[7], (1, 4 * HID), jnp.float32) * 0.1),
    }
    # TODO(synk): forward-direction LSTM weights are omitted — they never reach
    # the output (only output[0][:, hidden:] i.e. the backward direction is used).

    embeds = jax.random.normal(ks[8], (T, B, EMB_IN), jnp.float32)
    relations = jax.random.normal(ks[9], (T_REL, R, EMB_IN), jnp.float32)

    out = simpledot_forward(embeds, relations, params)
    out = jax.block_until_ready(out)

    ref = jax.block_until_ready(simpledot_reference(embeds, relations, params))
    # Tolerance relaxed slightly vs. the pure-f32 version: the input projection
    # now runs in bf16 (f32 accumulation) over K=768, which contributes a small
    # additional rounding error relative to the all-f32 reference.
    np.testing.assert_allclose(np.asarray(out), np.asarray(ref), atol=2e-3, rtol=2e-3)

    print("KERNEL_OK")
</pallas_src>

<mosaic_0001>
module attributes {stable_mosaic.version = 11 : i64} {
  func.func @_simpledot_kernel(%arg0: memref<16x768xbf16, #tpu.memory_space<vmem>>, %arg1: memref<240x768xbf16, #tpu.memory_space<any>>, %arg2: memref<768x64xbf16, #tpu.memory_space<vmem>>, %arg3: memref<1x64xf32, #tpu.memory_space<vmem>>, %arg4: memref<16x64xf32, #tpu.memory_space<vmem>>, %arg5: memref<768x64xbf16, #tpu.memory_space<vmem>>, %arg6: memref<1x64xf32, #tpu.memory_space<vmem>>, %arg7: memref<16x64xf32, #tpu.memory_space<vmem>>, %arg8: memref<2x128xf32, #tpu.memory_space<vmem>>, %arg9: memref<240x768xbf16, #tpu.memory_space<vmem>>, %arg10: memref<8x2x64xf32, #tpu.memory_space<vmem>>, %arg11: memref<30x8x64xf32, #tpu.memory_space<vmem>>, %arg12: memref<!tpu.dma_semaphore, #tpu.memory_space<semaphore_mem>>) attributes {dimension_semantics = [], scalar_prefetch = 0 : i64, scratch_operands = 4 : i64, tpu.core_type = #tpu.core_type<tc>} {
    tpu.enqueue_dma source(%arg1 : memref<240x768xbf16, #tpu.memory_space<any>>) target(%arg9 : memref<240x768xbf16, #tpu.memory_space<vmem>>) target_semaphore(%arg12 : memref<!tpu.dma_semaphore, #tpu.memory_space<semaphore_mem>>)
    %c0 = arith.constant 0 : index
    %c0_0 = arith.constant 0 : index
    %0 = vector.load %arg0[%c0, %c0_0] : memref<16x768xbf16, #tpu.memory_space<vmem>>, vector<16x768xbf16>
    %c0_1 = arith.constant 0 : index
    %c0_2 = arith.constant 0 : index
    %1 = vector.load %arg2[%c0_1, %c0_2] : memref<768x64xbf16, #tpu.memory_space<vmem>>, vector<768x64xbf16>
    %cst = arith.constant dense<0.000000e+00> : vector<16x64xf32>
    %2 = tpu.matmul %0, %1, %cst {dimension_numbers = #tpu.dot_dimension_numbers<[1], [0], [0], [1], [0, 0, 1, 1], [], []>} : vector<16x768xbf16>, vector<768x64xbf16>, vector<16x64xf32> -> vector<16x64xf32>
    %c0_3 = arith.constant 0 : index
    %c0_4 = arith.constant 0 : index
    %3 = vector.load %arg3[%c0_3, %c0_4] : memref<1x64xf32, #tpu.memory_space<vmem>>, vector<1x64xf32>
    %4 = vector.broadcast %3 : vector<1x64xf32> to vector<16x64xf32>
    %5 = arith.addf %2, %4 : vector<16x64xf32>
    %6 = vector.shape_cast %5 : vector<16x64xf32> to vector<8x2x64xf32>
    %c0_5 = arith.constant 0 : index
    %c0_6 = arith.constant 0 : index
    %c0_7 = arith.constant 0 : index
    %7 = vector.load %arg10[%c0_5, %c0_6, %c0_7] : memref<8x2x64xf32, #tpu.memory_space<vmem>>, vector<8x2x64xf32>
    tpu.vector_store %arg10[%c0_5, %c0_6, %c0_7], %6 {strides = array<i32>} : memref<8x2x64xf32, #tpu.memory_space<vmem>>, vector<8x2x64xf32>,
    tpu.wait_dma2 semaphore(%arg12 : memref<!tpu.dma_semaphore, #tpu.memory_space<semaphore_mem>>) src(%arg1 : memref<240x768xbf16, #tpu.memory_space<any>>) dst(%arg9 : memref<240x768xbf16, #tpu.memory_space<vmem>>)
    %c0_8 = arith.constant 0 : index
    %c0_9 = arith.constant 0 : index
    %8 = vector.load %arg9[%c0_8, %c0_9] : memref<240x768xbf16, #tpu.memory_space<vmem>>, vector<240x768xbf16>
    %c0_10 = arith.constant 0 : index
    %c0_11 = arith.constant 0 : index
    %9 = vector.load %arg5[%c0_10, %c0_11] : memref<768x64xbf16, #tpu.memory_space<vmem>>, vector<768x64xbf16>
    %cst_12 = arith.constant dense<0.000000e+00> : vector<240x64xf32>
    %10 = tpu.matmul %8, %9, %cst_12 {dimension_numbers = #tpu.dot_dimension_numbers<[1], [0], [0], [1], [0, 0, 1, 1], [], []>} : vector<240x768xbf16>, vector<768x64xbf16>, vector<240x64xf32> -> vector<240x64xf32>
    %c0_13 = arith.constant 0 : index
    %c0_14 = arith.constant 0 : index
    %11 = vector.load %arg6[%c0_13, %c0_14] : memref<1x64xf32, #tpu.memory_space<vmem>>, vector<1x64xf32>
    %12 = vector.broadcast %11 : vector<1x64xf32> to vector<240x64xf32>
    %13 = arith.addf %10, %12 : vector<240x64xf32>
    %14 = vector.shape_cast %13 : vector<240x64xf32> to vector<30x8x64xf32>
    %c0_15 = arith.constant 0 : index
    %c0_16 = arith.constant 0 : index
    %c0_17 = arith.constant 0 : index
    %15 = vector.load %arg11[%c0_15, %c0_16, %c0_17] : memref<30x8x64xf32, #tpu.memory_space<vmem>>, vector<30x8x64xf32>
    tpu.vector_store %arg11[%c0_15, %c0_16, %c0_17], %14 {strides = array<i32>} : memref<30x8x64xf32, #tpu.memory_space<vmem>>, vector<30x8x64xf32>,
    %c0_18 = arith.constant 0 : index
    %c0_19 = arith.constant 0 : index
    %16 = vector.load %arg4[%c0_18, %c0_19] : memref<16x64xf32, #tpu.memory_space<vmem>>, vector<16x64xf32>
    %c0_20 = arith.constant 0 : index
    %c0_21 = arith.constant 0 : index
    %17 = vector.load %arg7[%c0_20, %c0_21] : memref<16x64xf32, #tpu.memory_space<vmem>>, vector<16x64xf32>
    %cst_22 = arith.constant 0.000000e+00 : f32
    %18 = vector.broadcast %cst_22 : f32 to vector<2x16xf32>
    %cst_23 = arith.constant 0.000000e+00 : f32
    %19 = vector.broadcast %cst_23 : f32 to vector<2x16xf32>
    %cst_24 = arith.constant 0.000000e+00 : f32
    %20 = vector.broadcast %cst_24 : f32 to vector<8x16xf32>
    %cst_25 = arith.constant 0.000000e+00 : f32
    %21 = vector.broadcast %cst_25 : f32 to vector<8x16xf32>
    %c29 = arith.constant 29 : index
    %c0_26 = arith.constant 0 : index
    %c0_27 = arith.constant 0 : index
    %22 = vector.load %arg11[%c29, %c0_26, %c0_27] : memref<30x8x64xf32, #tpu.memory_space<vmem>>, vector<1x8x64xf32>
    %23 = vector.shape_cast %22 : vector<1x8x64xf32> to vector<8x64xf32>
    %cst_28 = arith.constant dense<0.000000e+00> : vector<8x64xf32>
    %24 = tpu.matmul %20, %17, %cst_28 {dimension_numbers = #tpu.dot_dimension_numbers<[1], [0], [0], [1], [0, 0, 1, 1], [], []>} : vector<8x16xf32>, vector<16x64xf32>, vector<8x64xf32> -> vector<8x64xf32>
    %25 = arith.addf %23, %24 : vector<8x64xf32>
    %26 = vector.extract_strided_slice %25 {offsets = [0, 0], sizes = [8, 16], strides = [1, 1]} : vector<8x64xf32> to vector<8x16xf32>
    %27 = arith.negf %26 : vector<8x16xf32>
    %28 = math.exp %27 : vector<8x16xf32>
    %cst_29 = arith.constant 1.000000e+00 : f32
    %29 = vector.broadcast %cst_29 : f32 to vector<8x16xf32>
    %30 = arith.addf %29, %28 : vector<8x16xf32>
    %31 = arith.divf %29, %30 : vector<8x16xf32>
    %32 = vector.extract_strided_slice %25 {offsets = [0, 16], sizes = [8, 16], strides = [1, 1]} : vector<8x64xf32> to vector<8x16xf32>
    %33 = arith.negf %32 : vector<8x16xf32>
    %34 = math.exp %33 : vector<8x16xf32>
    %cst_30 = arith.constant 1.000000e+00 : f32
    %35 = vector.broadcast %cst_30 : f32 to vector<8x16xf32>
    %36 = arith.addf %35, %34 : vector<8x16xf32>
    %37 = arith.divf %35, %36 : vector<8x16xf32>
    %38 = vector.extract_strided_slice %25 {offsets = [0, 32], sizes = [8, 16], strides = [1, 1]} : vector<8x64xf32> to vector<8x16xf32>
    %39 = math.tanh %38 : vector<8x16xf32>
    %40 = vector.extract_strided_slice %25 {offsets = [0, 48], sizes = [8, 16], strides = [1, 1]} : vector<8x64xf32> to vector<8x16xf32>
    %41 = arith.negf %40 : vector<8x16xf32>
    %42 = math.exp %41 : vector<8x16xf32>
    %cst_31 = arith.constant 1.000000e+00 : f32
    %43 = vector.broadcast %cst_31 : f32 to vector<8x16xf32>
    %44 = arith.addf %43, %42 : vector<8x16xf32>
    %45 = arith.divf %43, %44 : vector<8x16xf32>
    %46 = arith.mulf %37, %21 : vector<8x16xf32>
    %47 = arith.mulf %31, %39 : vector<8x16xf32>
    %48 = arith.addf %46, %47 : vector<8x16xf32>
    %49 = math.tanh %48 : vector<8x16xf32>
    %50 = arith.mulf %45, %49 : vector<8x16xf32>
    %c7 = arith.constant 7 : index
    %c0_32 = arith.constant 0 : index
    %c0_33 = arith.constant 0 : index
    %51 = vector.load %arg10[%c7, %c0_32, %c0_33] : memref<8x2x64xf32, #tpu.memory_space<vmem>>, vector<1x2x64xf32>
    %52 = vector.shape_cast %51 : vector<1x2x64xf32> to vector<2x64xf32>
    %cst_34 = arith.constant dense<0.000000e+00> : vector<2x64xf32>
    %53 = tpu.matmul %18, %16, %cst_34 {dimension_numbers = #tpu.dot_dimension_numbers<[1], [0], [0], [1], [0, 0, 1, 1], [], []>} : vector<2x16xf32>, vector<16x64xf32>, vector<2x64xf32> -> vector<2x64xf32>
    %54 = arith.addf %52, %53 : vector<2x64xf32>
    %55 = vector.extract_strided_slice %54 {offsets = [0, 0], sizes = [2, 16], strides = [1, 1]} : vector<2x64xf32> to vector<2x16xf32>
    %56 = arith.negf %55 : vector<2x16xf32>
    %57 = math.exp %56 : vector<2x16xf32>
    %cst_35 = arith.constant 1.000000e+00 : f32
    %58 = vector.broadcast %cst_35 : f32 to vector<2x16xf32>
    %59 = arith.addf %58, %57 : vector<2x16xf32>
    %60 = arith.divf %58, %59 : vector<2x16xf32>
    %61 = vector.extract_strided_slice %54 {offsets = [0, 16], sizes = [2, 16], strides = [1, 1]} : vector<2x64xf32> to vector<2x16xf32>
    %62 = arith.negf %61 : vector<2x16xf32>
    %63 = math.exp %62 : vector<2x16xf32>
    %cst_36 = arith.constant 1.000000e+00 : f32
    %64 = vector.broadcast %cst_36 : f32 to vector<2x16xf32>
    %65 = arith.addf %64, %63 : vector<2x16xf32>
    %66 = arith.divf %64, %65 : vector<2x16xf32>
    %67 = vector.extract_strided_slice %54 {offsets = [0, 32], sizes = [2, 16], strides = [1, 1]} : vector<2x64xf32> to vector<2x16xf32>
    %68 = math.tanh %67 : vector<2x16xf32>
    %69 = vector.extract_strided_slice %54 {offsets = [0, 48], sizes = [2, 16], strides = [1, 1]} : vector<2x64xf32> to vector<2x16xf32>
    %70 = arith.negf %69 : vector<2x16xf32>
    %71 = math.exp %70 : vector<2x16xf32>
    %cst_37 = arith.constant 1.000000e+00 : f32
    %72 = vector.broadcast %cst_37 : f32 to vector<2x16xf32>
    %73 = arith.addf %72, %71 : vector<2x16xf32>
    %74 = arith.divf %72, %73 : vector<2x16xf32>
    %75 = arith.mulf %66, %19 : vector<2x16xf32>
    %76 = arith.mulf %60, %68 : vector<2x16xf32>
    %77 = arith.addf %75, %76 : vector<2x16xf32>
    %78 = math.tanh %77 : vector<2x16xf32>
    %79 = arith.mulf %74, %78 : vector<2x16xf32>
    %c28 = arith.constant 28 : index
    %c0_38 = arith.constant 0 : index
    %c0_39 = arith.constant 0 : index
    %80 = vector.load %arg11[%c28, %c0_38, %c0_39] : memref<30x8x64xf32, #tpu.memory_space<vmem>>, vector<1x8x64xf32>
    %81 = vector.shape_cast %80 : vector<1x8x64xf32> to vector<8x64xf32>
    %cst_40 = arith.constant dense<0.000000e+00> : vector<8x64xf32>
    %82 = tpu.matmul %50, %17, %cst_40 {dimension_numbers = #tpu.dot_dimension_numbers<[1], [0], [0], [1], [0, 0, 1, 1], [], []>} : vector<8x16xf32>, vector<16x64xf32>, vector<8x64xf32> -> vector<8x64xf32>
    %83 = arith.addf %81, %82 : vector<8x64xf32>
    %84 = vector.extract_strided_slice %83 {offsets = [0, 0], sizes = [8, 16], strides = [1, 1]} : vector<8x64xf32> to vector<8x16xf32>
    %85 = arith.negf %84 : vector<8x16xf32>
    %86 = math.exp %85 : vector<8x16xf32>
    %cst_41 = arith.constant 1.000000e+00 : f32
    %87 = vector.broadcast %cst_41 : f32 to vector<8x16xf32>
    %88 = arith.addf %87, %86 : vector<8x16xf32>
    %89 = arith.divf %87, %88 : vector<8x16xf32>
    %90 = vector.extract_strided_slice %83 {offsets = [0, 16], sizes = [8, 16], strides = [1, 1]} : vector<8x64xf32> to vector<8x16xf32>
    %91 = arith.negf %90 : vector<8x16xf32>
    %92 = math.exp %91 : vector<8x16xf32>
    %cst_42 = arith.constant 1.000000e+00 : f32
    %93 = vector.broadcast %cst_42 : f32 to vector<8x16xf32>
    %94 = arith.addf %93, %92 : vector<8x16xf32>
    %95 = arith.divf %93, %94 : vector<8x16xf32>
    %96 = vector.extract_strided_slice %83 {offsets = [0, 32], sizes = [8, 16], strides = [1, 1]} : vector<8x64xf32> to vector<8x16xf32>
    %97 = math.tanh %96 : vector<8x16xf32>
    %98 = vector.extract_strided_slice %83 {offsets = [0, 48], sizes = [8, 16], strides = [1, 1]} : vector<8x64xf32> to vector<8x16xf32>
    %99 = arith.negf %98 : vector<8x16xf32>
    %100 = math.exp %99 : vector<8x16xf32>
    %cst_43 = arith.constant 1.000000e+00 : f32
    %101 = vector.broadcast %cst_43 : f32 to vector<8x16xf32>
    %102 = arith.addf %101, %100 : vector<8x16xf32>
    %103 = arith.divf %101, %102 : vector<8x16xf32>
    %104 = arith.mulf %95, %48 : vector<8x16xf32>
    %105 = arith.mulf %89, %97 : vector<8x16xf32>
    %106 = arith.addf %104, %105 : vector<8x16xf32>
    %107 = math.tanh %106 : vector<8x16xf32>
    %108 = arith.mulf %103, %107 : vector<8x16xf32>
    %c6 = arith.constant 6 : index
    %c0_44 = arith.constant 0 : index
    %c0_45 = arith.constant 0 : index
    %109 = vector.load %arg10[%c6, %c0_44, %c0_45] : memref<8x2x64xf32, #tpu.memory_space<vmem>>, vector<1x2x64xf32>
    %110 = vector.shape_cast %109 : vector<1x2x64xf32> to vector<2x64xf32>
    %cst_46 = arith.constant dense<0.000000e+00> : vector<2x64xf32>
    %111 = tpu.matmul %79, %16, %cst_46 {dimension_numbers = #tpu.dot_dimension_numbers<[1], [0], [0], [1], [0, 0, 1, 1], [], []>} : vector<2x16xf32>, vector<16x64xf32>, vector<2x64xf32> -> vector<2x64xf32>
    %112 = arith.addf %110, %111 : vector<2x64xf32>
    %113 = vector.extract_strided_slice %112 {offsets = [0, 0], sizes = [2, 16], strides = [1, 1]} : vector<2x64xf32> to vector<2x16xf32>
    %114 = arith.negf %113 : vector<2x16xf32>
    %115 = math.exp %114 : vector<2x16xf32>
    %cst_47 = arith.constant 1.000000e+00 : f32
    %116 = vector.broadcast %cst_47 : f32 to vector<2x16xf32>
    %117 = arith.addf %116, %115 : vector<2x16xf32>
    %118 = arith.divf %116, %117 : vector<2x16xf32>
    %119 = vector.extract_strided_slice %112 {offsets = [0, 16], sizes = [2, 16], strides = [1, 1]} : vector<2x64xf32> to vector<2x16xf32>
    %120 = arith.negf %119 : vector<2x16xf32>
    %121 = math.exp %120 : vector<2x16xf32>
    %cst_48 = arith.constant 1.000000e+00 : f32
    %122 = vector.broadcast %cst_48 : f32 to vector<2x16xf32>
    %123 = arith.addf %122, %121 : vector<2x16xf32>
    %124 = arith.divf %122, %123 : vector<2x16xf32>
    %125 = vector.extract_strided_slice %112 {offsets = [0, 32], sizes = [2, 16], strides = [1, 1]} : vector<2x64xf32> to vector<2x16xf32>
    %126 = math.tanh %125 : vector<2x16xf32>
    %127 = vector.extract_strided_slice %112 {offsets = [0, 48], sizes = [2, 16], strides = [1, 1]} : vector<2x64xf32> to vector<2x16xf32>
    %128 = arith.negf %127 : vector<2x16xf32>
    %129 = math.exp %128 : vector<2x16xf32>
    %cst_49 = arith.constant 1.000000e+00 : f32
    %130 = vector.broadcast %cst_49 : f32 to vector<2x16xf32>
    %131 = arith.addf %130, %129 : vector<2x16xf32>
    %132 = arith.divf %130, %131 : vector<2x16xf32>
    %133 = arith.mulf %124, %77 : vector<2x16xf32>
    %134 = arith.mulf %118, %126 : vector<2x16xf32>
    %135 = arith.addf %133, %134 : vector<2x16xf32>
    %136 = math.tanh %135 : vector<2x16xf32>
    %137 = arith.mulf %132, %136 : vector<2x16xf32>
    %c27 = arith.constant 27 : index
    %c0_50 = arith.constant 0 : index
    %c0_51 = arith.constant 0 : index
    %138 = vector.load %arg11[%c27, %c0_50, %c0_51] : memref<30x8x64xf32, #tpu.memory_space<vmem>>, vector<1x8x64xf32>
    %139 = vector.shape_cast %138 : vector<1x8x64xf32> to vector<8x64xf32>
    %cst_52 = arith.constant dense<0.000000e+00> : vector<8x64xf32>
    %140 = tpu.matmul %108, %17, %cst_52 {dimension_numbers = #tpu.dot_dimension_numbers<[1], [0], [0], [1], [0, 0, 1, 1], [], []>} : vector<8x16xf32>, vector<16x64xf32>, vector<8x64xf32> -> vector<8x64xf32>
    %141 = arith.addf %139, %140 : vector<8x64xf32>
    %142 = vector.extract_strided_slice %141 {offsets = [0, 0], sizes = [8, 16], strides = [1, 1]} : vector<8x64xf32> to vector<8x16xf32>
    %143 = arith.negf %142 : vector<8x16xf32>
    %144 = math.exp %143 : vector<8x16xf32>
    %cst_53 = arith.constant 1.000000e+00 : f32
    %145 = vector.broadcast %cst_53 : f32 to vector<8x16xf32>
    %146 = arith.addf %145, %144 : vector<8x16xf32>
    %147 = arith.divf %145, %146 : vector<8x16xf32>
    %148 = vector.extract_strided_slice %141 {offsets = [0, 16], sizes = [8, 16], strides = [1, 1]} : vector<8x64xf32> to vector<8x16xf32>
    %149 = arith.negf %148 : vector<8x16xf32>
    %150 = math.exp %149 : vector<8x16xf32>
    %cst_54 = arith.constant 1.000000e+00 : f32
    %151 = vector.broadcast %cst_54 : f32 to vector<8x16xf32>
    %152 = arith.addf %151, %150 : vector<8x16xf32>
    %153 = arith.divf %151, %152 : vector<8x16xf32>
    %154 = vector.extract_strided_slice %141 {offsets = [0, 32], sizes = [8, 16], strides = [1, 1]} : vector<8x64xf32> to vector<8x16xf32>
    %155 = math.tanh %154 : vector<8x16xf32>
    %156 = vector.extract_strided_slice %141 {offsets = [0, 48], sizes = [8, 16], strides = [1, 1]} : vector<8x64xf32> to vector<8x16xf32>
    %157 = arith.negf %156 : vector<8x16xf32>
    %158 = math.exp %157 : vector<8x16xf32>
    %cst_55 = arith.constant 1.000000e+00 : f32
    %159 = vector.broadcast %cst_55 : f32 to vector<8x16xf32>
    %160 = arith.addf %159, %158 : vector<8x16xf32>
    %161 = arith.divf %159, %160 : vector<8x16xf32>
    %162 = arith.mulf %153, %106 : vector<8x16xf32>
    %163 = arith.mulf %147, %155 : vector<8x16xf32>
    %164 = arith.addf %162, %163 : vector<8x16xf32>
    %165 = math.tanh %164 : vector<8x16xf32>
    %166 = arith.mulf %161, %165 : vector<8x16xf32>
    %c5 = arith.constant 5 : index
    %c0_56 = arith.constant 0 : index
    %c0_57 = arith.constant 0 : index
    %167 = vector.load %arg10[%c5, %c0_56, %c0_57] : memref<8x2x64xf32, #tpu.memory_space<vmem>>, vector<1x2x64xf32>
    %168 = vector.shape_cast %167 : vector<1x2x64xf32> to vector<2x64xf32>
    %cst_58 = arith.constant dense<0.000000e+00> : vector<2x64xf32>
    %169 = tpu.matmul %137, %16, %cst_58 {dimension_numbers = #tpu.dot_dimension_numbers<[1], [0], [0], [1], [0, 0, 1, 1], [], []>} : vector<2x16xf32>, vector<16x64xf32>, vector<2x64xf32> -> vector<2x64xf32>
    %170 = arith.addf %168, %169 : vector<2x64xf32>
    %171 = vector.extract_strided_slice %170 {offsets = [0, 0], sizes = [2, 16], strides = [1, 1]} : vector<2x64xf32> to vector<2x16xf32>
    %172 = arith.negf %171 : vector<2x16xf32>
    %173 = math.exp %172 : vector<2x16xf32>
    %cst_59 = arith.constant 1.000000e+00 : f32
    %174 = vector.broadcast %cst_59 : f32 to vector<2x16xf32>
    %175 = arith.addf %174, %173 : vector<2x16xf32>
    %176 = arith.divf %174, %175 : vector<2x16xf32>
    %177 = vector.extract_strided_slice %170 {offsets = [0, 16], sizes = [2, 16], strides = [1, 1]} : vector<2x64xf32> to vector<2x16xf32>
    %178 = arith.negf %177 : vector<2x16xf32>
    %179 = math.exp %178 : vector<2x16xf32>
    %cst_60 = arith.constant 1.000000e+00 : f32
    %180 = vector.broadcast %cst_60 : f32 to vector<2x16xf32>
    %181 = arith.addf %180, %179 : vector<2x16xf32>
    %182 = arith.divf %180, %181 : vector<2x16xf32>
    %183 = vector.extract_strided_slice %170 {offsets = [0, 32], sizes = [2, 16], strides = [1, 1]} : vector<2x64xf32> to vector<2x16xf32>
    %184 = math.tanh %183 : vector<2x16xf32>
    %185 = vector.extract_strided_slice %170 {offsets = [0, 48], sizes = [2, 16], strides = [1, 1]} : vector<2x64xf32> to vector<2x16xf32>
    %186 = arith.negf %185 : vector<2x16xf32>
    %187 = math.exp %186 : vector<2x16xf32>
    %cst_61 = arith.constant 1.000000e+00 : f32
    %188 = vector.broadcast %cst_61 : f32 to vector<2x16xf32>
    %189 = arith.addf %188, %187 : vector<2x16xf32>
    %190 = arith.divf %188, %189 : vector<2x16xf32>
    %191 = arith.mulf %182, %135 : vector<2x16xf32>
    %192 = arith.mulf %176, %184 : vector<2x16xf32>
    %193 = arith.addf %191, %192 : vector<2x16xf32>
    %194 = math.tanh %193 : vector<2x16xf32>
    %195 = arith.mulf %190, %194 : vector<2x16xf32>
    %c26 = arith.constant 26 : index
    %c0_62 = arith.constant 0 : index
    %c0_63 = arith.constant 0 : index
    %196 = vector.load %arg11[%c26, %c0_62, %c0_63] : memref<30x8x64xf32, #tpu.memory_space<vmem>>, vector<1x8x64xf32>
    %197 = vector.shape_cast %196 : vector<1x8x64xf32> to vector<8x64xf32>
    %cst_64 = arith.constant dense<0.000000e+00> : vector<8x64xf32>
    %198 = tpu.matmul %166, %17, %cst_64 {dimension_numbers = #tpu.dot_dimension_numbers<[1], [0], [0], [1], [0, 0, 1, 1], [], []>} : vector<8x16xf32>, vector<16x64xf32>, vector<8x64xf32> -> vector<8x64xf32>
    %199 = arith.addf %197, %198 : vector<8x64xf32>
    %200 = vector.extract_strided_slice %199 {offsets = [0, 0], sizes = [8, 16], strides = [1, 1]} : vector<8x64xf32> to vector<8x16xf32>
    %201 = arith.negf %200 : vector<8x16xf32>
    %202 = math.exp %201 : vector<8x16xf32>
    %cst_65 = arith.constant 1.000000e+00 : f32
    %203 = vector.broadcast %cst_65 : f32 to vector<8x16xf32>
    %204 = arith.addf %203, %202 : vector<8x16xf32>
    %205 = arith.divf %203, %204 : vector<8x16xf32>
    %206 = vector.extract_strided_slice %199 {offsets = [0, 16], sizes = [8, 16], strides = [1, 1]} : vector<8x64xf32> to vector<8x16xf32>
    %207 = arith.negf %206 : vector<8x16xf32>
    %208 = math.exp %207 : vector<8x16xf32>
    %cst_66 = arith.constant 1.000000e+00 : f32
    %209 = vector.broadcast %cst_66 : f32 to vector<8x16xf32>
    %210 = arith.addf %209, %208 : vector<8x16xf32>
    %211 = arith.divf %209, %210 : vector<8x16xf32>
    %212 = vector.extract_strided_slice %199 {offsets = [0, 32], sizes = [8, 16], strides = [1, 1]} : vector<8x64xf32> to vector<8x16xf32>
    %213 = math.tanh %212 : vector<8x16xf32>
    %214 = vector.extract_strided_slice %199 {offsets = [0, 48], sizes = [8, 16], strides = [1, 1]} : vector<8x64xf32> to vector<8x16xf32>
    %215 = arith.negf %214 : vector<8x16xf32>
    %216 = math.exp %215 : vector<8x16xf32>
    %cst_67 = arith.constant 1.000000e+00 : f32
    %217 = vector.broadcast %cst_67 : f32 to vector<8x16xf32>
    %218 = arith.addf %217, %216 : vector<8x16xf32>
    %219 = arith.divf %217, %218 : vector<8x16xf32>
    %220 = arith.mulf %211, %164 : vector<8x16xf32>
    %221 = arith.mulf %205, %213 : vector<8x16xf32>
    %222 = arith.addf %220, %221 : vector<8x16xf32>
    %223 = math.tanh %222 : vector<8x16xf32>
    %224 = arith.mulf %219, %223 : vector<8x16xf32>
    %c4 = arith.constant 4 : index
    %c0_68 = arith.constant 0 : index
    %c0_69 = arith.constant 0 : index
    %225 = vector.load %arg10[%c4, %c0_68, %c0_69] : memref<8x2x64xf32, #tpu.memory_space<vmem>>, vector<1x2x64xf32>
    %226 = vector.shape_cast %225 : vector<1x2x64xf32> to vector<2x64xf32>
    %cst_70 = arith.constant dense<0.000000e+00> : vector<2x64xf32>
    %227 = tpu.matmul %195, %16, %cst_70 {dimension_numbers = #tpu.dot_dimension_numbers<[1], [0], [0], [1], [0, 0, 1, 1], [], []>} : vector<2x16xf32>, vector<16x64xf32>, vector<2x64xf32> -> vector<2x64xf32>
    %228 = arith.addf %226, %227 : vector<2x64xf32>
    %229 = vector.extract_strided_slice %228 {offsets = [0, 0], sizes = [2, 16], strides = [1, 1]} : vector<2x64xf32> to vector<2x16xf32>
    %230 = arith.negf %229 : vector<2x16xf32>
    %231 = math.exp %230 : vector<2x16xf32>
    %cst_71 = arith.constant 1.000000e+00 : f32
    %232 = vector.broadcast %cst_71 : f32 to vector<2x16xf32>
    %233 = arith.addf %232, %231 : vector<2x16xf32>
    %234 = arith.divf %232, %233 : vector<2x16xf32>
    %235 = vector.extract_strided_slice %228 {offsets = [0, 16], sizes = [2, 16], strides = [1, 1]} : vector<2x64xf32> to vector<2x16xf32>
    %236 = arith.negf %235 : vector<2x16xf32>
    %237 = math.exp %236 : vector<2x16xf32>
    %cst_72 = arith.constant 1.000000e+00 : f32
    %238 = vector.broadcast %cst_72 : f32 to vector<2x16xf32>
    %239 = arith.addf %238, %237 : vector<2x16xf32>
    %240 = arith.divf %238, %239 : vector<2x16xf32>
    %241 = vector.extract_strided_slice %228 {offsets = [0, 32], sizes = [2, 16], strides = [1, 1]} : vector<2x64xf32> to vector<2x16xf32>
    %242 = math.tanh %241 : vector<2x16xf32>
    %243 = vector.extract_strided_slice %228 {offsets = [0, 48], sizes = [2, 16], strides = [1, 1]} : vector<2x64xf32> to vector<2x16xf32>
    %244 = arith.negf %243 : vector<2x16xf32>
    %245 = math.exp %244 : vector<2x16xf32>
    %cst_73 = arith.constant 1.000000e+00 : f32
    %246 = vector.broadcast %cst_73 : f32 to vector<2x16xf32>
    %247 = arith.addf %246, %245 : vector<2x16xf32>
    %248 = arith.divf %246, %247 : vector<2x16xf32>
    %249 = arith.mulf %240, %193 : vector<2x16xf32>
    %250 = arith.mulf %234, %242 : vector<2x16xf32>
    %251 = arith.addf %249, %250 : vector<2x16xf32>
    %252 = math.tanh %251 : vector<2x16xf32>
    %253 = arith.mulf %248, %252 : vector<2x16xf32>
    %c25 = arith.constant 25 : index
    %c0_74 = arith.constant 0 : index
    %c0_75 = arith.constant 0 : index
    %254 = vector.load %arg11[%c25, %c0_74, %c0_75] : memref<30x8x64xf32, #tpu.memory_space<vmem>>, vector<1x8x64xf32>
    %255 = vector.shape_cast %254 : vector<1x8x64xf32> to vector<8x64xf32>
    %cst_76 = arith.constant dense<0.000000e+00> : vector<8x64xf32>
    %256 = tpu.matmul %224, %17, %cst_76 {dimension_numbers = #tpu.dot_dimension_numbers<[1], [0], [0], [1], [0, 0, 1, 1], [], []>} : vector<8x16xf32>, vector<16x64xf32>, vector<8x64xf32> -> vector<8x64xf32>
    %257 = arith.addf %255, %256 : vector<8x64xf32>
    %258 = vector.extract_strided_slice %257 {offsets = [0, 0], sizes = [8, 16], strides = [1, 1]} : vector<8x64xf32> to vector<8x16xf32>
    %259 = arith.negf %258 : vector<8x16xf32>
    %260 = math.exp %259 : vector<8x16xf32>
    %cst_77 = arith.constant 1.000000e+00 : f32
    %261 = vector.broadcast %cst_77 : f32 to vector<8x16xf32>
    %262 = arith.addf %261, %260 : vector<8x16xf32>
    %263 = arith.divf %261, %262 : vector<8x16xf32>
    %264 = vector.extract_strided_slice %257 {offsets = [0, 16], sizes = [8, 16], strides = [1, 1]} : vector<8x64xf32> to vector<8x16xf32>
    %265 = arith.negf %264 : vector<8x16xf32>
    %266 = math.exp %265 : vector<8x16xf32>
    %cst_78 = arith.constant 1.000000e+00 : f32
    %267 = vector.broadcast %cst_78 : f32 to vector<8x16xf32>
    %268 = arith.addf %267, %266 : vector<8x16xf32>
    %269 = arith.divf %267, %268 : vector<8x16xf32>
    %270 = vector.extract_strided_slice %257 {offsets = [0, 32], sizes = [8, 16], strides = [1, 1]} : vector<8x64xf32> to vector<8x16xf32>
    %271 = math.tanh %270 : vector<8x16xf32>
    %272 = vector.extract_strided_slice %257 {offsets = [0, 48], sizes = [8, 16], strides = [1, 1]} : vector<8x64xf32> to vector<8x16xf32>
    %273 = arith.negf %272 : vector<8x16xf32>
    %274 = math.exp %273 : vector<8x16xf32>
    %cst_79 = arith.constant 1.000000e+00 : f32
    %275 = vector.broadcast %cst_79 : f32 to vector<8x16xf32>
    %276 = arith.addf %275, %274 : vector<8x16xf32>
    %277 = arith.divf %275, %276 : vector<8x16xf32>
    %278 = arith.mulf %269, %222 : vector<8x16xf32>
    %279 = arith.mulf %263, %271 : vector<8x16xf32>
    %280 = arith.addf %278, %279 : vector<8x16xf32>
    %281 = math.tanh %280 : vector<8x16xf32>
    %282 = arith.mulf %277, %281 : vector<8x16xf32>
    %c3 = arith.constant 3 : index
    %c0_80 = arith.constant 0 : index
    %c0_81 = arith.constant 0 : index
    %283 = vector.load %arg10[%c3, %c0_80, %c0_81] : memref<8x2x64xf32, #tpu.memory_space<vmem>>, vector<1x2x64xf32>
    %284 = vector.shape_cast %283 : vector<1x2x64xf32> to vector<2x64xf32>
    %cst_82 = arith.constant dense<0.000000e+00> : vector<2x64xf32>
    %285 = tpu.matmul %253, %16, %cst_82 {dimension_numbers = #tpu.dot_dimension_numbers<[1], [0], [0], [1], [0, 0, 1, 1], [], []>} : vector<2x16xf32>, vector<16x64xf32>, vector<2x64xf32> -> vector<2x64xf32>
    %286 = arith.addf %284, %285 : vector<2x64xf32>
    %287 = vector.extract_strided_slice %286 {offsets = [0, 0], sizes = [2, 16], strides = [1, 1]} : vector<2x64xf32> to vector<2x16xf32>
    %288 = arith.negf %287 : vector<2x16xf32>
    %289 = math.exp %288 : vector<2x16xf32>
    %cst_83 = arith.constant 1.000000e+00 : f32
    %290 = vector.broadcast %cst_83 : f32 to vector<2x16xf32>
    %291 = arith.addf %290, %289 : vector<2x16xf32>
    %292 = arith.divf %290, %291 : vector<2x16xf32>
    %293 = vector.extract_strided_slice %286 {offsets = [0, 16], sizes = [2, 16], strides = [1, 1]} : vector<2x64xf32> to vector<2x16xf32>
    %294 = arith.negf %293 : vector<2x16xf32>
    %295 = math.exp %294 : vector<2x16xf32>
    %cst_84 = arith.constant 1.000000e+00 : f32
    %296 = vector.broadcast %cst_84 : f32 to vector<2x16xf32>
    %297 = arith.addf %296, %295 : vector<2x16xf32>
    %298 = arith.divf %296, %297 : vector<2x16xf32>
    %299 = vector.extract_strided_slice %286 {offsets = [0, 32], sizes = [2, 16], strides = [1, 1]} : vector<2x64xf32> to vector<2x16xf32>
    %300 = math.tanh %299 : vector<2x16xf32>
    %301 = vector.extract_strided_slice %286 {offsets = [0, 48], sizes = [2, 16], strides = [1, 1]} : vector<2x64xf32> to vector<2x16xf32>
    %302 = arith.negf %301 : vector<2x16xf32>
    %303 = math.exp %302 : vector<2x16xf32>
    %cst_85 = arith.constant 1.000000e+00 : f32
    %304 = vector.broadcast %cst_85 : f32 to vector<2x16xf32>
    %305 = arith.addf %304, %303 : vector<2x16xf32>
    %306 = arith.divf %304, %305 : vector<2x16xf32>
    %307 = arith.mulf %298, %251 : vector<2x16xf32>
    %308 = arith.mulf %292, %300 : vector<2x16xf32>
    %309 = arith.addf %307, %308 : vector<2x16xf32>
    %310 = math.tanh %309 : vector<2x16xf32>
    %311 = arith.mulf %306, %310 : vector<2x16xf32>
    %c24 = arith.constant 24 : index
    %c0_86 = arith.constant 0 : index
    %c0_87 = arith.constant 0 : index
    %312 = vector.load %arg11[%c24, %c0_86, %c0_87] : memref<30x8x64xf32, #tpu.memory_space<vmem>>, vector<1x8x64xf32>
    %313 = vector.shape_cast %312 : vector<1x8x64xf32> to vector<8x64xf32>
    %cst_88 = arith.constant dense<0.000000e+00> : vector<8x64xf32>
    %314 = tpu.matmul %282, %17, %cst_88 {dimension_numbers = #tpu.dot_dimension_numbers<[1], [0], [0], [1], [0, 0, 1, 1], [], []>} : vector<8x16xf32>, vector<16x64xf32>, vector<8x64xf32> -> vector<8x64xf32>
    %315 = arith.addf %313, %314 : vector<8x64xf32>
    %316 = vector.extract_strided_slice %315 {offsets = [0, 0], sizes = [8, 16], strides = [1, 1]} : vector<8x64xf32> to vector<8x16xf32>
    %317 = arith.negf %316 : vector<8x16xf32>
    %318 = math.exp %317 : vector<8x16xf32>
    %cst_89 = arith.constant 1.000000e+00 : f32
    %319 = vector.broadcast %cst_89 : f32 to vector<8x16xf32>
    %320 = arith.addf %319, %318 : vector<8x16xf32>
    %321 = arith.divf %319, %320 : vector<8x16xf32>
    %322 = vector.extract_strided_slice %315 {offsets = [0, 16], sizes = [8, 16], strides = [1, 1]} : vector<8x64xf32> to vector<8x16xf32>
    %323 = arith.negf %322 : vector<8x16xf32>
    %324 = math.exp %323 : vector<8x16xf32>
    %cst_90 = arith.constant 1.000000e+00 : f32
    %325 = vector.broadcast %cst_90 : f32 to vector<8x16xf32>
    %326 = arith.addf %325, %324 : vector<8x16xf32>
    %327 = arith.divf %325, %326 : vector<8x16xf32>
    %328 = vector.extract_strided_slice %315 {offsets = [0, 32], sizes = [8, 16], strides = [1, 1]} : vector<8x64xf32> to vector<8x16xf32>
    %329 = math.tanh %328 : vector<8x16xf32>
    %330 = vector.extract_strided_slice %315 {offsets = [0, 48], sizes = [8, 16], strides = [1, 1]} : vector<8x64xf32> to vector<8x16xf32>
    %331 = arith.negf %330 : vector<8x16xf32>
    %332 = math.exp %331 : vector<8x16xf32>
    %cst_91 = arith.constant 1.000000e+00 : f32
    %333 = vector.broadcast %cst_91 : f32 to vector<8x16xf32>
    %334 = arith.addf %333, %332 : vector<8x16xf32>
    %335 = arith.divf %333, %334 : vector<8x16xf32>
    %336 = arith.mulf %327, %280 : vector<8x16xf32>
    %337 = arith.mulf %321, %329 : vector<8x16xf32>
    %338 = arith.addf %336, %337 : vector<8x16xf32>
    %339 = math.tanh %338 : vector<8x16xf32>
    %340 = arith.mulf %335, %339 : vector<8x16xf32>
    %c2 = arith.constant 2 : index
    %c0_92 = arith.constant 0 : index
    %c0_93 = arith.constant 0 : index
    %341 = vector.load %arg10[%c2, %c0_92, %c0_93] : memref<8x2x64xf32, #tpu.memory_space<vmem>>, vector<1x2x64xf32>
    %342 = vector.shape_cast %341 : vector<1x2x64xf32> to vector<2x64xf32>
    %cst_94 = arith.constant dense<0.000000e+00> : vector<2x64xf32>
    %343 = tpu.matmul %311, %16, %cst_94 {dimension_numbers = #tpu.dot_dimension_numbers<[1], [0], [0], [1], [0, 0, 1, 1], [], []>} : vector<2x16xf32>, vector<16x64xf32>, vector<2x64xf32> -> vector<2x64xf32>
    %344 = arith.addf %342, %343 : vector<2x64xf32>
    %345 = vector.extract_strided_slice %344 {offsets = [0, 0], sizes = [2, 16], strides = [1, 1]} : vector<2x64xf32> to vector<2x16xf32>
    %346 = arith.negf %345 : vector<2x16xf32>
    %347 = math.exp %346 : vector<2x16xf32>
    %cst_95 = arith.constant 1.000000e+00 : f32
    %348 = vector.broadcast %cst_95 : f32 to vector<2x16xf32>
    %349 = arith.addf %348, %347 : vector<2x16xf32>
    %350 = arith.divf %348, %349 : vector<2x16xf32>
    %351 = vector.extract_strided_slice %344 {offsets = [0, 16], sizes = [2, 16], strides = [1, 1]} : vector<2x64xf32> to vector<2x16xf32>
    %352 = arith.negf %351 : vector<2x16xf32>
    %353 = math.exp %352 : vector<2x16xf32>
    %cst_96 = arith.constant 1.000000e+00 : f32
    %354 = vector.broadcast %cst_96 : f32 to vector<2x16xf32>
    %355 = arith.addf %354, %353 : vector<2x16xf32>
    %356 = arith.divf %354, %355 : vector<2x16xf32>
    %357 = vector.extract_strided_slice %344 {offsets = [0, 32], sizes = [2, 16], strides = [1, 1]} : vector<2x64xf32> to vector<2x16xf32>
    %358 = math.tanh %357 : vector<2x16xf32>
    %359 = vector.extract_strided_slice %344 {offsets = [0, 48], sizes = [2, 16], strides = [1, 1]} : vector<2x64xf32> to vector<2x16xf32>
    %360 = arith.negf %359 : vector<2x16xf32>
    %361 = math.exp %360 : vector<2x16xf32>
    %cst_97 = arith.constant 1.000000e+00 : f32
    %362 = vector.broadcast %cst_97 : f32 to vector<2x16xf32>
    %363 = arith.addf %362, %361 : vector<2x16xf32>
    %364 = arith.divf %362, %363 : vector<2x16xf32>
    %365 = arith.mulf %356, %309 : vector<2x16xf32>
    %366 = arith.mulf %350, %358 : vector<2x16xf32>
    %367 = arith.addf %365, %366 : vector<2x16xf32>
    %368 = math.tanh %367 : vector<2x16xf32>
    %369 = arith.mulf %364, %368 : vector<2x16xf32>
    %c23 = arith.constant 23 : index
    %c0_98 = arith.constant 0 : index
    %c0_99 = arith.constant 0 : index
    %370 = vector.load %arg11[%c23, %c0_98, %c0_99] : memref<30x8x64xf32, #tpu.memory_space<vmem>>, vector<1x8x64xf32>
    %371 = vector.shape_cast %370 : vector<1x8x64xf32> to vector<8x64xf32>
    %cst_100 = arith.constant dense<0.000000e+00> : vector<8x64xf32>
    %372 = tpu.matmul %340, %17, %cst_100 {dimension_numbers = #tpu.dot_dimension_numbers<[1], [0], [0], [1], [0, 0, 1, 1], [], []>} : vector<8x16xf32>, vector<16x64xf32>, vector<8x64xf32> -> vector<8x64xf32>
    %373 = arith.addf %371, %372 : vector<8x64xf32>
    %374 = vector.extract_strided_slice %373 {offsets = [0, 0], sizes = [8, 16], strides = [1, 1]} : vector<8x64xf32> to vector<8x16xf32>
    %375 = arith.negf %374 : vector<8x16xf32>
    %376 = math.exp %375 : vector<8x16xf32>
    %cst_101 = arith.constant 1.000000e+00 : f32
    %377 = vector.broadcast %cst_101 : f32 to vector<8x16xf32>
    %378 = arith.addf %377, %376 : vector<8x16xf32>
    %379 = arith.divf %377, %378 : vector<8x16xf32>
    %380 = vector.extract_strided_slice %373 {offsets = [0, 16], sizes = [8, 16], strides = [1, 1]} : vector<8x64xf32> to vector<8x16xf32>
    %381 = arith.negf %380 : vector<8x16xf32>
    %382 = math.exp %381 : vector<8x16xf32>
    %cst_102 = arith.constant 1.000000e+00 : f32
    %383 = vector.broadcast %cst_102 : f32 to vector<8x16xf32>
    %384 = arith.addf %383, %382 : vector<8x16xf32>
    %385 = arith.divf %383, %384 : vector<8x16xf32>
    %386 = vector.extract_strided_slice %373 {offsets = [0, 32], sizes = [8, 16], strides = [1, 1]} : vector<8x64xf32> to vector<8x16xf32>
    %387 = math.tanh %386 : vector<8x16xf32>
    %388 = vector.extract_strided_slice %373 {offsets = [0, 48], sizes = [8, 16], strides = [1, 1]} : vector<8x64xf32> to vector<8x16xf32>
    %389 = arith.negf %388 : vector<8x16xf32>
    %390 = math.exp %389 : vector<8x16xf32>
    %cst_103 = arith.constant 1.000000e+00 : f32
    %391 = vector.broadcast %cst_103 : f32 to vector<8x16xf32>
    %392 = arith.addf %391, %390 : vector<8x16xf32>
    %393 = arith.divf %391, %392 : vector<8x16xf32>
    %394 = arith.mulf %385, %338 : vector<8x16xf32>
    %395 = arith.mulf %379, %387 : vector<8x16xf32>
    %396 = arith.addf %394, %395 : vector<8x16xf32>
    %397 = math.tanh %396 : vector<8x16xf32>
    %398 = arith.mulf %393, %397 : vector<8x16xf32>
    %c1 = arith.constant 1 : index
    %c0_104 = arith.constant 0 : index
    %c0_105 = arith.constant 0 : index
    %399 = vector.load %arg10[%c1, %c0_104, %c0_105] : memref<8x2x64xf32, #tpu.memory_space<vmem>>, vector<1x2x64xf32>
    %400 = vector.shape_cast %399 : vector<1x2x64xf32> to vector<2x64xf32>
    %cst_106 = arith.constant dense<0.000000e+00> : vector<2x64xf32>
    %401 = tpu.matmul %369, %16, %cst_106 {dimension_numbers = #tpu.dot_dimension_numbers<[1], [0], [0], [1], [0, 0, 1, 1], [], []>} : vector<2x16xf32>, vector<16x64xf32>, vector<2x64xf32> -> vector<2x64xf32>
    %402 = arith.addf %400, %401 : vector<2x64xf32>
    %403 = vector.extract_strided_slice %402 {offsets = [0, 0], sizes = [2, 16], strides = [1, 1]} : vector<2x64xf32> to vector<2x16xf32>
    %404 = arith.negf %403 : vector<2x16xf32>
    %405 = math.exp %404 : vector<2x16xf32>
    %cst_107 = arith.constant 1.000000e+00 : f32
    %406 = vector.broadcast %cst_107 : f32 to vector<2x16xf32>
    %407 = arith.addf %406, %405 : vector<2x16xf32>
    %408 = arith.divf %406, %407 : vector<2x16xf32>
    %409 = vector.extract_strided_slice %402 {offsets = [0, 16], sizes = [2, 16], strides = [1, 1]} : vector<2x64xf32> to vector<2x16xf32>
    %410 = arith.negf %409 : vector<2x16xf32>
    %411 = math.exp %410 : vector<2x16xf32>
    %cst_108 = arith.constant 1.000000e+00 : f32
    %412 = vector.broadcast %cst_108 : f32 to vector<2x16xf32>
    %413 = arith.addf %412, %411 : vector<2x16xf32>
    %414 = arith.divf %412, %413 : vector<2x16xf32>
    %415 = vector.extract_strided_slice %402 {offsets = [0, 32], sizes = [2, 16], strides = [1, 1]} : vector<2x64xf32> to vector<2x16xf32>
    %416 = math.tanh %415 : vector<2x16xf32>
    %417 = vector.extract_strided_slice %402 {offsets = [0, 48], sizes = [2, 16], strides = [1, 1]} : vector<2x64xf32> to vector<2x16xf32>
    %418 = arith.negf %417 : vector<2x16xf32>
    %419 = math.exp %418 : vector<2x16xf32>
    %cst_109 = arith.constant 1.000000e+00 : f32
    %420 = vector.broadcast %cst_109 : f32 to vector<2x16xf32>
    %421 = arith.addf %420, %419 : vector<2x16xf32>
    %422 = arith.divf %420, %421 : vector<2x16xf32>
    %423 = arith.mulf %414, %367 : vector<2x16xf32>
    %424 = arith.mulf %408, %416 : vector<2x16xf32>
    %425 = arith.addf %423, %424 : vector<2x16xf32>
    %426 = math.tanh %425 : vector<2x16xf32>
    %427 = arith.mulf %422, %426 : vector<2x16xf32>
    %c22 = arith.constant 22 : index
    %c0_110 = arith.constant 0 : index
    %c0_111 = arith.constant 0 : index
    %428 = vector.load %arg11[%c22, %c0_110, %c0_111] : memref<30x8x64xf32, #tpu.memory_space<vmem>>, vector<1x8x64xf32>
    %429 = vector.shape_cast %428 : vector<1x8x64xf32> to vector<8x64xf32>
    %cst_112 = arith.constant dense<0.000000e+00> : vector<8x64xf32>
    %430 = tpu.matmul %398, %17, %cst_112 {dimension_numbers = #tpu.dot_dimension_numbers<[1], [0], [0], [1], [0, 0, 1, 1], [], []>} : vector<8x16xf32>, vector<16x64xf32>, vector<8x64xf32> -> vector<8x64xf32>
    %431 = arith.addf %429, %430 : vector<8x64xf32>
    %432 = vector.extract_strided_slice %431 {offsets = [0, 0], sizes = [8, 16], strides = [1, 1]} : vector<8x64xf32> to vector<8x16xf32>
    %433 = arith.negf %432 : vector<8x16xf32>
    %434 = math.exp %433 : vector<8x16xf32>
    %cst_113 = arith.constant 1.000000e+00 : f32
    %435 = vector.broadcast %cst_113 : f32 to vector<8x16xf32>
    %436 = arith.addf %435, %434 : vector<8x16xf32>
    %437 = arith.divf %435, %436 : vector<8x16xf32>
    %438 = vector.extract_strided_slice %431 {offsets = [0, 16], sizes = [8, 16], strides = [1, 1]} : vector<8x64xf32> to vector<8x16xf32>
    %439 = arith.negf %438 : vector<8x16xf32>
    %440 = math.exp %439 : vector<8x16xf32>
    %cst_114 = arith.constant 1.000000e+00 : f32
    %441 = vector.broadcast %cst_114 : f32 to vector<8x16xf32>
    %442 = arith.addf %441, %440 : vector<8x16xf32>
    %443 = arith.divf %441, %442 : vector<8x16xf32>
    %444 = vector.extract_strided_slice %431 {offsets = [0, 32], sizes = [8, 16], strides = [1, 1]} : vector<8x64xf32> to vector<8x16xf32>
    %445 = math.tanh %444 : vector<8x16xf32>
    %446 = vector.extract_strided_slice %431 {offsets = [0, 48], sizes = [8, 16], strides = [1, 1]} : vector<8x64xf32> to vector<8x16xf32>
    %447 = arith.negf %446 : vector<8x16xf32>
    %448 = math.exp %447 : vector<8x16xf32>
    %cst_115 = arith.constant 1.000000e+00 : f32
    %449 = vector.broadcast %cst_115 : f32 to vector<8x16xf32>
    %450 = arith.addf %449, %448 : vector<8x16xf32>
    %451 = arith.divf %449, %450 : vector<8x16xf32>
    %452 = arith.mulf %443, %396 : vector<8x16xf32>
    %453 = arith.mulf %437, %445 : vector<8x16xf32>
    %454 = arith.addf %452, %453 : vector<8x16xf32>
    %455 = math.tanh %454 : vector<8x16xf32>
    %456 = arith.mulf %451, %455 : vector<8x16xf32>
    %c0_116 = arith.constant 0 : index
    %c0_117 = arith.constant 0 : index
    %c0_118 = arith.constant 0 : index
    %457 = vector.load %arg10[%c0_116, %c0_117, %c0_118] : memref<8x2x64xf32, #tpu.memory_space<vmem>>, vector<1x2x64xf32>
    %458 = vector.shape_cast %457 : vector<1x2x64xf32> to vector<2x64xf32>
    %cst_119 = arith.constant dense<0.000000e+00> : vector<2x64xf32>
    %459 = tpu.matmul %427, %16, %cst_119 {dimension_numbers = #tpu.dot_dimension_numbers<[1], [0], [0], [1], [0, 0, 1, 1], [], []>} : vector<2x16xf32>, vector<16x64xf32>, vector<2x64xf32> -> vector<2x64xf32>
    %460 = arith.addf %458, %459 : vector<2x64xf32>
    %461 = vector.extract_strided_slice %460 {offsets = [0, 0], sizes = [2, 16], strides = [1, 1]} : vector<2x64xf32> to vector<2x16xf32>
    %462 = arith.negf %461 : vector<2x16xf32>
    %463 = math.exp %462 : vector<2x16xf32>
    %cst_120 = arith.constant 1.000000e+00 : f32
    %464 = vector.broadcast %cst_120 : f32 to vector<2x16xf32>
    %465 = arith.addf %464, %463 : vector<2x16xf32>
    %466 = arith.divf %464, %465 : vector<2x16xf32>
    %467 = vector.extract_strided_slice %460 {offsets = [0, 16], sizes = [2, 16], strides = [1, 1]} : vector<2x64xf32> to vector<2x16xf32>
    %468 = arith.negf %467 : vector<2x16xf32>
    %469 = math.exp %468 : vector<2x16xf32>
    %cst_121 = arith.constant 1.000000e+00 : f32
    %470 = vector.broadcast %cst_121 : f32 to vector<2x16xf32>
    %471 = arith.addf %470, %469 : vector<2x16xf32>
    %472 = arith.divf %470, %471 : vector<2x16xf32>
    %473 = vector.extract_strided_slice %460 {offsets = [0, 32], sizes = [2, 16], strides = [1, 1]} : vector<2x64xf32> to vector<2x16xf32>
    %474 = math.tanh %473 : vector<2x16xf32>
    %475 = vector.extract_strided_slice %460 {offsets = [0, 48], sizes = [2, 16], strides = [1, 1]} : vector<2x64xf32> to vector<2x16xf32>
    %476 = arith.negf %475 : vector<2x16xf32>
    %477 = math.exp %476 : vector<2x16xf32>
    %cst_122 = arith.constant 1.000000e+00 : f32
    %478 = vector.broadcast %cst_122 : f32 to vector<2x16xf32>
    %479 = arith.addf %478, %477 : vector<2x16xf32>
    %480 = arith.divf %478, %479 : vector<2x16xf32>
    %481 = arith.mulf %472, %425 : vector<2x16xf32>
    %482 = arith.mulf %466, %474 : vector<2x16xf32>
    %483 = arith.addf %481, %482 : vector<2x16xf32>
    %484 = math.tanh %483 : vector<2x16xf32>
    %485 = arith.mulf %480, %484 : vector<2x16xf32>
    %c21 = arith.constant 21 : index
    %c0_123 = arith.constant 0 : index
    %c0_124 = arith.constant 0 : index
    %486 = vector.load %arg11[%c21, %c0_123, %c0_124] : memref<30x8x64xf32, #tpu.memory_space<vmem>>, vector<1x8x64xf32>
    %487 = vector.shape_cast %486 : vector<1x8x64xf32> to vector<8x64xf32>
    %cst_125 = arith.constant dense<0.000000e+00> : vector<8x64xf32>
    %488 = tpu.matmul %456, %17, %cst_125 {dimension_numbers = #tpu.dot_dimension_numbers<[1], [0], [0], [1], [0, 0, 1, 1], [], []>} : vector<8x16xf32>, vector<16x64xf32>, vector<8x64xf32> -> vector<8x64xf32>
    %489 = arith.addf %487, %488 : vector<8x64xf32>
    %490 = vector.extract_strided_slice %489 {offsets = [0, 0], sizes = [8, 16], strides = [1, 1]} : vector<8x64xf32> to vector<8x16xf32>
    %491 = arith.negf %490 : vector<8x16xf32>
    %492 = math.exp %491 : vector<8x16xf32>
    %cst_126 = arith.constant 1.000000e+00 : f32
    %493 = vector.broadcast %cst_126 : f32 to vector<8x16xf32>
    %494 = arith.addf %493, %492 : vector<8x16xf32>
    %495 = arith.divf %493, %494 : vector<8x16xf32>
    %496 = vector.extract_strided_slice %489 {offsets = [0, 16], sizes = [8, 16], strides = [1, 1]} : vector<8x64xf32> to vector<8x16xf32>
    %497 = arith.negf %496 : vector<8x16xf32>
    %498 = math.exp %497 : vector<8x16xf32>
    %cst_127 = arith.constant 1.000000e+00 : f32
    %499 = vector.broadcast %cst_127 : f32 to vector<8x16xf32>
    %500 = arith.addf %499, %498 : vector<8x16xf32>
    %501 = arith.divf %499, %500 : vector<8x16xf32>
    %502 = vector.extract_strided_slice %489 {offsets = [0, 32], sizes = [8, 16], strides = [1, 1]} : vector<8x64xf32> to vector<8x16xf32>
    %503 = math.tanh %502 : vector<8x16xf32>
    %504 = vector.extract_strided_slice %489 {offsets = [0, 48], sizes = [8, 16], strides = [1, 1]} : vector<8x64xf32> to vector<8x16xf32>
    %505 = arith.negf %504 : vector<8x16xf32>
    %506 = math.exp %505 : vector<8x16xf32>
    %cst_128 = arith.constant 1.000000e+00 : f32
    %507 = vector.broadcast %cst_128 : f32 to vector<8x16xf32>
    %508 = arith.addf %507, %506 : vector<8x16xf32>
    %509 = arith.divf %507, %508 : vector<8x16xf32>
    %510 = arith.mulf %501, %454 : vector<8x16xf32>
    %511 = arith.mulf %495, %503 : vector<8x16xf32>
    %512 = arith.addf %510, %511 : vector<8x16xf32>
    %513 = math.tanh %512 : vector<8x16xf32>
    %514 = arith.mulf %509, %513 : vector<8x16xf32>
    %c20 = arith.constant 20 : index
    %c0_129 = arith.constant 0 : index
    %c0_130 = arith.constant 0 : index
    %515 = vector.load %arg11[%c20, %c0_129, %c0_130] : memref<30x8x64xf32, #tpu.memory_space<vmem>>, vector<1x8x64xf32>
    %516 = vector.shape_cast %515 : vector<1x8x64xf32> to vector<8x64xf32>
    %cst_131 = arith.constant dense<0.000000e+00> : vector<8x64xf32>
    %517 = tpu.matmul %514, %17, %cst_131 {dimension_numbers = #tpu.dot_dimension_numbers<[1], [0], [0], [1], [0, 0, 1, 1], [], []>} : vector<8x16xf32>, vector<16x64xf32>, vector<8x64xf32> -> vector<8x64xf32>
    %518 = arith.addf %516, %517 : vector<8x64xf32>
    %519 = vector.extract_strided_slice %518 {offsets = [0, 0], sizes = [8, 16], strides = [1, 1]} : vector<8x64xf32> to vector<8x16xf32>
    %520 = arith.negf %519 : vector<8x16xf32>
    %521 = math.exp %520 : vector<8x16xf32>
    %cst_132 = arith.constant 1.000000e+00 : f32
    %522 = vector.broadcast %cst_132 : f32 to vector<8x16xf32>
    %523 = arith.addf %522, %521 : vector<8x16xf32>
    %524 = arith.divf %522, %523 : vector<8x16xf32>
    %525 = vector.extract_strided_slice %518 {offsets = [0, 16], sizes = [8, 16], strides = [1, 1]} : vector<8x64xf32> to vector<8x16xf32>
    %526 = arith.negf %525 : vector<8x16xf32>
    %527 = math.exp %526 : vector<8x16xf32>
    %cst_133 = arith.constant 1.000000e+00 : f32
    %528 = vector.broadcast %cst_133 : f32 to vector<8x16xf32>
    %529 = arith.addf %528, %527 : vector<8x16xf32>
    %530 = arith.divf %528, %529 : vector<8x16xf32>
    %531 = vector.extract_strided_slice %518 {offsets = [0, 32], sizes = [8, 16], strides = [1, 1]} : vector<8x64xf32> to vector<8x16xf32>
    %532 = math.tanh %531 : vector<8x16xf32>
    %533 = vector.extract_strided_slice %518 {offsets = [0, 48], sizes = [8, 16], strides = [1, 1]} : vector<8x64xf32> to vector<8x16xf32>
    %534 = arith.negf %533 : vector<8x16xf32>
    %535 = math.exp %534 : vector<8x16xf32>
    %cst_134 = arith.constant 1.000000e+00 : f32
    %536 = vector.broadcast %cst_134 : f32 to vector<8x16xf32>
    %537 = arith.addf %536, %535 : vector<8x16xf32>
    %538 = arith.divf %536, %537 : vector<8x16xf32>
    %539 = arith.mulf %530, %512 : vector<8x16xf32>
    %540 = arith.mulf %524, %532 : vector<8x16xf32>
    %541 = arith.addf %539, %540 : vector<8x16xf32>
    %542 = math.tanh %541 : vector<8x16xf32>
    %543 = arith.mulf %538, %542 : vector<8x16xf32>
    %c19 = arith.constant 19 : index
    %c0_135 = arith.constant 0 : index
    %c0_136 = arith.constant 0 : index
    %544 = vector.load %arg11[%c19, %c0_135, %c0_136] : memref<30x8x64xf32, #tpu.memory_space<vmem>>, vector<1x8x64xf32>
    %545 = vector.shape_cast %544 : vector<1x8x64xf32> to vector<8x64xf32>
    %cst_137 = arith.constant dense<0.000000e+00> : vector<8x64xf32>
    %546 = tpu.matmul %543, %17, %cst_137 {dimension_numbers = #tpu.dot_dimension_numbers<[1], [0], [0], [1], [0, 0, 1, 1], [], []>} : vector<8x16xf32>, vector<16x64xf32>, vector<8x64xf32> -> vector<8x64xf32>
    %547 = arith.addf %545, %546 : vector<8x64xf32>
    %548 = vector.extract_strided_slice %547 {offsets = [0, 0], sizes = [8, 16], strides = [1, 1]} : vector<8x64xf32> to vector<8x16xf32>
    %549 = arith.negf %548 : vector<8x16xf32>
    %550 = math.exp %549 : vector<8x16xf32>
    %cst_138 = arith.constant 1.000000e+00 : f32
    %551 = vector.broadcast %cst_138 : f32 to vector<8x16xf32>
    %552 = arith.addf %551, %550 : vector<8x16xf32>
    %553 = arith.divf %551, %552 : vector<8x16xf32>
    %554 = vector.extract_strided_slice %547 {offsets = [0, 16], sizes = [8, 16], strides = [1, 1]} : vector<8x64xf32> to vector<8x16xf32>
    %555 = arith.negf %554 : vector<8x16xf32>
    %556 = math.exp %555 : vector<8x16xf32>
    %cst_139 = arith.constant 1.000000e+00 : f32
    %557 = vector.broadcast %cst_139 : f32 to vector<8x16xf32>
    %558 = arith.addf %557, %556 : vector<8x16xf32>
    %559 = arith.divf %557, %558 : vector<8x16xf32>
    %560 = vector.extract_strided_slice %547 {offsets = [0, 32], sizes = [8, 16], strides = [1, 1]} : vector<8x64xf32> to vector<8x16xf32>
    %561 = math.tanh %560 : vector<8x16xf32>
    %562 = vector.extract_strided_slice %547 {offsets = [0, 48], sizes = [8, 16], strides = [1, 1]} : vector<8x64xf32> to vector<8x16xf32>
    %563 = arith.negf %562 : vector<8x16xf32>
    %564 = math.exp %563 : vector<8x16xf32>
    %cst_140 = arith.constant 1.000000e+00 : f32
    %565 = vector.broadcast %cst_140 : f32 to vector<8x16xf32>
    %566 = arith.addf %565, %564 : vector<8x16xf32>
    %567 = arith.divf %565, %566 : vector<8x16xf32>
    %568 = arith.mulf %559, %541 : vector<8x16xf32>
    %569 = arith.mulf %553, %561 : vector<8x16xf32>
    %570 = arith.addf %568, %569 : vector<8x16xf32>
    %571 = math.tanh %570 : vector<8x16xf32>
    %572 = arith.mulf %567, %571 : vector<8x16xf32>
    %c18 = arith.constant 18 : index
    %c0_141 = arith.constant 0 : index
    %c0_142 = arith.constant 0 : index
    %573 = vector.load %arg11[%c18, %c0_141, %c0_142] : memref<30x8x64xf32, #tpu.memory_space<vmem>>, vector<1x8x64xf32>
    %574 = vector.shape_cast %573 : vector<1x8x64xf32> to vector<8x64xf32>
    %cst_143 = arith.constant dense<0.000000e+00> : vector<8x64xf32>
    %575 = tpu.matmul %572, %17, %cst_143 {dimension_numbers = #tpu.dot_dimension_numbers<[1], [0], [0], [1], [0, 0, 1, 1], [], []>} : vector<8x16xf32>, vector<16x64xf32>, vector<8x64xf32> -> vector<8x64xf32>
    %576 = arith.addf %574, %575 : vector<8x64xf32>
    %577 = vector.extract_strided_slice %576 {offsets = [0, 0], sizes = [8, 16], strides = [1, 1]} : vector<8x64xf32> to vector<8x16xf32>
    %578 = arith.negf %577 : vector<8x16xf32>
    %579 = math.exp %578 : vector<8x16xf32>
    %cst_144 = arith.constant 1.000000e+00 : f32
    %580 = vector.broadcast %cst_144 : f32 to vector<8x16xf32>
    %581 = arith.addf %580, %579 : vector<8x16xf32>
    %582 = arith.divf %580, %581 : vector<8x16xf32>
    %583 = vector.extract_strided_slice %576 {offsets = [0, 16], sizes = [8, 16], strides = [1, 1]} : vector<8x64xf32> to vector<8x16xf32>
    %584 = arith.negf %583 : vector<8x16xf32>
    %585 = math.exp %584 : vector<8x16xf32>
    %cst_145 = arith.constant 1.000000e+00 : f32
    %586 = vector.broadcast %cst_145 : f32 to vector<8x16xf32>
    %587 = arith.addf %586, %585 : vector<8x16xf32>
    %588 = arith.divf %586, %587 : vector<8x16xf32>
    %589 = vector.extract_strided_slice %576 {offsets = [0, 32], sizes = [8, 16], strides = [1, 1]} : vector<8x64xf32> to vector<8x16xf32>
    %590 = math.tanh %589 : vector<8x16xf32>
    %591 = vector.extract_strided_slice %576 {offsets = [0, 48], sizes = [8, 16], strides = [1, 1]} : vector<8x64xf32> to vector<8x16xf32>
    %592 = arith.negf %591 : vector<8x16xf32>
    %593 = math.exp %592 : vector<8x16xf32>
    %cst_146 = arith.constant 1.000000e+00 : f32
    %594 = vector.broadcast %cst_146 : f32 to vector<8x16xf32>
    %595 = arith.addf %594, %593 : vector<8x16xf32>
    %596 = arith.divf %594, %595 : vector<8x16xf32>
    %597 = arith.mulf %588, %570 : vector<8x16xf32>
    %598 = arith.mulf %582, %590 : vector<8x16xf32>
    %599 = arith.addf %597, %598 : vector<8x16xf32>
    %600 = math.tanh %599 : vector<8x16xf32>
    %601 = arith.mulf %596, %600 : vector<8x16xf32>
    %c17 = arith.constant 17 : index
    %c0_147 = arith.constant 0 : index
    %c0_148 = arith.constant 0 : index
    %602 = vector.load %arg11[%c17, %c0_147, %c0_148] : memref<30x8x64xf32, #tpu.memory_space<vmem>>, vector<1x8x64xf32>
    %603 = vector.shape_cast %602 : vector<1x8x64xf32> to vector<8x64xf32>
    %cst_149 = arith.constant dense<0.000000e+00> : vector<8x64xf32>
    %604 = tpu.matmul %601, %17, %cst_149 {dimension_numbers = #tpu.dot_dimension_numbers<[1], [0], [0], [1], [0, 0, 1, 1], [], []>} : vector<8x16xf32>, vector<16x64xf32>, vector<8x64xf32> -> vector<8x64xf32>
    %605 = arith.addf %603, %604 : vector<8x64xf32>
    %606 = vector.extract_strided_slice %605 {offsets = [0, 0], sizes = [8, 16], strides = [1, 1]} : vector<8x64xf32> to vector<8x16xf32>
    %607 = arith.negf %606 : vector<8x16xf32>
    %608 = math.exp %607 : vector<8x16xf32>
    %cst_150 = arith.constant 1.000000e+00 : f32
    %609 = vector.broadcast %cst_150 : f32 to vector<8x16xf32>
    %610 = arith.addf %609, %608 : vector<8x16xf32>
    %611 = arith.divf %609, %610 : vector<8x16xf32>
    %612 = vector.extract_strided_slice %605 {offsets = [0, 16], sizes = [8, 16], strides = [1, 1]} : vector<8x64xf32> to vector<8x16xf32>
    %613 = arith.negf %612 : vector<8x16xf32>
    %614 = math.exp %613 : vector<8x16xf32>
    %cst_151 = arith.constant 1.000000e+00 : f32
    %615 = vector.broadcast %cst_151 : f32 to vector<8x16xf32>
    %616 = arith.addf %615, %614 : vector<8x16xf32>
    %617 = arith.divf %615, %616 : vector<8x16xf32>
    %618 = vector.extract_strided_slice %605 {offsets = [0, 32], sizes = [8, 16], strides = [1, 1]} : vector<8x64xf32> to vector<8x16xf32>
    %619 = math.tanh %618 : vector<8x16xf32>
    %620 = vector.extract_strided_slice %605 {offsets = [0, 48], sizes = [8, 16], strides = [1, 1]} : vector<8x64xf32> to vector<8x16xf32>
    %621 = arith.negf %620 : vector<8x16xf32>
    %622 = math.exp %621 : vector<8x16xf32>
    %cst_152 = arith.constant 1.000000e+00 : f32
    %623 = vector.broadcast %cst_152 : f32 to vector<8x16xf32>
    %624 = arith.addf %623, %622 : vector<8x16xf32>
    %625 = arith.divf %623, %624 : vector<8x16xf32>
    %626 = arith.mulf %617, %599 : vector<8x16xf32>
    %627 = arith.mulf %611, %619 : vector<8x16xf32>
    %628 = arith.addf %626, %627 : vector<8x16xf32>
    %629 = math.tanh %628 : vector<8x16xf32>
    %630 = arith.mulf %625, %629 : vector<8x16xf32>
    %c16 = arith.constant 16 : index
    %c0_153 = arith.constant 0 : index
    %c0_154 = arith.constant 0 : index
    %631 = vector.load %arg11[%c16, %c0_153, %c0_154] : memref<30x8x64xf32, #tpu.memory_space<vmem>>, vector<1x8x64xf32>
    %632 = vector.shape_cast %631 : vector<1x8x64xf32> to vector<8x64xf32>
    %cst_155 = arith.constant dense<0.000000e+00> : vector<8x64xf32>
    %633 = tpu.matmul %630, %17, %cst_155 {dimension_numbers = #tpu.dot_dimension_numbers<[1], [0], [0], [1], [0, 0, 1, 1], [], []>} : vector<8x16xf32>, vector<16x64xf32>, vector<8x64xf32> -> vector<8x64xf32>
    %634 = arith.addf %632, %633 : vector<8x64xf32>
    %635 = vector.extract_strided_slice %634 {offsets = [0, 0], sizes = [8, 16], strides = [1, 1]} : vector<8x64xf32> to vector<8x16xf32>
    %636 = arith.negf %635 : vector<8x16xf32>
    %637 = math.exp %636 : vector<8x16xf32>
    %cst_156 = arith.constant 1.000000e+00 : f32
    %638 = vector.broadcast %cst_156 : f32 to vector<8x16xf32>
    %639 = arith.addf %638, %637 : vector<8x16xf32>
    %640 = arith.divf %638, %639 : vector<8x16xf32>
    %641 = vector.extract_strided_slice %634 {offsets = [0, 16], sizes = [8, 16], strides = [1, 1]} : vector<8x64xf32> to vector<8x16xf32>
    %642 = arith.negf %641 : vector<8x16xf32>
    %643 = math.exp %642 : vector<8x16xf32>
    %cst_157 = arith.constant 1.000000e+00 : f32
    %644 = vector.broadcast %cst_157 : f32 to vector<8x16xf32>
    %645 = arith.addf %644, %643 : vector<8x16xf32>
    %646 = arith.divf %644, %645 : vector<8x16xf32>
    %647 = vector.extract_strided_slice %634 {offsets = [0, 32], sizes = [8, 16], strides = [1, 1]} : vector<8x64xf32> to vector<8x16xf32>
    %648 = math.tanh %647 : vector<8x16xf32>
    %649 = vector.extract_strided_slice %634 {offsets = [0, 48], sizes = [8, 16], strides = [1, 1]} : vector<8x64xf32> to vector<8x16xf32>
    %650 = arith.negf %649 : vector<8x16xf32>
    %651 = math.exp %650 : vector<8x16xf32>
    %cst_158 = arith.constant 1.000000e+00 : f32
    %652 = vector.broadcast %cst_158 : f32 to vector<8x16xf32>
    %653 = arith.addf %652, %651 : vector<8x16xf32>
    %654 = arith.divf %652, %653 : vector<8x16xf32>
    %655 = arith.mulf %646, %628 : vector<8x16xf32>
    %656 = arith.mulf %640, %648 : vector<8x16xf32>
    %657 = arith.addf %655, %656 : vector<8x16xf32>
    %658 = math.tanh %657 : vector<8x16xf32>
    %659 = arith.mulf %654, %658 : vector<8x16xf32>
    %c15 = arith.constant 15 : index
    %c0_159 = arith.constant 0 : index
    %c0_160 = arith.constant 0 : index
    %660 = vector.load %arg11[%c15, %c0_159, %c0_160] : memref<30x8x64xf32, #tpu.memory_space<vmem>>, vector<1x8x64xf32>
    %661 = vector.shape_cast %660 : vector<1x8x64xf32> to vector<8x64xf32>
    %cst_161 = arith.constant dense<0.000000e+00> : vector<8x64xf32>
    %662 = tpu.matmul %659, %17, %cst_161 {dimension_numbers = #tpu.dot_dimension_numbers<[1], [0], [0], [1], [0, 0, 1, 1], [], []>} : vector<8x16xf32>, vector<16x64xf32>, vector<8x64xf32> -> vector<8x64xf32>
    %663 = arith.addf %661, %662 : vector<8x64xf32>
    %664 = vector.extract_strided_slice %663 {offsets = [0, 0], sizes = [8, 16], strides = [1, 1]} : vector<8x64xf32> to vector<8x16xf32>
    %665 = arith.negf %664 : vector<8x16xf32>
    %666 = math.exp %665 : vector<8x16xf32>
    %cst_162 = arith.constant 1.000000e+00 : f32
    %667 = vector.broadcast %cst_162 : f32 to vector<8x16xf32>
    %668 = arith.addf %667, %666 : vector<8x16xf32>
    %669 = arith.divf %667, %668 : vector<8x16xf32>
    %670 = vector.extract_strided_slice %663 {offsets = [0, 16], sizes = [8, 16], strides = [1, 1]} : vector<8x64xf32> to vector<8x16xf32>
    %671 = arith.negf %670 : vector<8x16xf32>
    %672 = math.exp %671 : vector<8x16xf32>
    %cst_163 = arith.constant 1.000000e+00 : f32
    %673 = vector.broadcast %cst_163 : f32 to vector<8x16xf32>
    %674 = arith.addf %673, %672 : vector<8x16xf32>
    %675 = arith.divf %673, %674 : vector<8x16xf32>
    %676 = vector.extract_strided_slice %663 {offsets = [0, 32], sizes = [8, 16], strides = [1, 1]} : vector<8x64xf32> to vector<8x16xf32>
    %677 = math.tanh %676 : vector<8x16xf32>
    %678 = vector.extract_strided_slice %663 {offsets = [0, 48], sizes = [8, 16], strides = [1, 1]} : vector<8x64xf32> to vector<8x16xf32>
    %679 = arith.negf %678 : vector<8x16xf32>
    %680 = math.exp %679 : vector<8x16xf32>
    %cst_164 = arith.constant 1.000000e+00 : f32
    %681 = vector.broadcast %cst_164 : f32 to vector<8x16xf32>
    %682 = arith.addf %681, %680 : vector<8x16xf32>
    %683 = arith.divf %681, %682 : vector<8x16xf32>
    %684 = arith.mulf %675, %657 : vector<8x16xf32>
    %685 = arith.mulf %669, %677 : vector<8x16xf32>
    %686 = arith.addf %684, %685 : vector<8x16xf32>
    %687 = math.tanh %686 : vector<8x16xf32>
    %688 = arith.mulf %683, %687 : vector<8x16xf32>
    %c14 = arith.constant 14 : index
    %c0_165 = arith.constant 0 : index
    %c0_166 = arith.constant 0 : index
    %689 = vector.load %arg11[%c14, %c0_165, %c0_166] : memref<30x8x64xf32, #tpu.memory_space<vmem>>, vector<1x8x64xf32>
    %690 = vector.shape_cast %689 : vector<1x8x64xf32> to vector<8x64xf32>
    %cst_167 = arith.constant dense<0.000000e+00> : vector<8x64xf32>
    %691 = tpu.matmul %688, %17, %cst_167 {dimension_numbers = #tpu.dot_dimension_numbers<[1], [0], [0], [1], [0, 0, 1, 1], [], []>} : vector<8x16xf32>, vector<16x64xf32>, vector<8x64xf32> -> vector<8x64xf32>
    %692 = arith.addf %690, %691 : vector<8x64xf32>
    %693 = vector.extract_strided_slice %692 {offsets = [0, 0], sizes = [8, 16], strides = [1, 1]} : vector<8x64xf32> to vector<8x16xf32>
    %694 = arith.negf %693 : vector<8x16xf32>
    %695 = math.exp %694 : vector<8x16xf32>
    %cst_168 = arith.constant 1.000000e+00 : f32
    %696 = vector.broadcast %cst_168 : f32 to vector<8x16xf32>
    %697 = arith.addf %696, %695 : vector<8x16xf32>
    %698 = arith.divf %696, %697 : vector<8x16xf32>
    %699 = vector.extract_strided_slice %692 {offsets = [0, 16], sizes = [8, 16], strides = [1, 1]} : vector<8x64xf32> to vector<8x16xf32>
    %700 = arith.negf %699 : vector<8x16xf32>
    %701 = math.exp %700 : vector<8x16xf32>
    %cst_169 = arith.constant 1.000000e+00 : f32
    %702 = vector.broadcast %cst_169 : f32 to vector<8x16xf32>
    %703 = arith.addf %702, %701 : vector<8x16xf32>
    %704 = arith.divf %702, %703 : vector<8x16xf32>
    %705 = vector.extract_strided_slice %692 {offsets = [0, 32], sizes = [8, 16], strides = [1, 1]} : vector<8x64xf32> to vector<8x16xf32>
    %706 = math.tanh %705 : vector<8x16xf32>
    %707 = vector.extract_strided_slice %692 {offsets = [0, 48], sizes = [8, 16], strides = [1, 1]} : vector<8x64xf32> to vector<8x16xf32>
    %708 = arith.negf %707 : vector<8x16xf32>
    %709 = math.exp %708 : vector<8x16xf32>
    %cst_170 = arith.constant 1.000000e+00 : f32
    %710 = vector.broadcast %cst_170 : f32 to vector<8x16xf32>
    %711 = arith.addf %710, %709 : vector<8x16xf32>
    %712 = arith.divf %710, %711 : vector<8x16xf32>
    %713 = arith.mulf %704, %686 : vector<8x16xf32>
    %714 = arith.mulf %698, %706 : vector<8x16xf32>
    %715 = arith.addf %713, %714 : vector<8x16xf32>
    %716 = math.tanh %715 : vector<8x16xf32>
    %717 = arith.mulf %712, %716 : vector<8x16xf32>
    %c13 = arith.constant 13 : index
    %c0_171 = arith.constant 0 : index
    %c0_172 = arith.constant 0 : index
    %718 = vector.load %arg11[%c13, %c0_171, %c0_172] : memref<30x8x64xf32, #tpu.memory_space<vmem>>, vector<1x8x64xf32>
    %719 = vector.shape_cast %718 : vector<1x8x64xf32> to vector<8x64xf32>
    %cst_173 = arith.constant dense<0.000000e+00> : vector<8x64xf32>
    %720 = tpu.matmul %717, %17, %cst_173 {dimension_numbers = #tpu.dot_dimension_numbers<[1], [0], [0], [1], [0, 0, 1, 1], [], []>} : vector<8x16xf32>, vector<16x64xf32>, vector<8x64xf32> -> vector<8x64xf32>
    %721 = arith.addf %719, %720 : vector<8x64xf32>
    %722 = vector.extract_strided_slice %721 {offsets = [0, 0], sizes = [8, 16], strides = [1, 1]} : vector<8x64xf32> to vector<8x16xf32>
    %723 = arith.negf %722 : vector<8x16xf32>
    %724 = math.exp %723 : vector<8x16xf32>
    %cst_174 = arith.constant 1.000000e+00 : f32
    %725 = vector.broadcast %cst_174 : f32 to vector<8x16xf32>
    %726 = arith.addf %725, %724 : vector<8x16xf32>
    %727 = arith.divf %725, %726 : vector<8x16xf32>
    %728 = vector.extract_strided_slice %721 {offsets = [0, 16], sizes = [8, 16], strides = [1, 1]} : vector<8x64xf32> to vector<8x16xf32>
    %729 = arith.negf %728 : vector<8x16xf32>
    %730 = math.exp %729 : vector<8x16xf32>
    %cst_175 = arith.constant 1.000000e+00 : f32
    %731 = vector.broadcast %cst_175 : f32 to vector<8x16xf32>
    %732 = arith.addf %731, %730 : vector<8x16xf32>
    %733 = arith.divf %731, %732 : vector<8x16xf32>
    %734 = vector.extract_strided_slice %721 {offsets = [0, 32], sizes = [8, 16], strides = [1, 1]} : vector<8x64xf32> to vector<8x16xf32>
    %735 = math.tanh %734 : vector<8x16xf32>
    %736 = vector.extract_strided_slice %721 {offsets = [0, 48], sizes = [8, 16], strides = [1, 1]} : vector<8x64xf32> to vector<8x16xf32>
    %737 = arith.negf %736 : vector<8x16xf32>
    %738 = math.exp %737 : vector<8x16xf32>
    %cst_176 = arith.constant 1.000000e+00 : f32
    %739 = vector.broadcast %cst_176 : f32 to vector<8x16xf32>
    %740 = arith.addf %739, %738 : vector<8x16xf32>
    %741 = arith.divf %739, %740 : vector<8x16xf32>
    %742 = arith.mulf %733, %715 : vector<8x16xf32>
    %743 = arith.mulf %727, %735 : vector<8x16xf32>
    %744 = arith.addf %742, %743 : vector<8x16xf32>
    %745 = math.tanh %744 : vector<8x16xf32>
    %746 = arith.mulf %741, %745 : vector<8x16xf32>
    %c12 = arith.constant 12 : index
    %c0_177 = arith.constant 0 : index
    %c0_178 = arith.constant 0 : index
    %747 = vector.load %arg11[%c12, %c0_177, %c0_178] : memref<30x8x64xf32, #tpu.memory_space<vmem>>, vector<1x8x64xf32>
    %748 = vector.shape_cast %747 : vector<1x8x64xf32> to vector<8x64xf32>
    %cst_179 = arith.constant dense<0.000000e+00> : vector<8x64xf32>
    %749 = tpu.matmul %746, %17, %cst_179 {dimension_numbers = #tpu.dot_dimension_numbers<[1], [0], [0], [1], [0, 0, 1, 1], [], []>} : vector<8x16xf32>, vector<16x64xf32>, vector<8x64xf32> -> vector<8x64xf32>
    %750 = arith.addf %748, %749 : vector<8x64xf32>
    %751 = vector.extract_strided_slice %750 {offsets = [0, 0], sizes = [8, 16], strides = [1, 1]} : vector<8x64xf32> to vector<8x16xf32>
    %752 = arith.negf %751 : vector<8x16xf32>
    %753 = math.exp %752 : vector<8x16xf32>
    %cst_180 = arith.constant 1.000000e+00 : f32
    %754 = vector.broadcast %cst_180 : f32 to vector<8x16xf32>
    %755 = arith.addf %754, %753 : vector<8x16xf32>
    %756 = arith.divf %754, %755 : vector<8x16xf32>
    %757 = vector.extract_strided_slice %750 {offsets = [0, 16], sizes = [8, 16], strides = [1, 1]} : vector<8x64xf32> to vector<8x16xf32>
    %758 = arith.negf %757 : vector<8x16xf32>
    %759 = math.exp %758 : vector<8x16xf32>
    %cst_181 = arith.constant 1.000000e+00 : f32
    %760 = vector.broadcast %cst_181 : f32 to vector<8x16xf32>
    %761 = arith.addf %760, %759 : vector<8x16xf32>
    %762 = arith.divf %760, %761 : vector<8x16xf32>
    %763 = vector.extract_strided_slice %750 {offsets = [0, 32], sizes = [8, 16], strides = [1, 1]} : vector<8x64xf32> to vector<8x16xf32>
    %764 = math.tanh %763 : vector<8x16xf32>
    %765 = vector.extract_strided_slice %750 {offsets = [0, 48], sizes = [8, 16], strides = [1, 1]} : vector<8x64xf32> to vector<8x16xf32>
    %766 = arith.negf %765 : vector<8x16xf32>
    %767 = math.exp %766 : vector<8x16xf32>
    %cst_182 = arith.constant 1.000000e+00 : f32
    %768 = vector.broadcast %cst_182 : f32 to vector<8x16xf32>
    %769 = arith.addf %768, %767 : vector<8x16xf32>
    %770 = arith.divf %768, %769 : vector<8x16xf32>
    %771 = arith.mulf %762, %744 : vector<8x16xf32>
    %772 = arith.mulf %756, %764 : vector<8x16xf32>
    %773 = arith.addf %771, %772 : vector<8x16xf32>
    %774 = math.tanh %773 : vector<8x16xf32>
    %775 = arith.mulf %770, %774 : vector<8x16xf32>
    %c11 = arith.constant 11 : index
    %c0_183 = arith.constant 0 : index
    %c0_184 = arith.constant 0 : index
    %776 = vector.load %arg11[%c11, %c0_183, %c0_184] : memref<30x8x64xf32, #tpu.memory_space<vmem>>, vector<1x8x64xf32>
    %777 = vector.shape_cast %776 : vector<1x8x64xf32> to vector<8x64xf32>
    %cst_185 = arith.constant dense<0.000000e+00> : vector<8x64xf32>
    %778 = tpu.matmul %775, %17, %cst_185 {dimension_numbers = #tpu.dot_dimension_numbers<[1], [0], [0], [1], [0, 0, 1, 1], [], []>} : vector<8x16xf32>, vector<16x64xf32>, vector<8x64xf32> -> vector<8x64xf32>
    %779 = arith.addf %777, %778 : vector<8x64xf32>
    %780 = vector.extract_strided_slice %779 {offsets = [0, 0], sizes = [8, 16], strides = [1, 1]} : vector<8x64xf32> to vector<8x16xf32>
    %781 = arith.negf %780 : vector<8x16xf32>
    %782 = math.exp %781 : vector<8x16xf32>
    %cst_186 = arith.constant 1.000000e+00 : f32
    %783 = vector.broadcast %cst_186 : f32 to vector<8x16xf32>
    %784 = arith.addf %783, %782 : vector<8x16xf32>
    %785 = arith.divf %783, %784 : vector<8x16xf32>
    %786 = vector.extract_strided_slice %779 {offsets = [0, 16], sizes = [8, 16], strides = [1, 1]} : vector<8x64xf32> to vector<8x16xf32>
    %787 = arith.negf %786 : vector<8x16xf32>
    %788 = math.exp %787 : vector<8x16xf32>
    %cst_187 = arith.constant 1.000000e+00 : f32
    %789 = vector.broadcast %cst_187 : f32 to vector<8x16xf32>
    %790 = arith.addf %789, %788 : vector<8x16xf32>
    %791 = arith.divf %789, %790 : vector<8x16xf32>
    %792 = vector.extract_strided_slice %779 {offsets = [0, 32], sizes = [8, 16], strides = [1, 1]} : vector<8x64xf32> to vector<8x16xf32>
    %793 = math.tanh %792 : vector<8x16xf32>
    %794 = vector.extract_strided_slice %779 {offsets = [0, 48], sizes = [8, 16], strides = [1, 1]} : vector<8x64xf32> to vector<8x16xf32>
    %795 = arith.negf %794 : vector<8x16xf32>
    %796 = math.exp %795 : vector<8x16xf32>
    %cst_188 = arith.constant 1.000000e+00 : f32
    %797 = vector.broadcast %cst_188 : f32 to vector<8x16xf32>
    %798 = arith.addf %797, %796 : vector<8x16xf32>
    %799 = arith.divf %797, %798 : vector<8x16xf32>
    %800 = arith.mulf %791, %773 : vector<8x16xf32>
    %801 = arith.mulf %785, %793 : vector<8x16xf32>
    %802 = arith.addf %800, %801 : vector<8x16xf32>
    %803 = math.tanh %802 : vector<8x16xf32>
    %804 = arith.mulf %799, %803 : vector<8x16xf32>
    %c10 = arith.constant 10 : index
    %c0_189 = arith.constant 0 : index
    %c0_190 = arith.constant 0 : index
    %805 = vector.load %arg11[%c10, %c0_189, %c0_190] : memref<30x8x64xf32, #tpu.memory_space<vmem>>, vector<1x8x64xf32>
    %806 = vector.shape_cast %805 : vector<1x8x64xf32> to vector<8x64xf32>
    %cst_191 = arith.constant dense<0.000000e+00> : vector<8x64xf32>
    %807 = tpu.matmul %804, %17, %cst_191 {dimension_numbers = #tpu.dot_dimension_numbers<[1], [0], [0], [1], [0, 0, 1, 1], [], []>} : vector<8x16xf32>, vector<16x64xf32>, vector<8x64xf32> -> vector<8x64xf32>
    %808 = arith.addf %806, %807 : vector<8x64xf32>
    %809 = vector.extract_strided_slice %808 {offsets = [0, 0], sizes = [8, 16], strides = [1, 1]} : vector<8x64xf32> to vector<8x16xf32>
    %810 = arith.negf %809 : vector<8x16xf32>
    %811 = math.exp %810 : vector<8x16xf32>
    %cst_192 = arith.constant 1.000000e+00 : f32
    %812 = vector.broadcast %cst_192 : f32 to vector<8x16xf32>
    %813 = arith.addf %812, %811 : vector<8x16xf32>
    %814 = arith.divf %812, %813 : vector<8x16xf32>
    %815 = vector.extract_strided_slice %808 {offsets = [0, 16], sizes = [8, 16], strides = [1, 1]} : vector<8x64xf32> to vector<8x16xf32>
    %816 = arith.negf %815 : vector<8x16xf32>
    %817 = math.exp %816 : vector<8x16xf32>
    %cst_193 = arith.constant 1.000000e+00 : f32
    %818 = vector.broadcast %cst_193 : f32 to vector<8x16xf32>
    %819 = arith.addf %818, %817 : vector<8x16xf32>
    %820 = arith.divf %818, %819 : vector<8x16xf32>
    %821 = vector.extract_strided_slice %808 {offsets = [0, 32], sizes = [8, 16], strides = [1, 1]} : vector<8x64xf32> to vector<8x16xf32>
    %822 = math.tanh %821 : vector<8x16xf32>
    %823 = vector.extract_strided_slice %808 {offsets = [0, 48], sizes = [8, 16], strides = [1, 1]} : vector<8x64xf32> to vector<8x16xf32>
    %824 = arith.negf %823 : vector<8x16xf32>
    %825 = math.exp %824 : vector<8x16xf32>
    %cst_194 = arith.constant 1.000000e+00 : f32
    %826 = vector.broadcast %cst_194 : f32 to vector<8x16xf32>
    %827 = arith.addf %826, %825 : vector<8x16xf32>
    %828 = arith.divf %826, %827 : vector<8x16xf32>
    %829 = arith.mulf %820, %802 : vector<8x16xf32>
    %830 = arith.mulf %814, %822 : vector<8x16xf32>
    %831 = arith.addf %829, %830 : vector<8x16xf32>
    %832 = math.tanh %831 : vector<8x16xf32>
    %833 = arith.mulf %828, %832 : vector<8x16xf32>
    %c9 = arith.constant 9 : index
    %c0_195 = arith.constant 0 : index
    %c0_196 = arith.constant 0 : index
    %834 = vector.load %arg11[%c9, %c0_195, %c0_196] : memref<30x8x64xf32, #tpu.memory_space<vmem>>, vector<1x8x64xf32>
    %835 = vector.shape_cast %834 : vector<1x8x64xf32> to vector<8x64xf32>
    %cst_197 = arith.constant dense<0.000000e+00> : vector<8x64xf32>
    %836 = tpu.matmul %833, %17, %cst_197 {dimension_numbers = #tpu.dot_dimension_numbers<[1], [0], [0], [1], [0, 0, 1, 1], [], []>} : vector<8x16xf32>, vector<16x64xf32>, vector<8x64xf32> -> vector<8x64xf32>
    %837 = arith.addf %835, %836 : vector<8x64xf32>
    %838 = vector.extract_strided_slice %837 {offsets = [0, 0], sizes = [8, 16], strides = [1, 1]} : vector<8x64xf32> to vector<8x16xf32>
    %839 = arith.negf %838 : vector<8x16xf32>
    %840 = math.exp %839 : vector<8x16xf32>
    %cst_198 = arith.constant 1.000000e+00 : f32
    %841 = vector.broadcast %cst_198 : f32 to vector<8x16xf32>
    %842 = arith.addf %841, %840 : vector<8x16xf32>
    %843 = arith.divf %841, %842 : vector<8x16xf32>
    %844 = vector.extract_strided_slice %837 {offsets = [0, 16], sizes = [8, 16], strides = [1, 1]} : vector<8x64xf32> to vector<8x16xf32>
    %845 = arith.negf %844 : vector<8x16xf32>
    %846 = math.exp %845 : vector<8x16xf32>
    %cst_199 = arith.constant 1.000000e+00 : f32
    %847 = vector.broadcast %cst_199 : f32 to vector<8x16xf32>
    %848 = arith.addf %847, %846 : vector<8x16xf32>
    %849 = arith.divf %847, %848 : vector<8x16xf32>
    %850 = vector.extract_strided_slice %837 {offsets = [0, 32], sizes = [8, 16], strides = [1, 1]} : vector<8x64xf32> to vector<8x16xf32>
    %851 = math.tanh %850 : vector<8x16xf32>
    %852 = vector.extract_strided_slice %837 {offsets = [0, 48], sizes = [8, 16], strides = [1, 1]} : vector<8x64xf32> to vector<8x16xf32>
    %853 = arith.negf %852 : vector<8x16xf32>
    %854 = math.exp %853 : vector<8x16xf32>
    %cst_200 = arith.constant 1.000000e+00 : f32
    %855 = vector.broadcast %cst_200 : f32 to vector<8x16xf32>
    %856 = arith.addf %855, %854 : vector<8x16xf32>
    %857 = arith.divf %855, %856 : vector<8x16xf32>
    %858 = arith.mulf %849, %831 : vector<8x16xf32>
    %859 = arith.mulf %843, %851 : vector<8x16xf32>
    %860 = arith.addf %858, %859 : vector<8x16xf32>
    %861 = math.tanh %860 : vector<8x16xf32>
    %862 = arith.mulf %857, %861 : vector<8x16xf32>
    %c8 = arith.constant 8 : index
    %c0_201 = arith.constant 0 : index
    %c0_202 = arith.constant 0 : index
    %863 = vector.load %arg11[%c8, %c0_201, %c0_202] : memref<30x8x64xf32, #tpu.memory_space<vmem>>, vector<1x8x64xf32>
    %864 = vector.shape_cast %863 : vector<1x8x64xf32> to vector<8x64xf32>
    %cst_203 = arith.constant dense<0.000000e+00> : vector<8x64xf32>
    %865 = tpu.matmul %862, %17, %cst_203 {dimension_numbers = #tpu.dot_dimension_numbers<[1], [0], [0], [1], [0, 0, 1, 1], [], []>} : vector<8x16xf32>, vector<16x64xf32>, vector<8x64xf32> -> vector<8x64xf32>
    %866 = arith.addf %864, %865 : vector<8x64xf32>
    %867 = vector.extract_strided_slice %866 {offsets = [0, 0], sizes = [8, 16], strides = [1, 1]} : vector<8x64xf32> to vector<8x16xf32>
    %868 = arith.negf %867 : vector<8x16xf32>
    %869 = math.exp %868 : vector<8x16xf32>
    %cst_204 = arith.constant 1.000000e+00 : f32
    %870 = vector.broadcast %cst_204 : f32 to vector<8x16xf32>
    %871 = arith.addf %870, %869 : vector<8x16xf32>
    %872 = arith.divf %870, %871 : vector<8x16xf32>
    %873 = vector.extract_strided_slice %866 {offsets = [0, 16], sizes = [8, 16], strides = [1, 1]} : vector<8x64xf32> to vector<8x16xf32>
    %874 = arith.negf %873 : vector<8x16xf32>
    %875 = math.exp %874 : vector<8x16xf32>
    %cst_205 = arith.constant 1.000000e+00 : f32
    %876 = vector.broadcast %cst_205 : f32 to vector<8x16xf32>
    %877 = arith.addf %876, %875 : vector<8x16xf32>
    %878 = arith.divf %876, %877 : vector<8x16xf32>
    %879 = vector.extract_strided_slice %866 {offsets = [0, 32], sizes = [8, 16], strides = [1, 1]} : vector<8x64xf32> to vector<8x16xf32>
    %880 = math.tanh %879 : vector<8x16xf32>
    %881 = vector.extract_strided_slice %866 {offsets = [0, 48], sizes = [8, 16], strides = [1, 1]} : vector<8x64xf32> to vector<8x16xf32>
    %882 = arith.negf %881 : vector<8x16xf32>
    %883 = math.exp %882 : vector<8x16xf32>
    %cst_206 = arith.constant 1.000000e+00 : f32
    %884 = vector.broadcast %cst_206 : f32 to vector<8x16xf32>
    %885 = arith.addf %884, %883 : vector<8x16xf32>
    %886 = arith.divf %884, %885 : vector<8x16xf32>
    %887 = arith.mulf %878, %860 : vector<8x16xf32>
    %888 = arith.mulf %872, %880 : vector<8x16xf32>
    %889 = arith.addf %887, %888 : vector<8x16xf32>
    %890 = math.tanh %889 : vector<8x16xf32>
    %891 = arith.mulf %886, %890 : vector<8x16xf32>
    %c7_207 = arith.constant 7 : index
    %c0_208 = arith.constant 0 : index
    %c0_209 = arith.constant 0 : index
    %892 = vector.load %arg11[%c7_207, %c0_208, %c0_209] : memref<30x8x64xf32, #tpu.memory_space<vmem>>, vector<1x8x64xf32>
    %893 = vector.shape_cast %892 : vector<1x8x64xf32> to vector<8x64xf32>
    %cst_210 = arith.constant dense<0.000000e+00> : vector<8x64xf32>
    %894 = tpu.matmul %891, %17, %cst_210 {dimension_numbers = #tpu.dot_dimension_numbers<[1], [0], [0], [1], [0, 0, 1, 1], [], []>} : vector<8x16xf32>, vector<16x64xf32>, vector<8x64xf32> -> vector<8x64xf32>
    %895 = arith.addf %893, %894 : vector<8x64xf32>
    %896 = vector.extract_strided_slice %895 {offsets = [0, 0], sizes = [8, 16], strides = [1, 1]} : vector<8x64xf32> to vector<8x16xf32>
    %897 = arith.negf %896 : vector<8x16xf32>
    %898 = math.exp %897 : vector<8x16xf32>
    %cst_211 = arith.constant 1.000000e+00 : f32
    %899 = vector.broadcast %cst_211 : f32 to vector<8x16xf32>
    %900 = arith.addf %899, %898 : vector<8x16xf32>
    %901 = arith.divf %899, %900 : vector<8x16xf32>
    %902 = vector.extract_strided_slice %895 {offsets = [0, 16], sizes = [8, 16], strides = [1, 1]} : vector<8x64xf32> to vector<8x16xf32>
    %903 = arith.negf %902 : vector<8x16xf32>
    %904 = math.exp %903 : vector<8x16xf32>
    %cst_212 = arith.constant 1.000000e+00 : f32
    %905 = vector.broadcast %cst_212 : f32 to vector<8x16xf32>
    %906 = arith.addf %905, %904 : vector<8x16xf32>
    %907 = arith.divf %905, %906 : vector<8x16xf32>
    %908 = vector.extract_strided_slice %895 {offsets = [0, 32], sizes = [8, 16], strides = [1, 1]} : vector<8x64xf32> to vector<8x16xf32>
    %909 = math.tanh %908 : vector<8x16xf32>
    %910 = vector.extract_strided_slice %895 {offsets = [0, 48], sizes = [8, 16], strides = [1, 1]} : vector<8x64xf32> to vector<8x16xf32>
    %911 = arith.negf %910 : vector<8x16xf32>
    %912 = math.exp %911 : vector<8x16xf32>
    %cst_213 = arith.constant 1.000000e+00 : f32
    %913 = vector.broadcast %cst_213 : f32 to vector<8x16xf32>
    %914 = arith.addf %913, %912 : vector<8x16xf32>
    %915 = arith.divf %913, %914 : vector<8x16xf32>
    %916 = arith.mulf %907, %889 : vector<8x16xf32>
    %917 = arith.mulf %901, %909 : vector<8x16xf32>
    %918 = arith.addf %916, %917 : vector<8x16xf32>
    %919 = math.tanh %918 : vector<8x16xf32>
    %920 = arith.mulf %915, %919 : vector<8x16xf32>
    %c6_214 = arith.constant 6 : index
    %c0_215 = arith.constant 0 : index
    %c0_216 = arith.constant 0 : index
    %921 = vector.load %arg11[%c6_214, %c0_215, %c0_216] : memref<30x8x64xf32, #tpu.memory_space<vmem>>, vector<1x8x64xf32>
    %922 = vector.shape_cast %921 : vector<1x8x64xf32> to vector<8x64xf32>
    %cst_217 = arith.constant dense<0.000000e+00> : vector<8x64xf32>
    %923 = tpu.matmul %920, %17, %cst_217 {dimension_numbers = #tpu.dot_dimension_numbers<[1], [0], [0], [1], [0, 0, 1, 1], [], []>} : vector<8x16xf32>, vector<16x64xf32>, vector<8x64xf32> -> vector<8x64xf32>
    %924 = arith.addf %922, %923 : vector<8x64xf32>
    %925 = vector.extract_strided_slice %924 {offsets = [0, 0], sizes = [8, 16], strides = [1, 1]} : vector<8x64xf32> to vector<8x16xf32>
    %926 = arith.negf %925 : vector<8x16xf32>
    %927 = math.exp %926 : vector<8x16xf32>
    %cst_218 = arith.constant 1.000000e+00 : f32
    %928 = vector.broadcast %cst_218 : f32 to vector<8x16xf32>
    %929 = arith.addf %928, %927 : vector<8x16xf32>
    %930 = arith.divf %928, %929 : vector<8x16xf32>
    %931 = vector.extract_strided_slice %924 {offsets = [0, 16], sizes = [8, 16], strides = [1, 1]} : vector<8x64xf32> to vector<8x16xf32>
    %932 = arith.negf %931 : vector<8x16xf32>
    %933 = math.exp %932 : vector<8x16xf32>
    %cst_219 = arith.constant 1.000000e+00 : f32
    %934 = vector.broadcast %cst_219 : f32 to vector<8x16xf32>
    %935 = arith.addf %934, %933 : vector<8x16xf32>
    %936 = arith.divf %934, %935 : vector<8x16xf32>
    %937 = vector.extract_strided_slice %924 {offsets = [0, 32], sizes = [8, 16], strides = [1, 1]} : vector<8x64xf32> to vector<8x16xf32>
    %938 = math.tanh %937 : vector<8x16xf32>
    %939 = vector.extract_strided_slice %924 {offsets = [0, 48], sizes = [8, 16], strides = [1, 1]} : vector<8x64xf32> to vector<8x16xf32>
    %940 = arith.negf %939 : vector<8x16xf32>
    %941 = math.exp %940 : vector<8x16xf32>
    %cst_220 = arith.constant 1.000000e+00 : f32
    %942 = vector.broadcast %cst_220 : f32 to vector<8x16xf32>
    %943 = arith.addf %942, %941 : vector<8x16xf32>
    %944 = arith.divf %942, %943 : vector<8x16xf32>
    %945 = arith.mulf %936, %918 : vector<8x16xf32>
    %946 = arith.mulf %930, %938 : vector<8x16xf32>
    %947 = arith.addf %945, %946 : vector<8x16xf32>
    %948 = math.tanh %947 : vector<8x16xf32>
    %949 = arith.mulf %944, %948 : vector<8x16xf32>
    %c5_221 = arith.constant 5 : index
    %c0_222 = arith.constant 0 : index
    %c0_223 = arith.constant 0 : index
    %950 = vector.load %arg11[%c5_221, %c0_222, %c0_223] : memref<30x8x64xf32, #tpu.memory_space<vmem>>, vector<1x8x64xf32>
    %951 = vector.shape_cast %950 : vector<1x8x64xf32> to vector<8x64xf32>
    %cst_224 = arith.constant dense<0.000000e+00> : vector<8x64xf32>
    %952 = tpu.matmul %949, %17, %cst_224 {dimension_numbers = #tpu.dot_dimension_numbers<[1], [0], [0], [1], [0, 0, 1, 1], [], []>} : vector<8x16xf32>, vector<16x64xf32>, vector<8x64xf32> -> vector<8x64xf32>
    %953 = arith.addf %951, %952 : vector<8x64xf32>
    %954 = vector.extract_strided_slice %953 {offsets = [0, 0], sizes = [8, 16], strides = [1, 1]} : vector<8x64xf32> to vector<8x16xf32>
    %955 = arith.negf %954 : vector<8x16xf32>
    %956 = math.exp %955 : vector<8x16xf32>
    %cst_225 = arith.constant 1.000000e+00 : f32
    %957 = vector.broadcast %cst_225 : f32 to vector<8x16xf32>
    %958 = arith.addf %957, %956 : vector<8x16xf32>
    %959 = arith.divf %957, %958 : vector<8x16xf32>
    %960 = vector.extract_strided_slice %953 {offsets = [0, 16], sizes = [8, 16], strides = [1, 1]} : vector<8x64xf32> to vector<8x16xf32>
    %961 = arith.negf %960 : vector<8x16xf32>
    %962 = math.exp %961 : vector<8x16xf32>
    %cst_226 = arith.constant 1.000000e+00 : f32
    %963 = vector.broadcast %cst_226 : f32 to vector<8x16xf32>
    %964 = arith.addf %963, %962 : vector<8x16xf32>
    %965 = arith.divf %963, %964 : vector<8x16xf32>
    %966 = vector.extract_strided_slice %953 {offsets = [0, 32], sizes = [8, 16], strides = [1, 1]} : vector<8x64xf32> to vector<8x16xf32>
    %967 = math.tanh %966 : vector<8x16xf32>
    %968 = vector.extract_strided_slice %953 {offsets = [0, 48], sizes = [8, 16], strides = [1, 1]} : vector<8x64xf32> to vector<8x16xf32>
    %969 = arith.negf %968 : vector<8x16xf32>
    %970 = math.exp %969 : vector<8x16xf32>
    %cst_227 = arith.constant 1.000000e+00 : f32
    %971 = vector.broadcast %cst_227 : f32 to vector<8x16xf32>
    %972 = arith.addf %971, %970 : vector<8x16xf32>
    %973 = arith.divf %971, %972 : vector<8x16xf32>
    %974 = arith.mulf %965, %947 : vector<8x16xf32>
    %975 = arith.mulf %959, %967 : vector<8x16xf32>
    %976 = arith.addf %974, %975 : vector<8x16xf32>
    %977 = math.tanh %976 : vector<8x16xf32>
    %978 = arith.mulf %973, %977 : vector<8x16xf32>
    %c4_228 = arith.constant 4 : index
    %c0_229 = arith.constant 0 : index
    %c0_230 = arith.constant 0 : index
    %979 = vector.load %arg11[%c4_228, %c0_229, %c0_230] : memref<30x8x64xf32, #tpu.memory_space<vmem>>, vector<1x8x64xf32>
    %980 = vector.shape_cast %979 : vector<1x8x64xf32> to vector<8x64xf32>
    %cst_231 = arith.constant dense<0.000000e+00> : vector<8x64xf32>
    %981 = tpu.matmul %978, %17, %cst_231 {dimension_numbers = #tpu.dot_dimension_numbers<[1], [0], [0], [1], [0, 0, 1, 1], [], []>} : vector<8x16xf32>, vector<16x64xf32>, vector<8x64xf32> -> vector<8x64xf32>
    %982 = arith.addf %980, %981 : vector<8x64xf32>
    %983 = vector.extract_strided_slice %982 {offsets = [0, 0], sizes = [8, 16], strides = [1, 1]} : vector<8x64xf32> to vector<8x16xf32>
    %984 = arith.negf %983 : vector<8x16xf32>
    %985 = math.exp %984 : vector<8x16xf32>
    %cst_232 = arith.constant 1.000000e+00 : f32
    %986 = vector.broadcast %cst_232 : f32 to vector<8x16xf32>
    %987 = arith.addf %986, %985 : vector<8x16xf32>
    %988 = arith.divf %986, %987 : vector<8x16xf32>
    %989 = vector.extract_strided_slice %982 {offsets = [0, 16], sizes = [8, 16], strides = [1, 1]} : vector<8x64xf32> to vector<8x16xf32>
    %990 = arith.negf %989 : vector<8x16xf32>
    %991 = math.exp %990 : vector<8x16xf32>
    %cst_233 = arith.constant 1.000000e+00 : f32
    %992 = vector.broadcast %cst_233 : f32 to vector<8x16xf32>
    %993 = arith.addf %992, %991 : vector<8x16xf32>
    %994 = arith.divf %992, %993 : vector<8x16xf32>
    %995 = vector.extract_strided_slice %982 {offsets = [0, 32], sizes = [8, 16], strides = [1, 1]} : vector<8x64xf32> to vector<8x16xf32>
    %996 = math.tanh %995 : vector<8x16xf32>
    %997 = vector.extract_strided_slice %982 {offsets = [0, 48], sizes = [8, 16], strides = [1, 1]} : vector<8x64xf32> to vector<8x16xf32>
    %998 = arith.negf %997 : vector<8x16xf32>
    %999 = math.exp %998 : vector<8x16xf32>
    %cst_234 = arith.constant 1.000000e+00 : f32
    %1000 = vector.broadcast %cst_234 : f32 to vector<8x16xf32>
    %1001 = arith.addf %1000, %999 : vector<8x16xf32>
    %1002 = arith.divf %1000, %1001 : vector<8x16xf32>
    %1003 = arith.mulf %994, %976 : vector<8x16xf32>
    %1004 = arith.mulf %988, %996 : vector<8x16xf32>
    %1005 = arith.addf %1003, %1004 : vector<8x16xf32>
    %1006 = math.tanh %1005 : vector<8x16xf32>
    %1007 = arith.mulf %1002, %1006 : vector<8x16xf32>
    %c3_235 = arith.constant 3 : index
    %c0_236 = arith.constant 0 : index
    %c0_237 = arith.constant 0 : index
    %1008 = vector.load %arg11[%c3_235, %c0_236, %c0_237] : memref<30x8x64xf32, #tpu.memory_space<vmem>>, vector<1x8x64xf32>
    %1009 = vector.shape_cast %1008 : vector<1x8x64xf32> to vector<8x64xf32>
    %cst_238 = arith.constant dense<0.000000e+00> : vector<8x64xf32>
    %1010 = tpu.matmul %1007, %17, %cst_238 {dimension_numbers = #tpu.dot_dimension_numbers<[1], [0], [0], [1], [0, 0, 1, 1], [], []>} : vector<8x16xf32>, vector<16x64xf32>, vector<8x64xf32> -> vector<8x64xf32>
    %1011 = arith.addf %1009, %1010 : vector<8x64xf32>
    %1012 = vector.extract_strided_slice %1011 {offsets = [0, 0], sizes = [8, 16], strides = [1, 1]} : vector<8x64xf32> to vector<8x16xf32>
    %1013 = arith.negf %1012 : vector<8x16xf32>
    %1014 = math.exp %1013 : vector<8x16xf32>
    %cst_239 = arith.constant 1.000000e+00 : f32
    %1015 = vector.broadcast %cst_239 : f32 to vector<8x16xf32>
    %1016 = arith.addf %1015, %1014 : vector<8x16xf32>
    %1017 = arith.divf %1015, %1016 : vector<8x16xf32>
    %1018 = vector.extract_strided_slice %1011 {offsets = [0, 16], sizes = [8, 16], strides = [1, 1]} : vector<8x64xf32> to vector<8x16xf32>
    %1019 = arith.negf %1018 : vector<8x16xf32>
    %1020 = math.exp %1019 : vector<8x16xf32>
    %cst_240 = arith.constant 1.000000e+00 : f32
    %1021 = vector.broadcast %cst_240 : f32 to vector<8x16xf32>
    %1022 = arith.addf %1021, %1020 : vector<8x16xf32>
    %1023 = arith.divf %1021, %1022 : vector<8x16xf32>
    %1024 = vector.extract_strided_slice %1011 {offsets = [0, 32], sizes = [8, 16], strides = [1, 1]} : vector<8x64xf32> to vector<8x16xf32>
    %1025 = math.tanh %1024 : vector<8x16xf32>
    %1026 = vector.extract_strided_slice %1011 {offsets = [0, 48], sizes = [8, 16], strides = [1, 1]} : vector<8x64xf32> to vector<8x16xf32>
    %1027 = arith.negf %1026 : vector<8x16xf32>
    %1028 = math.exp %1027 : vector<8x16xf32>
    %cst_241 = arith.constant 1.000000e+00 : f32
    %1029 = vector.broadcast %cst_241 : f32 to vector<8x16xf32>
    %1030 = arith.addf %1029, %1028 : vector<8x16xf32>
    %1031 = arith.divf %1029, %1030 : vector<8x16xf32>
    %1032 = arith.mulf %1023, %1005 : vector<8x16xf32>
    %1033 = arith.mulf %1017, %1025 : vector<8x16xf32>
    %1034 = arith.addf %1032, %1033 : vector<8x16xf32>
    %1035 = math.tanh %1034 : vector<8x16xf32>
    %1036 = arith.mulf %1031, %1035 : vector<8x16xf32>
    %c2_242 = arith.constant 2 : index
    %c0_243 = arith.constant 0 : index
    %c0_244 = arith.constant 0 : index
    %1037 = vector.load %arg11[%c2_242, %c0_243, %c0_244] : memref<30x8x64xf32, #tpu.memory_space<vmem>>, vector<1x8x64xf32>
    %1038 = vector.shape_cast %1037 : vector<1x8x64xf32> to vector<8x64xf32>
    %cst_245 = arith.constant dense<0.000000e+00> : vector<8x64xf32>
    %1039 = tpu.matmul %1036, %17, %cst_245 {dimension_numbers = #tpu.dot_dimension_numbers<[1], [0], [0], [1], [0, 0, 1, 1], [], []>} : vector<8x16xf32>, vector<16x64xf32>, vector<8x64xf32> -> vector<8x64xf32>
    %1040 = arith.addf %1038, %1039 : vector<8x64xf32>
    %1041 = vector.extract_strided_slice %1040 {offsets = [0, 0], sizes = [8, 16], strides = [1, 1]} : vector<8x64xf32> to vector<8x16xf32>
    %1042 = arith.negf %1041 : vector<8x16xf32>
    %1043 = math.exp %1042 : vector<8x16xf32>
    %cst_246 = arith.constant 1.000000e+00 : f32
    %1044 = vector.broadcast %cst_246 : f32 to vector<8x16xf32>
    %1045 = arith.addf %1044, %1043 : vector<8x16xf32>
    %1046 = arith.divf %1044, %1045 : vector<8x16xf32>
    %1047 = vector.extract_strided_slice %1040 {offsets = [0, 16], sizes = [8, 16], strides = [1, 1]} : vector<8x64xf32> to vector<8x16xf32>
    %1048 = arith.negf %1047 : vector<8x16xf32>
    %1049 = math.exp %1048 : vector<8x16xf32>
    %cst_247 = arith.constant 1.000000e+00 : f32
    %1050 = vector.broadcast %cst_247 : f32 to vector<8x16xf32>
    %1051 = arith.addf %1050, %1049 : vector<8x16xf32>
    %1052 = arith.divf %1050, %1051 : vector<8x16xf32>
    %1053 = vector.extract_strided_slice %1040 {offsets = [0, 32], sizes = [8, 16], strides = [1, 1]} : vector<8x64xf32> to vector<8x16xf32>
    %1054 = math.tanh %1053 : vector<8x16xf32>
    %1055 = vector.extract_strided_slice %1040 {offsets = [0, 48], sizes = [8, 16], strides = [1, 1]} : vector<8x64xf32> to vector<8x16xf32>
    %1056 = arith.negf %1055 : vector<8x16xf32>
    %1057 = math.exp %1056 : vector<8x16xf32>
    %cst_248 = arith.constant 1.000000e+00 : f32
    %1058 = vector.broadcast %cst_248 : f32 to vector<8x16xf32>
    %1059 = arith.addf %1058, %1057 : vector<8x16xf32>
    %1060 = arith.divf %1058, %1059 : vector<8x16xf32>
    %1061 = arith.mulf %1052, %1034 : vector<8x16xf32>
    %1062 = arith.mulf %1046, %1054 : vector<8x16xf32>
    %1063 = arith.addf %1061, %1062 : vector<8x16xf32>
    %1064 = math.tanh %1063 : vector<8x16xf32>
    %1065 = arith.mulf %1060, %1064 : vector<8x16xf32>
    %c1_249 = arith.constant 1 : index
    %c0_250 = arith.constant 0 : index
    %c0_251 = arith.constant 0 : index
    %1066 = vector.load %arg11[%c1_249, %c0_250, %c0_251] : memref<30x8x64xf32, #tpu.memory_space<vmem>>, vector<1x8x64xf32>
    %1067 = vector.shape_cast %1066 : vector<1x8x64xf32> to vector<8x64xf32>
    %cst_252 = arith.constant dense<0.000000e+00> : vector<8x64xf32>
    %1068 = tpu.matmul %1065, %17, %cst_252 {dimension_numbers = #tpu.dot_dimension_numbers<[1], [0], [0], [1], [0, 0, 1, 1], [], []>} : vector<8x16xf32>, vector<16x64xf32>, vector<8x64xf32> -> vector<8x64xf32>
    %1069 = arith.addf %1067, %1068 : vector<8x64xf32>
    %1070 = vector.extract_strided_slice %1069 {offsets = [0, 0], sizes = [8, 16], strides = [1, 1]} : vector<8x64xf32> to vector<8x16xf32>
    %1071 = arith.negf %1070 : vector<8x16xf32>
    %1072 = math.exp %1071 : vector<8x16xf32>
    %cst_253 = arith.constant 1.000000e+00 : f32
    %1073 = vector.broadcast %cst_253 : f32 to vector<8x16xf32>
    %1074 = arith.addf %1073, %1072 : vector<8x16xf32>
    %1075 = arith.divf %1073, %1074 : vector<8x16xf32>
    %1076 = vector.extract_strided_slice %1069 {offsets = [0, 16], sizes = [8, 16], strides = [1, 1]} : vector<8x64xf32> to vector<8x16xf32>
    %1077 = arith.negf %1076 : vector<8x16xf32>
    %1078 = math.exp %1077 : vector<8x16xf32>
    %cst_254 = arith.constant 1.000000e+00 : f32
    %1079 = vector.broadcast %cst_254 : f32 to vector<8x16xf32>
    %1080 = arith.addf %1079, %1078 : vector<8x16xf32>
    %1081 = arith.divf %1079, %1080 : vector<8x16xf32>
    %1082 = vector.extract_strided_slice %1069 {offsets = [0, 32], sizes = [8, 16], strides = [1, 1]} : vector<8x64xf32> to vector<8x16xf32>
    %1083 = math.tanh %1082 : vector<8x16xf32>
    %1084 = vector.extract_strided_slice %1069 {offsets = [0, 48], sizes = [8, 16], strides = [1, 1]} : vector<8x64xf32> to vector<8x16xf32>
    %1085 = arith.negf %1084 : vector<8x16xf32>
    %1086 = math.exp %1085 : vector<8x16xf32>
    %cst_255 = arith.constant 1.000000e+00 : f32
    %1087 = vector.broadcast %cst_255 : f32 to vector<8x16xf32>
    %1088 = arith.addf %1087, %1086 : vector<8x16xf32>
    %1089 = arith.divf %1087, %1088 : vector<8x16xf32>
    %1090 = arith.mulf %1081, %1063 : vector<8x16xf32>
    %1091 = arith.mulf %1075, %1083 : vector<8x16xf32>
    %1092 = arith.addf %1090, %1091 : vector<8x16xf32>
    %1093 = math.tanh %1092 : vector<8x16xf32>
    %1094 = arith.mulf %1089, %1093 : vector<8x16xf32>
    %c0_256 = arith.constant 0 : index
    %c0_257 = arith.constant 0 : index
    %c0_258 = arith.constant 0 : index
    %1095 = vector.load %arg11[%c0_256, %c0_257, %c0_258] : memref<30x8x64xf32, #tpu.memory_space<vmem>>, vector<1x8x64xf32>
    %1096 = vector.shape_cast %1095 : vector<1x8x64xf32> to vector<8x64xf32>
    %cst_259 = arith.constant dense<0.000000e+00> : vector<8x64xf32>
    %1097 = tpu.matmul %1094, %17, %cst_259 {dimension_numbers = #tpu.dot_dimension_numbers<[1], [0], [0], [1], [0, 0, 1, 1], [], []>} : vector<8x16xf32>, vector<16x64xf32>, vector<8x64xf32> -> vector<8x64xf32>
    %1098 = arith.addf %1096, %1097 : vector<8x64xf32>
    %1099 = vector.extract_strided_slice %1098 {offsets = [0, 0], sizes = [8, 16], strides = [1, 1]} : vector<8x64xf32> to vector<8x16xf32>
    %1100 = arith.negf %1099 : vector<8x16xf32>
    %1101 = math.exp %1100 : vector<8x16xf32>
    %cst_260 = arith.constant 1.000000e+00 : f32
    %1102 = vector.broadcast %cst_260 : f32 to vector<8x16xf32>
    %1103 = arith.addf %1102, %1101 : vector<8x16xf32>
    %1104 = arith.divf %1102, %1103 : vector<8x16xf32>
    %1105 = vector.extract_strided_slice %1098 {offsets = [0, 16], sizes = [8, 16], strides = [1, 1]} : vector<8x64xf32> to vector<8x16xf32>
    %1106 = arith.negf %1105 : vector<8x16xf32>
    %1107 = math.exp %1106 : vector<8x16xf32>
    %cst_261 = arith.constant 1.000000e+00 : f32
    %1108 = vector.broadcast %cst_261 : f32 to vector<8x16xf32>
    %1109 = arith.addf %1108, %1107 : vector<8x16xf32>
    %1110 = arith.divf %1108, %1109 : vector<8x16xf32>
    %1111 = vector.extract_strided_slice %1098 {offsets = [0, 32], sizes = [8, 16], strides = [1, 1]} : vector<8x64xf32> to vector<8x16xf32>
    %1112 = math.tanh %1111 : vector<8x16xf32>
    %1113 = vector.extract_strided_slice %1098 {offsets = [0, 48], sizes = [8, 16], strides = [1, 1]} : vector<8x64xf32> to vector<8x16xf32>
    %1114 = arith.negf %1113 : vector<8x16xf32>
    %1115 = math.exp %1114 : vector<8x16xf32>
    %cst_262 = arith.constant 1.000000e+00 : f32
    %1116 = vector.broadcast %cst_262 : f32 to vector<8x16xf32>
    %1117 = arith.addf %1116, %1115 : vector<8x16xf32>
    %1118 = arith.divf %1116, %1117 : vector<8x16xf32>
    %1119 = arith.mulf %1110, %1092 : vector<8x16xf32>
    %1120 = arith.mulf %1104, %1112 : vector<8x16xf32>
    %1121 = arith.addf %1119, %1120 : vector<8x16xf32>
    %1122 = math.tanh %1121 : vector<8x16xf32>
    %1123 = arith.mulf %1118, %1122 : vector<8x16xf32>
    %cst_263 = arith.constant dense<0.000000e+00> : vector<2x8xf32>
    %1124 = tpu.matmul %485, %1123, %cst_263 {dimension_numbers = #tpu.dot_dimension_numbers<[1], [1], [0], [0], [0, 0, 1, 0], [], []>} : vector<2x16xf32>, vector<8x16xf32>, vector<2x8xf32> -> vector<2x8xf32>
    %cst_264 = arith.constant dense<0xFF800000> : vector<2xf32>
    %1125 = vector.multi_reduction <maximumf>, %1124, %cst_264 [1] : vector<2x8xf32> to vector<2xf32>
    %1126 = vector.shape_cast %1125 : vector<2xf32> to vector<2x1xf32>
    %1127 = vector.broadcast %1126 : vector<2x1xf32> to vector<2x8xf32>
    %1128 = arith.subf %1124, %1127 : vector<2x8xf32>
    %1129 = math.exp %1128 : vector<2x8xf32>
    %cst_265 = arith.constant dense<0.000000e+00> : vector<2xf32>
    %1130 = vector.multi_reduction <add>, %1129, %cst_265 [1] : vector<2x8xf32> to vector<2xf32>
    %1131 = vector.shape_cast %1130 : vector<2xf32> to vector<2x1xf32>
    %1132 = math.log %1131 : vector<2x1xf32>
    %1133 = vector.broadcast %1126 : vector<2x1xf32> to vector<2x8xf32>
    %1134 = arith.subf %1124, %1133 : vector<2x8xf32>
    %1135 = vector.broadcast %1132 : vector<2x1xf32> to vector<2x8xf32>
    %1136 = arith.subf %1134, %1135 : vector<2x8xf32>
    %cst_266 = arith.constant 0.000000e+00 : f32
    %1137 = vector.broadcast %cst_266 : f32 to vector<2x120xf32>
    %1138 = tpu.concatenate %1136, %1137 in 1 : vector<2x8xf32>, vector<2x120xf32> -> vector<2x128xf32>
    %c0_267 = arith.constant 0 : index
    %c0_268 = arith.constant 0 : index
    %1139 = vector.load %arg8[%c0_267, %c0_268] : memref<2x128xf32, #tpu.memory_space<vmem>>, vector<2x128xf32>
    tpu.vector_store %arg8[%c0_267, %c0_268], %1138 {strides = array<i32>} : memref<2x128xf32, #tpu.memory_space<vmem>>, vector<2x128xf32>,
    return
  }
}

</mosaic_0001>

<bundles_post_ra>
// kernel: tpu_custom_call.1
= control target key start
LH: loop header
LB: loop body
LE: loop exit
PB: predicated region body
PF: predicated region fallthrough
CT: control target
= control target key end

     0   :  { %13 = vsyncpa [#allocation7], 0  ;;  %s9300_s0 = inlined_call_operand.vmem [shape: bf16[16,768], index: 0, kind: input, shape index: {}]   ;;  %s9301_s1 = inlined_call_operand.vmem [shape: bf16[240,768], index: 1, kind: input, shape index: {}]   ;;  %s9302_s2 = inlined_call_operand.vmem [shape: bf16[768,64], index: 2, kind: input, shape index: {}]   ;;  %s9303_s3 = inlined_call_operand.vmem [shape: f32[1,64], index: 3, kind: input, shape index: {}]   ;;  %s9304_s4 = inlined_call_operand.vmem [shape: f32[16,64], index: 4, kind: input, shape index: {}]   ;;  %s9305_s5 = inlined_call_operand.vmem [shape: bf16[768,64], index: 5, kind: input, shape index: {}]   ;;  %s9306_s6 = inlined_call_operand.vmem [shape: f32[1,64], index: 6, kind: input, shape index: {}]   ;;  %s9307_s7 = inlined_call_operand.vmem [shape: f32[16,64], index: 7, kind: input, shape index: {}]   ;;  %s9308_s8 = inlined_call_operand.hbm [shape: f32[2,128], index: 8, kind: output, shape index: {}]  }
   0x1   :  { %v46_v0 = vld [vmem:[%s9301_s1] sm:$0xf]  ;;  %v48_v1 = vld [vmem:[%s9301_s1 + $0x18] sm:$0xf]  ;;  %v50_v2 = vld [vmem:[%s9301_s1 + $0x4] sm:$0xf] }
   0x2   :  { %47 = vst [vmem:[#allocation2] sm:$0xf] %v46_v0  ;;  %49 = vst [vmem:[#allocation2 + $0x4] sm:$0xf] %v48_v1  ;;  %v52_v3 = vld [vmem:[%s9301_s1 + $0x1c] sm:$0xf] }
   0x3   :  { %v54_v4 = vld [vmem:[%s9301_s1 + $0x8] sm:$0xf]  ;;  %51 = vst [vmem:[#allocation2 + $0x8] sm:$0xf] %v50_v2  ;;  %53 = vst [vmem:[#allocation2 + $0xc] sm:$0xf] %v52_v3 }
   0x4   :  { %55 = vst [vmem:[#allocation2 + $0x10] sm:$0xf] %v54_v4  ;;  %v56_v5 = vld [vmem:[%s9301_s1 + $0x20] sm:$0xf]  ;;  %v58_v6 = vld [vmem:[%s9301_s1 + $0xc] sm:$0xf] }
   0x5   :  { %v60_v7 = vld [vmem:[%s9301_s1 + $0x24] sm:$0xf]  ;;  %57 = vst [vmem:[#allocation2 + $0x14] sm:$0xf] %v56_v5  ;;  %59 = vst [vmem:[#allocation2 + $0x18] sm:$0xf] %v58_v6 }
   0x6   :  { %61 = vst [vmem:[#allocation2 + $0x1c] sm:$0xf] %v60_v7  ;;  %v62_v8 = vld [vmem:[%s9301_s1 + $0x10] sm:$0xf]  ;;  %v64_v9 = vld [vmem:[%s9301_s1 + $0x28] sm:$0xf] }
   0x7   :  { %v66_v10 = vld [vmem:[%s9301_s1 + $0x14] sm:$0xf]  ;;  %63 = vst [vmem:[#allocation2 + $0x20] sm:$0xf] %v62_v8  ;;  %65 = vst [vmem:[#allocation2 + $0x24] sm:$0xf] %v64_v9 }
   0x8   :  { %67 = vst [vmem:[#allocation2 + $0x28] sm:$0xf] %v66_v10  ;;  %v68_v11 = vld [vmem:[%s9301_s1 + $0x2c] sm:$0xff]   ;;  %v72_v12 = vld [vmem:[%s9301_s1 + $0x48] sm:$0xf]  ;;  %v92_v22 = vld [vmem:[%s9301_s1 + $0x5c] sm:$0xff]  }
   0x9   :  { %v74_v13 = vld [vmem:[%s9301_s1 + $0x34] sm:$0xf]  ;;  %69 = vst [vmem:[#allocation2 + $0x2c] sm:$0xff] %v68_v11   ;;  %73 = vst [vmem:[#allocation2 + $0x34] sm:$0xf] %v72_v12  ;;  %v116_v33 = vld [vmem:[%s9301_s1 + $0x8c] sm:$0xff]  }
   0xa   :  { %75 = vst [vmem:[#allocation2 + $0x38] sm:$0xf] %v74_v13  ;;  %v76_v14 = vld [vmem:[%s9301_s1 + $0x4c] sm:$0xf]  ;;  %v78_v15 = vld [vmem:[%s9301_s1 + $0x38] sm:$0xf] }
   0xb   :  { %v80_v16 = vld [vmem:[%s9301_s1 + $0x50] sm:$0xf]  ;;  %77 = vst [vmem:[#allocation2 + $0x3c] sm:$0xf] %v76_v14  ;;  %79 = vst [vmem:[#allocation2 + $0x40] sm:$0xf] %v78_v15 }
   0xc   :  { %81 = vst [vmem:[#allocation2 + $0x44] sm:$0xf] %v80_v16  ;;  %v82_v17 = vld [vmem:[%s9301_s1 + $0x3c] sm:$0xf]  ;;  %v84_v18 = vld [vmem:[%s9301_s1 + $0x54] sm:$0xf] }
   0xd   :  { %v86_v19 = vld [vmem:[%s9301_s1 + $0x40] sm:$0xf]  ;;  %83 = vst [vmem:[#allocation2 + $0x48] sm:$0xf] %v82_v17  ;;  %85 = vst [vmem:[#allocation2 + $0x4c] sm:$0xf] %v84_v18 }
   0xe   :  { %87 = vst [vmem:[#allocation2 + $0x50] sm:$0xf] %v86_v19  ;;  %v88_v20 = vld [vmem:[%s9301_s1 + $0x58] sm:$0xf]  ;;  %v90_v21 = vld [vmem:[%s9301_s1 + $0x44] sm:$0xf] }
   0xf   :  { %89 = vst [vmem:[#allocation2 + $0x54] sm:$0xf] %v88_v20  ;;  %91 = vst [vmem:[#allocation2 + $0x58] sm:$0xf] %v90_v21  ;;  %v96_v23 = vld [vmem:[%s9301_s1 + $0x78] sm:$0xf] }
  0x10   :  { %93 = vst [vmem:[#allocation2 + $0x5c] sm:$0xff] %v92_v22   ;;  %v98_v24 = vld [vmem:[%s9301_s1 + $0x64] sm:$0xf]  ;;  %v100_v25 = vld [vmem:[%s9301_s1 + $0x7c] sm:$0xf]  ;;  %117 = vst [vmem:[#allocation2 + $0x8c] sm:$0xff] %v116_v33  }
  0x11   :  { %97 = vst [vmem:[#allocation2 + $0x64] sm:$0xf] %v96_v23  ;;  %99 = vst [vmem:[#allocation2 + $0x68] sm:$0xf] %v98_v24  ;;  %v102_v26 = vld [vmem:[%s9301_s1 + $0x68] sm:$0xf] }
  0x12   :  { %101 = vst [vmem:[#allocation2 + $0x6c] sm:$0xf] %v100_v25  ;;  %v104_v27 = vld [vmem:[%s9301_s1 + $0x80] sm:$0xf]  ;;  %v106_v28 = vld [vmem:[%s9301_s1 + $0x6c] sm:$0xf] }
  0x13   :  { %103 = vst [vmem:[#allocation2 + $0x70] sm:$0xf] %v102_v26  ;;  %105 = vst [vmem:[#allocation2 + $0x74] sm:$0xf] %v104_v27  ;;  %v108_v29 = vld [vmem:[%s9301_s1 + $0x84] sm:$0xf] }
  0x14   :  { %107 = vst [vmem:[#allocation2 + $0x78] sm:$0xf] %v106_v28  ;;  %v110_v30 = vld [vmem:[%s9301_s1 + $0x70] sm:$0xf]  ;;  %v112_v31 = vld [vmem:[%s9301_s1 + $0x88] sm:$0xf] }
  0x15   :  { %109 = vst [vmem:[#allocation2 + $0x7c] sm:$0xf] %v108_v29  ;;  %111 = vst [vmem:[#allocation2 + $0x80] sm:$0xf] %v110_v30  ;;  %v114_v32 = vld [vmem:[%s9301_s1 + $0x74] sm:$0xf] }
  0x16   :  { %113 = vst [vmem:[#allocation2 + $0x84] sm:$0xf] %v112_v31  ;;  %v120_v34 = vld [vmem:[%s9301_s1 + $0xa8] sm:$0xf]  ;;  %115 = vst [vmem:[#allocation2 + $0x88] sm:$0xf] %v114_v32 }
  0x17   :  { %121 = vst [vmem:[#allocation2 + $0x94] sm:$0xf] %v120_v34  ;;  %v122_v35 = vld [vmem:[%s9301_s1 + $0x94] sm:$0xf]  ;;  %v124_v36 = vld [vmem:[%s9301_s1 + $0xac] sm:$0xf] }
  0x18   :  { %v126_v37 = vld [vmem:[%s9301_s1 + $0x98] sm:$0xf]  ;;  %123 = vst [vmem:[#allocation2 + $0x98] sm:$0xf] %v122_v35  ;;  %125 = vst [vmem:[#allocation2 + $0x9c] sm:$0xf] %v124_v36 }
  0x19   :  { %127 = vst [vmem:[#allocation2 + $0xa0] sm:$0xf] %v126_v37  ;;  %v128_v38 = vld [vmem:[%s9301_s1 + $0xb0] sm:$0xf]  ;;  %v130_v39 = vld [vmem:[%s9301_s1 + $0x9c] sm:$0xf] }
  0x1a   :  { %v132_v40 = vld [vmem:[%s9301_s1 + $0xb4] sm:$0xf]  ;;  %129 = vst [vmem:[#allocation2 + $0xa4] sm:$0xf] %v128_v38  ;;  %131 = vst [vmem:[#allocation2 + $0xa8] sm:$0xf] %v130_v39 }
  0x1b   :  { %133 = vst [vmem:[#allocation2 + $0xac] sm:$0xf] %v132_v40  ;;  %v134_v41 = vld [vmem:[%s9301_s1 + $0xa0] sm:$0xf]  ;;  %v136_v42 = vld [vmem:[%s9301_s1 + $0xb8] sm:$0xf] }
  0x1c   :  { %v138_v43 = vld [vmem:[%s9301_s1 + $0xa4] sm:$0xf]  ;;  %135 = vst [vmem:[#allocation2 + $0xb0] sm:$0xf] %v134_v41  ;;  %137 = vst [vmem:[#allocation2 + $0xb4] sm:$0xf] %v136_v42 }
  0x1d   :  { %139 = vst [vmem:[#allocation2 + $0xb8] sm:$0xf] %v138_v43  ;;  %v140_v44 = vld [vmem:[%s9301_s1 + $0xbc] sm:$0xff]   ;;  %v144_v45 = vld [vmem:[%s9301_s1 + $0xd8] sm:$0xf]  ;;  %v164_v55 = vld [vmem:[%s9301_s1 + $0xec] sm:$0xff]  }
  0x1e   :  { %v146_v46 = vld [vmem:[%s9301_s1 + $0xc4] sm:$0xf]  ;;  %141 = vst [vmem:[#allocation2 + $0xbc] sm:$0xff] %v140_v44   ;;  %145 = vst [vmem:[#allocation2 + $0xc4] sm:$0xf] %v144_v45  ;;  %v188_v2 = vld [vmem:[%s9301_s1 + $0x11c] sm:$0xff]  }
  0x1f   :  { %147 = vst [vmem:[#allocation2 + $0xc8] sm:$0xf] %v146_v46  ;;  %v148_v47 = vld [vmem:[%s9301_s1 + $0xdc] sm:$0xf]  ;;  %v150_v48 = vld [vmem:[%s9301_s1 + $0xc8] sm:$0xf] }
  0x20   :  { %v152_v49 = vld [vmem:[%s9301_s1 + $0xe0] sm:$0xf]  ;;  %149 = vst [vmem:[#allocation2 + $0xcc] sm:$0xf] %v148_v47  ;;  %151 = vst [vmem:[#allocation2 + $0xd0] sm:$0xf] %v150_v48 }
  0x21   :  { %153 = vst [vmem:[#allocation2 + $0xd4] sm:$0xf] %v152_v49  ;;  %v154_v50 = vld [vmem:[%s9301_s1 + $0xcc] sm:$0xf]  ;;  %v156_v51 = vld [vmem:[%s9301_s1 + $0xe4] sm:$0xf] }
  0x22   :  { %v158_v52 = vld [vmem:[%s9301_s1 + $0xd0] sm:$0xf]  ;;  %155 = vst [vmem:[#allocation2 + $0xd8] sm:$0xf] %v154_v50  ;;  %157 = vst [vmem:[#allocation2 + $0xdc] sm:$0xf] %v156_v51 }
  0x23   :  { %159 = vst [vmem:[#allocation2 + $0xe0] sm:$0xf] %v158_v52  ;;  %v160_v53 = vld [vmem:[%s9301_s1 + $0xe8] sm:$0xf]  ;;  %v162_v54 = vld [vmem:[%s9301_s1 + $0xd4] sm:$0xf] }
  0x24   :  { %161 = vst [vmem:[#allocation2 + $0xe4] sm:$0xf] %v160_v53  ;;  %163 = vst [vmem:[#allocation2 + $0xe8] sm:$0xf] %v162_v54  ;;  %v168_v56 = vld [vmem:[%s9301_s1 + $0x108] sm:$0xf] }
  0x25   :  { %165 = vst [vmem:[#allocation2 + $0xec] sm:$0xff] %v164_v55   ;;  %v170_v57 = vld [vmem:[%s9301_s1 + $0xf4] sm:$0xf]  ;;  %v172_v58 = vld [vmem:[%s9301_s1 + $0x10c] sm:$0xf]  ;;  %189 = vst [vmem:[#allocation2 + $0x11c] sm:$0xff] %v188_v2  }
  0x26   :  { %169 = vst [vmem:[#allocation2 + $0xf4] sm:$0xf] %v168_v56  ;;  %171 = vst [vmem:[#allocation2 + $0xf8] sm:$0xf] %v170_v57  ;;  %v174_v59 = vld [vmem:[%s9301_s1 + $0xf8] sm:$0xf] }
  0x27   :  { %173 = vst [vmem:[#allocation2 + $0xfc] sm:$0xf] %v172_v58  ;;  %v176_v60 = vld [vmem:[%s9301_s1 + $0x110] sm:$0xf]  ;;  %v178_v61 = vld [vmem:[%s9301_s1 + $0xfc] sm:$0xf] }
  0x28   :  { %175 = vst [vmem:[#allocation2 + $0x100] sm:$0xf] %v174_v59  ;;  %177 = vst [vmem:[#allocation2 + $0x104] sm:$0xf] %v176_v60  ;;  %v180_v62 = vld [vmem:[%s9301_s1 + $0x114] sm:$0xf] }
  0x29   :  { %179 = vst [vmem:[#allocation2 + $0x108] sm:$0xf] %v178_v61  ;;  %v182_v63 = vld [vmem:[%s9301_s1 + $0x100] sm:$0xf]  ;;  %v184_v0 = vld [vmem:[%s9301_s1 + $0x118] sm:$0xf] }
  0x2a   :  { %181 = vst [vmem:[#allocation2 + $0x10c] sm:$0xf] %v180_v62  ;;  %183 = vst [vmem:[#allocation2 + $0x110] sm:$0xf] %v182_v63  ;;  %v186_v1 = vld [vmem:[%s9301_s1 + $0x104] sm:$0xf] }
  0x2b   :  { %185 = vst [vmem:[#allocation2 + $0x114] sm:$0xf] %v184_v0  ;;  %v192_v3 = vld [vmem:[%s9301_s1 + $0x138] sm:$0xf]  ;;  %187 = vst [vmem:[#allocation2 + $0x118] sm:$0xf] %v186_v1 }
  0x2c   :  { %193 = vst [vmem:[#allocation2 + $0x124] sm:$0xf] %v192_v3  ;;  %v194_v4 = vld [vmem:[%s9301_s1 + $0x124] sm:$0xf]  ;;  %v196_v5 = vld [vmem:[%s9301_s1 + $0x13c] sm:$0xf] }
  0x2d   :  { %v198_v6 = vld [vmem:[%s9301_s1 + $0x128] sm:$0xf]  ;;  %195 = vst [vmem:[#allocation2 + $0x128] sm:$0xf] %v194_v4  ;;  %197 = vst [vmem:[#allocation2 + $0x12c] sm:$0xf] %v196_v5 }
  0x2e   :  { %199 = vst [vmem:[#allocation2 + $0x130] sm:$0xf] %v198_v6  ;;  %v200_v7 = vld [vmem:[%s9301_s1 + $0x140] sm:$0xf]  ;;  %v202_v8 = vld [vmem:[%s9301_s1 + $0x12c] sm:$0xf] }
  0x2f   :  { %v204_v9 = vld [vmem:[%s9301_s1 + $0x144] sm:$0xf]  ;;  %201 = vst [vmem:[#allocation2 + $0x134] sm:$0xf] %v200_v7  ;;  %203 = vst [vmem:[#allocation2 + $0x138] sm:$0xf] %v202_v8 }
  0x30   :  { %205 = vst [vmem:[#allocation2 + $0x13c] sm:$0xf] %v204_v9  ;;  %v206_v10 = vld [vmem:[%s9301_s1 + $0x130] sm:$0xf]  ;;  %v208_v11 = vld [vmem:[%s9301_s1 + $0x148] sm:$0xf] }
  0x31   :  { %v210_v12 = vld [vmem:[%s9301_s1 + $0x134] sm:$0xf]  ;;  %207 = vst [vmem:[#allocation2 + $0x140] sm:$0xf] %v206_v10  ;;  %209 = vst [vmem:[#allocation2 + $0x144] sm:$0xf] %v208_v11 }
  0x32   :  { %211 = vst [vmem:[#allocation2 + $0x148] sm:$0xf] %v210_v12  ;;  %v212_v13 = vld [vmem:[%s9301_s1 + $0x14c] sm:$0xff]   ;;  %v216_v14 = vld [vmem:[%s9301_s1 + $0x168] sm:$0xf]  ;;  %v236_v24 = vld [vmem:[%s9301_s1 + $0x17c] sm:$0xff]  }
  0x33   :  { %v218_v15 = vld [vmem:[%s9301_s1 + $0x154] sm:$0xf]  ;;  %213 = vst [vmem:[#allocation2 + $0x14c] sm:$0xff] %v212_v13   ;;  %217 = vst [vmem:[#allocation2 + $0x154] sm:$0xf] %v216_v14  ;;  %v260_v35 = vld [vmem:[%s9301_s1 + $0x1ac] sm:$0xff]  }
  0x34   :  { %219 = vst [vmem:[#allocation2 + $0x158] sm:$0xf] %v218_v15  ;;  %v220_v16 = vld [vmem:[%s9301_s1 + $0x16c] sm:$0xf]  ;;  %v222_v17 = vld [vmem:[%s9301_s1 + $0x158] sm:$0xf] }
  0x35   :  { %v224_v18 = vld [vmem:[%s9301_s1 + $0x170] sm:$0xf]  ;;  %221 = vst [vmem:[#allocation2 + $0x15c] sm:$0xf] %v220_v16  ;;  %223 = vst [vmem:[#allocation2 + $0x160] sm:$0xf] %v222_v17 }
  0x36   :  { %225 = vst [vmem:[#allocation2 + $0x164] sm:$0xf] %v224_v18  ;;  %v226_v19 = vld [vmem:[%s9301_s1 + $0x15c] sm:$0xf]  ;;  %v228_v20 = vld [vmem:[%s9301_s1 + $0x174] sm:$0xf] }
  0x37   :  { %v230_v21 = vld [vmem:[%s9301_s1 + $0x160] sm:$0xf]  ;;  %227 = vst [vmem:[#allocation2 + $0x168] sm:$0xf] %v226_v19  ;;  %229 = vst [vmem:[#allocation2 + $0x16c] sm:$0xf] %v228_v20 }
  0x38   :  { %231 = vst [vmem:[#allocation2 + $0x170] sm:$0xf] %v230_v21  ;;  %v232_v22 = vld [vmem:[%s9301_s1 + $0x178] sm:$0xf]  ;;  %v234_v23 = vld [vmem:[%s9301_s1 + $0x164] sm:$0xf] }
  0x39   :  { %233 = vst [vmem:[#allocation2 + $0x174] sm:$0xf] %v232_v22  ;;  %235 = vst [vmem:[#allocation2 + $0x178] sm:$0xf] %v234_v23  ;;  %v240_v25 = vld [vmem:[%s9301_s1 + $0x198] sm:$0xf] }
  0x3a   :  { %237 = vst [vmem:[#allocation2 + $0x17c] sm:$0xff] %v236_v24   ;;  %v242_v26 = vld [vmem:[%s9301_s1 + $0x184] sm:$0xf]  ;;  %v244_v27 = vld [vmem:[%s9301_s1 + $0x19c] sm:$0xf]  ;;  %261 = vst [vmem:[#allocation2 + $0x1ac] sm:$0xff] %v260_v35  }
  0x3b   :  { %241 = vst [vmem:[#allocation2 + $0x184] sm:$0xf] %v240_v25  ;;  %243 = vst [vmem:[#allocation2 + $0x188] sm:$0xf] %v242_v26  ;;  %v246_v28 = vld [vmem:[%s9301_s1 + $0x188] sm:$0xf] }
  0x3c   :  { %245 = vst [vmem:[#allocation2 + $0x18c] sm:$0xf] %v244_v27  ;;  %v248_v29 = vld [vmem:[%s9301_s1 + $0x1a0] sm:$0xf]  ;;  %v250_v30 = vld [vmem:[%s9301_s1 + $0x18c] sm:$0xf] }
  0x3d   :  { %247 = vst [vmem:[#allocation2 + $0x190] sm:$0xf] %v246_v28  ;;  %249 = vst [vmem:[#allocation2 + $0x194] sm:$0xf] %v248_v29  ;;  %v252_v31 = vld [vmem:[%s9301_s1 + $0x1a4] sm:$0xf] }
  0x3e   :  { %251 = vst [vmem:[#allocation2 + $0x198] sm:$0xf] %v250_v30  ;;  %v254_v32 = vld [vmem:[%s9301_s1 + $0x190] sm:$0xf]  ;;  %v256_v33 = vld [vmem:[%s9301_s1 + $0x1a8] sm:$0xf] }
  0x3f   :  { %253 = vst [vmem:[#allocation2 + $0x19c] sm:$0xf] %v252_v31  ;;  %255 = vst [vmem:[#allocation2 + $0x1a0] sm:$0xf] %v254_v32  ;;  %v258_v34 = vld [vmem:[%s9301_s1 + $0x194] sm:$0xf] }
  0x40   :  { %257 = vst [vmem:[#allocation2 + $0x1a4] sm:$0xf] %v256_v33  ;;  %v264_v36 = vld [vmem:[%s9301_s1 + $0x1c8] sm:$0xf]  ;;  %259 = vst [vmem:[#allocation2 + $0x1a8] sm:$0xf] %v258_v34 }
  0x41   :  { %265 = vst [vmem:[#allocation2 + $0x1b4] sm:$0xf] %v264_v36  ;;  %v266_v37 = vld [vmem:[%s9301_s1 + $0x1b4] sm:$0xf]  ;;  %v268_v38 = vld [vmem:[%s9301_s1 + $0x1cc] sm:$0xf] }
  0x42   :  { %v270_v39 = vld [vmem:[%s9301_s1 + $0x1b8] sm:$0xf]  ;;  %267 = vst [vmem:[#allocation2 + $0x1b8] sm:$0xf] %v266_v37  ;;  %269 = vst [vmem:[#allocation2 + $0x1bc] sm:$0xf] %v268_v38 }
  0x43   :  { %271 = vst [vmem:[#allocation2 + $0x1c0] sm:$0xf] %v270_v39  ;;  %v272_v40 = vld [vmem:[%s9301_s1 + $0x1d0] sm:$0xf]  ;;  %v274_v41 = vld [vmem:[%s9301_s1 + $0x1bc] sm:$0xf] }
  0x44   :  { %v276_v42 = vld [vmem:[%s9301_s1 + $0x1d4] sm:$0xf]  ;;  %273 = vst [vmem:[#allocation2 + $0x1c4] sm:$0xf] %v272_v40  ;;  %275 = vst [vmem:[#allocation2 + $0x1c8] sm:$0xf] %v274_v41 }
  0x45   :  { %277 = vst [vmem:[#allocation2 + $0x1cc] sm:$0xf] %v276_v42  ;;  %v278_v43 = vld [vmem:[%s9301_s1 + $0x1c0] sm:$0xf]  ;;  %v280_v44 = vld [vmem:[%s9301_s1 + $0x1d8] sm:$0xf] }
  0x46   :  { %v282_v45 = vld [vmem:[%s9301_s1 + $0x1c4] sm:$0xf]  ;;  %279 = vst [vmem:[#allocation2 + $0x1d0] sm:$0xf] %v278_v43  ;;  %281 = vst [vmem:[#allocation2 + $0x1d4] sm:$0xf] %v280_v44 }
  0x47   :  { %283 = vst [vmem:[#allocation2 + $0x1d8] sm:$0xf] %v282_v45  ;;  %v284_v46 = vld [vmem:[%s9301_s1 + $0x1dc] sm:$0xff]   ;;  %v288_v47 = vld [vmem:[%s9301_s1 + $0x1f8] sm:$0xf]  ;;  %v308_v57 = vld [vmem:[%s9301_s1 + $0x20c] sm:$0xff]  }
  0x48   :  { %v290_v48 = vld [vmem:[%s9301_s1 + $0x1e4] sm:$0xf]  ;;  %285 = vst [vmem:[#allocation2 + $0x1dc] sm:$0xff] %v284_v46   ;;  %289 = vst [vmem:[#allocation2 + $0x1e4] sm:$0xf] %v288_v47  ;;  %v332_v4 = vld [vmem:[%s9301_s1 + $0x23c] sm:$0xff]  }
  0x49   :  { %291 = vst [vmem:[#allocation2 + $0x1e8] sm:$0xf] %v290_v48  ;;  %v292_v49 = vld [vmem:[%s9301_s1 + $0x1fc] sm:$0xf]  ;;  %v294_v50 = vld [vmem:[%s9301_s1 + $0x1e8] sm:$0xf] }
  0x4a   :  { %v296_v51 = vld [vmem:[%s9301_s1 + $0x200] sm:$0xf]  ;;  %293 = vst [vmem:[#allocation2 + $0x1ec] sm:$0xf] %v292_v49  ;;  %295 = vst [vmem:[#allocation2 + $0x1f0] sm:$0xf] %v294_v50 }
  0x4b   :  { %297 = vst [vmem:[#allocation2 + $0x1f4] sm:$0xf] %v296_v51  ;;  %v298_v52 = vld [vmem:[%s9301_s1 + $0x1ec] sm:$0xf]  ;;  %v300_v53 = vld [vmem:[%s9301_s1 + $0x204] sm:$0xf] }
  0x4c   :  { %v302_v54 = vld [vmem:[%s9301_s1 + $0x1f0] sm:$0xf]  ;;  %299 = vst [vmem:[#allocation2 + $0x1f8] sm:$0xf] %v298_v52  ;;  %301 = vst [vmem:[#allocation2 + $0x1fc] sm:$0xf] %v300_v53 }
  0x4d   :  { %303 = vst [vmem:[#allocation2 + $0x200] sm:$0xf] %v302_v54  ;;  %v304_v55 = vld [vmem:[%s9301_s1 + $0x208] sm:$0xf]  ;;  %v306_v56 = vld [vmem:[%s9301_s1 + $0x1f4] sm:$0xf] }
  0x4e   :  { %305 = vst [vmem:[#allocation2 + $0x204] sm:$0xf] %v304_v55  ;;  %307 = vst [vmem:[#allocation2 + $0x208] sm:$0xf] %v306_v56  ;;  %v312_v58 = vld [vmem:[%s9301_s1 + $0x228] sm:$0xf] }
  0x4f   :  { %309 = vst [vmem:[#allocation2 + $0x20c] sm:$0xff] %v308_v57   ;;  %v314_v59 = vld [vmem:[%s9301_s1 + $0x214] sm:$0xf]  ;;  %v316_v60 = vld [vmem:[%s9301_s1 + $0x22c] sm:$0xf]  ;;  %333 = vst [vmem:[#allocation2 + $0x23c] sm:$0xff] %v332_v4  }
  0x50   :  { %313 = vst [vmem:[#allocation2 + $0x214] sm:$0xf] %v312_v58  ;;  %315 = vst [vmem:[#allocation2 + $0x218] sm:$0xf] %v314_v59  ;;  %v318_v61 = vld [vmem:[%s9301_s1 + $0x218] sm:$0xf] }
  0x51   :  { %317 = vst [vmem:[#allocation2 + $0x21c] sm:$0xf] %v316_v60  ;;  %v320_v62 = vld [vmem:[%s9301_s1 + $0x230] sm:$0xf]  ;;  %v322_v63 = vld [vmem:[%s9301_s1 + $0x21c] sm:$0xf] }
  0x52   :  { %319 = vst [vmem:[#allocation2 + $0x220] sm:$0xf] %v318_v61  ;;  %321 = vst [vmem:[#allocation2 + $0x224] sm:$0xf] %v320_v62  ;;  %v324_v0 = vld [vmem:[%s9301_s1 + $0x234] sm:$0xf] }
  0x53   :  { %323 = vst [vmem:[#allocation2 + $0x228] sm:$0xf] %v322_v63  ;;  %v326_v1 = vld [vmem:[%s9301_s1 + $0x220] sm:$0xf]  ;;  %v328_v2 = vld [vmem:[%s9301_s1 + $0x238] sm:$0xf] }
  0x54   :  { %325 = vst [vmem:[#allocation2 + $0x22c] sm:$0xf] %v324_v0  ;;  %327 = vst [vmem:[#allocation2 + $0x230] sm:$0xf] %v326_v1  ;;  %v330_v3 = vld [vmem:[%s9301_s1 + $0x224] sm:$0xf] }
  0x55   :  { %329 = vst [vmem:[#allocation2 + $0x234] sm:$0xf] %v328_v2  ;;  %v336_v5 = vld [vmem:[%s9301_s1 + $0x258] sm:$0xf]  ;;  %331 = vst [vmem:[#allocation2 + $0x238] sm:$0xf] %v330_v3 }
  0x56   :  { %337 = vst [vmem:[#allocation2 + $0x244] sm:$0xf] %v336_v5  ;;  %v338_v6 = vld [vmem:[%s9301_s1 + $0x244] sm:$0xf]  ;;  %v340_v7 = vld [vmem:[%s9301_s1 + $0x25c] sm:$0xf] }
  0x57   :  { %v342_v8 = vld [vmem:[%s9301_s1 + $0x248] sm:$0xf]  ;;  %339 = vst [vmem:[#allocation2 + $0x248] sm:$0xf] %v338_v6  ;;  %341 = vst [vmem:[#allocation2 + $0x24c] sm:$0xf] %v340_v7 }
  0x58   :  { %343 = vst [vmem:[#allocation2 + $0x250] sm:$0xf] %v342_v8  ;;  %v344_v9 = vld [vmem:[%s9301_s1 + $0x260] sm:$0xf]  ;;  %v346_v10 = vld [vmem:[%s9301_s1 + $0x24c] sm:$0xf] }
  0x59   :  { %v348_v11 = vld [vmem:[%s9301_s1 + $0x264] sm:$0xf]  ;;  %345 = vst [vmem:[#allocation2 + $0x254] sm:$0xf] %v344_v9  ;;  %347 = vst [vmem:[#allocation2 + $0x258] sm:$0xf] %v346_v10 }
  0x5a   :  { %349 = vst [vmem:[#allocation2 + $0x25c] sm:$0xf] %v348_v11  ;;  %v350_v12 = vld [vmem:[%s9301_s1 + $0x250] sm:$0xf]  ;;  %v352_v13 = vld [vmem:[%s9301_s1 + $0x268] sm:$0xf] }
  0x5b   :  { %v354_v14 = vld [vmem:[%s9301_s1 + $0x254] sm:$0xf]  ;;  %351 = vst [vmem:[#allocation2 + $0x260] sm:$0xf] %v350_v12  ;;  %353 = vst [vmem:[#allocation2 + $0x264] sm:$0xf] %v352_v13 }
  0x5c   :  { %355 = vst [vmem:[#allocation2 + $0x268] sm:$0xf] %v354_v14  ;;  %v356_v15 = vld [vmem:[%s9301_s1 + $0x26c] sm:$0xff]   ;;  %v360_v16 = vld [vmem:[%s9301_s1 + $0x288] sm:$0xf]  ;;  %v380_v26 = vld [vmem:[%s9301_s1 + $0x29c] sm:$0xff]  }
  0x5d   :  { %v362_v17 = vld [vmem:[%s9301_s1 + $0x274] sm:$0xf]  ;;  %357 = vst [vmem:[#allocation2 + $0x26c] sm:$0xff] %v356_v15   ;;  %361 = vst [vmem:[#allocation2 + $0x274] sm:$0xf] %v360_v16 }
  0x5e   :  { %363 = vst [vmem:[#allocation2 + $0x278] sm:$0xf] %v362_v17  ;;  %v364_v18 = vld [vmem:[%s9301_s1 + $0x28c] sm:$0xf]  ;;  %v366_v19 = vld [vmem:[%s9301_s1 + $0x278] sm:$0xf] }
  0x5f   :  { %v368_v20 = vld [vmem:[%s9301_s1 + $0x290] sm:$0xf]  ;;  %365 = vst [vmem:[#allocation2 + $0x27c] sm:$0xf] %v364_v18  ;;  %367 = vst [vmem:[#allocation2 + $0x280] sm:$0xf] %v366_v19 }
  0x60   :  { %369 = vst [vmem:[#allocation2 + $0x284] sm:$0xf] %v368_v20  ;;  %v370_v21 = vld [vmem:[%s9301_s1 + $0x27c] sm:$0xf]  ;;  %v372_v22 = vld [vmem:[%s9301_s1 + $0x294] sm:$0xf] }
  0x61   :  { %v374_v23 = vld [vmem:[%s9301_s1 + $0x280] sm:$0xf]  ;;  %371 = vst [vmem:[#allocation2 + $0x288] sm:$0xf] %v370_v21  ;;  %373 = vst [vmem:[#allocation2 + $0x28c] sm:$0xf] %v372_v22 }
  0x62   :  { %375 = vst [vmem:[#allocation2 + $0x290] sm:$0xf] %v374_v23  ;;  %v376_v24 = vld [vmem:[%s9301_s1 + $0x298] sm:$0xf]  ;;  %v378_v25 = vld [vmem:[%s9301_s1 + $0x284] sm:$0xf] }
  0x63   :  { %377 = vst [vmem:[#allocation2 + $0x294] sm:$0xf] %v376_v24  ;;  %379 = vst [vmem:[#allocation2 + $0x298] sm:$0xf] %v378_v25  ;;  %v384_v27 = vld [vmem:[%s9301_s1 + $0x2b8] sm:$0xf] }
  0x64   :  { %381 = vst [vmem:[#allocation2 + $0x29c] sm:$0xff] %v380_v26   ;;  %v386_v28 = vld [vmem:[%s9301_s1 + $0x2a4] sm:$0xf]  ;;  %v388_v29 = vld [vmem:[%s9301_s1 + $0x2bc] sm:$0xf] }
  0x65   :  { %385 = vst [vmem:[#allocation2 + $0x2a4] sm:$0xf] %v384_v27  ;;  %387 = vst [vmem:[#allocation2 + $0x2a8] sm:$0xf] %v386_v28  ;;  %v390_v30 = vld [vmem:[%s9301_s1 + $0x2a8] sm:$0xf] }
  0x66   :  { %389 = vst [vmem:[#allocation2 + $0x2ac] sm:$0xf] %v388_v29  ;;  %v392_v31 = vld [vmem:[%s9301_s1 + $0x2c0] sm:$0xf]  ;;  %v394_v32 = vld [vmem:[%s9301_s1 + $0x2ac] sm:$0xf] }
  0x67   :  { %391 = vst [vmem:[#allocation2 + $0x2b0] sm:$0xf] %v390_v30  ;;  %393 = vst [vmem:[#allocation2 + $0x2b4] sm:$0xf] %v392_v31  ;;  %v396_v33 = vld [vmem:[%s9301_s1 + $0x2c4] sm:$0xf] }
  0x68   :  { %395 = vst [vmem:[#allocation2 + $0x2b8] sm:$0xf] %v394_v32  ;;  %v398_v34 = vld [vmem:[%s9301_s1 + $0x2b0] sm:$0xf]  ;;  %v400_v35 = vld [vmem:[%s9301_s1 + $0x2c8] sm:$0xf] }
  0x69   :  { %397 = vst [vmem:[#allocation2 + $0x2bc] sm:$0xf] %v396_v33  ;;  %399 = vst [vmem:[#allocation2 + $0x2c0] sm:$0xf] %v398_v34  ;;  %v402_v36 = vld [vmem:[%s9301_s1 + $0x2b4] sm:$0xf] }
  0x6a   :  { %401 = vst [vmem:[#allocation2 + $0x2c4] sm:$0xf] %v400_v35  ;;  %v404_v37 = vld [vmem:[%s9301_s1 + $0x2cc] sm:$0xf]  ;;  %403 = vst [vmem:[#allocation2 + $0x2c8] sm:$0xf] %v402_v36 }
  0x6b   :  { %405 = vst [vmem:[#allocation2 + $0x2cc] sm:$0xf] %v404_v37 }
  0x6c   :  { %796 = vsyncadd [#allocation5], 11520  ;;  %v7452_v38 = vld [vmem:[%s9302_s2 + $0x40] sm:$0xff]   ;;  %v7456_v42 = vld [vmem:[%s9302_s2 + $0x48] sm:$0xff]   ;;  %vm1391_vm0 = vcmask 517120  }
  0x6d   :  { %v7453_v39 = vld [vmem:[%s9302_s2] sm:$0xff]   ;;  %6558 = vmatprep.subr.bf16.mxu0 %v7452_v38  ;;  %v7457_v43 = vld [vmem:[%s9302_s2 + $0x8] sm:$0xff]   ;;  %v7460_v46 = vld [vmem:[%s9302_s2 + $0x50] sm:$0xff]  }
  0x6e   :  { %v7454_v40 = vld [vmem:[%s9302_s2 + $0xc0] sm:$0xff]   ;;  %6559 = vmatpush3.bf16.msra.mxu0 %v7453_v39  ;;  %v7458_v44 = vld [vmem:[%s9302_s2 + $0xc8] sm:$0xff]   ;;  %v7461_v47 = vld [vmem:[%s9302_s2 + $0x10] sm:$0xff]  }
  0x6f   :  { %v7455_v41 = vld [vmem:[%s9302_s2 + $0x80] sm:$0xff]   ;;  %6580 = vmatprep.subr.bf16.mxu1 %v7454_v40  ;;  %6560 = vmatprep.subr.bf16.mxu0 %v7456_v42  ;;  %v7459_v45 = vld [vmem:[%s9302_s2 + $0x88] sm:$0xff]   ;;  %v7462_v48 = vld [vmem:[%s9302_s2 + $0xd0] sm:$0xff]  }
  0x70   :  { %6581 = vmatpush3.bf16.msra.mxu1 %v7455_v41  ;;  %v7463_v49 = vld [vmem:[%s9302_s2 + $0x90] sm:$0xff]   ;;  %v7464_v50 = vld [vmem:[%s9302_s2 + $0x58] sm:$0xff]   ;;  %v7468_v54 = vld [vmem:[%s9302_s2 + $0x60] sm:$0xff]  }
  0x71   :  { %6582 = vmatprep.subr.bf16.mxu1 %v7458_v44  ;;  %v7465_v51 = vld [vmem:[%s9302_s2 + $0x18] sm:$0xff]   ;;  %v7469_v55 = vld [vmem:[%s9302_s2 + $0x20] sm:$0xff]   ;;  %v7472_v58 = vld [vmem:[%s9302_s2 + $0x68] sm:$0xff]  }
  0x72   :  { %6561 = vmatpush3.bf16.msra.mxu0 %v7457_v43  ;;  %v7466_v52 = vld [vmem:[%s9302_s2 + $0xd8] sm:$0xff]   ;;  %v7470_v56 = vld [vmem:[%s9302_s2 + $0xe0] sm:$0xff]   ;;  %v7473_v59 = vld [vmem:[%s9302_s2 + $0x28] sm:$0xff]  }
  0x73   :  { %6562 = vmatprep.subr.bf16.mxu0 %v7460_v46  ;;  %v7467_v53 = vld [vmem:[%s9302_s2 + $0x98] sm:$0xff]   ;;  %v7471_v57 = vld [vmem:[%s9302_s2 + $0xa0] sm:$0xff]   ;;  %v7474_v60 = vld [vmem:[%s9302_s2 + $0xe8] sm:$0xff]  }
  0x74   :  { %6583 = vmatpush3.bf16.msra.mxu1 %v7459_v45  ;;  %v7475_v61 = vld [vmem:[%s9302_s2 + $0xa8] sm:$0xff]   ;;  %v7476_v62 = vld [vmem:[%s9302_s2 + $0x70] sm:$0xff]   ;;  %v7480_v2 = vld [vmem:[%s9302_s2 + $0x78] sm:$0xff]   ;;  %v7891_v45 = vmov 1983009808  }
  0x75   :  { %6584 = vmatprep.subr.bf16.mxu1 %v7462_v48  ;;  %v7477_v63 = vld [vmem:[%s9302_s2 + $0x30] sm:$0xff]   ;;  %v7481_v3 = vld [vmem:[%s9302_s2 + $0x38] sm:$0xff]   ;;  %v7487_v8 = vld [vmem:[%s9302_s2 + $0x140] sm:$0xff]   ;;  %v1351_v46 = vunpack.c.l.s4 %v7891_v45 }
  0x76   :  { %6563 = vmatpush3.bf16.msra.mxu0 %v7461_v47  ;;  %v7478_v0 = vld [vmem:[%s9302_s2 + $0xf0] sm:$0xff]   ;;  %v7482_v4 = vld [vmem:[%s9302_s2 + $0xf8] sm:$0xff]   ;;  %v7488_v9 = vld [vmem:[%s9300_s0 + $0x8] ss:$24 sps:$4 sm:$0xff]   ;;  %v1353_v47 = vlaneseq }
  0x77   :  { %6564 = vmatprep.subr.bf16.mxu0 %v7464_v50  ;;  %v7479_v1 = vld [vmem:[%s9302_s2 + $0xb0] sm:$0xff]   ;;  %v7483_v5 = vld [vmem:[%s9300_s0] ss:$24 sps:$4 sm:$0xff]   ;;  %v7485_v6 = vld [vmem:[%s9300_s0 + $0x4] ss:$24 sps:$4 sm:$0xff]   ;;  %v1352_v48 = vunpack.c.0.s8 %v1351_v46 }
  0x78   :  { %6585 = vmatpush3.bf16.msra.mxu1 %v7463_v49  ;;  %v7486_v7 = vld [vmem:[%s9302_s2 + $0xb8] sm:$0xff]   ;;  %1256 = vmatprep.mubr.bf16.mxu0 %v7485_v6  ;;  %v7490_v10 = vld [vmem:[%s9300_s0 + $0xc] ss:$24 sps:$4 sm:$0xff]   ;;  %v7494_v14 = vld [vmem:[%s9302_s2 + $0x150] sm:$0xff]   ;;  %v1354_v49 = vshrl.u32 %v1353_v47, 7 }
  0x79   :  { %6586 = vmatprep.subr.bf16.mxu1 %v7466_v52  ;;  %v7491_v11 = vld [vmem:[%s9302_s2 + $0x100] sm:$0xff]   ;;  %1297 = vmatprep.mubr.bf16.mxu1 %v7490_v10  ;;  %v7492_v12 = vld [vmem:[%s9302_s2 + $0x148] sm:$0xff]   ;;  %v7495_v15 = vld [vmem:[%s9302_s2 + $0x110] sm:$0xff]  }
  0x7a   :  { %6565 = vmatpush3.bf16.msra.mxu0 %v7465_v51  ;;  %v7493_v13 = vld [vmem:[%s9302_s2 + $0x108] sm:$0xff]   ;;  %v7496_v16 = vld [vmem:[%s9302_s2 + $0x158] sm:$0xff]   ;;  %v7498_v18 = vld [vmem:[%s9302_s2 + $0x160] sm:$0xff]  }
  0x7b   :  { %6566 = vmatprep.subr.bf16.mxu0 %v7468_v54  ;;  %v7497_v17 = vld [vmem:[%s9302_s2 + $0x118] sm:$0xff]   ;;  %v7499_v19 = vld [vmem:[%s9302_s2 + $0x120] sm:$0xff]   ;;  %v7500_v20 = vld [vmem:[%s9302_s2 + $0x168] sm:$0xff]  }
  0x7c   :  { %6587 = vmatpush3.bf16.msra.mxu1 %v7467_v53  ;;  %v7508_v21 = vld [vmem:[%s9300_s0 + $0x14] ss:$24 sps:$4 sm:$0xff]   ;;  %v7504_v25 = vld [vmem:[%s9302_s2 + $0x178] sm:$0xff]   ;;  %v7506_v27 = vld [vmem:[%s9300_s0 + $0x10] ss:$24 sps:$4 sm:$0xff]   ;;  %v1355_v53 = vsub.s32 %v1352_v48, %v1354_v49 }
  0x7d   :  { %6588 = vmatprep.subr.bf16.mxu1 %v7470_v56  ;;  %v7501_v22 = vld [vmem:[%s9302_s2 + $0x128] sm:$0xff]   ;;  %v7502_v23 = vld [vmem:[%s9302_s2 + $0x170] sm:$0xff]   ;;  %v7505_v26 = vld [vmem:[%s9302_s2 + $0x138] sm:$0xff]  }
  0x7e   :  { %6567 = vmatpush3.bf16.msra.mxu0 %v7469_v55  ;;  %v7503_v24 = vld [vmem:[%s9302_s2 + $0x130] sm:$0xff]   ;;  %v6377_v29 = vld [vmem:[%s9303_s3] ss:$0 sm:$0xff] }
  0x7f   :  { %6568 = vmatprep.subr.bf16.mxu0 %v7472_v58 }
  0x80   :  { %6589 = vmatpush3.bf16.msra.mxu1 %v7471_v57 }
  0x81   :  { %6590 = vmatprep.subr.bf16.mxu1 %v7474_v60 }
  0x82   :  { %6569 = vmatpush3.bf16.msra.mxu0 %v7473_v59 }
  0x83   :  { %6570 = vmatprep.subr.bf16.mxu0 %v7476_v62 }
  0x84   :  { %6591 = vmatpush3.bf16.msra.mxu1 %v7475_v61 }
  0x85   :  { %6592 = vmatprep.subr.bf16.mxu1 %v7478_v0 }
  0x86   :  { %6571 = vmatpush3.bf16.msra.mxu0 %v7477_v63 }
  0x87   :  { %6572 = vmatprep.subr.bf16.mxu0 %v7480_v2 }
  0x88   :  { %6593 = vmatpush3.bf16.msra.mxu1 %v7479_v1 }
  0x89   :  { %6594 = vmatprep.subr.bf16.mxu1 %v7482_v4 }
  0x8a   :  { %6573 = vmatpush3.bf16.msra.mxu0 %v7481_v3 }
  0x8b   :  { %6602 = vmatprep.subr.bf16.mxu0 %v7487_v8 }
  0x8c   :  { %6595 = vmatpush3.bf16.msra.mxu1 %v7486_v7 }
  0x8d   :  { %1257 = vmatmul.mubr.bf16.vlgmr.msra.gmra.mrb[0].mxu0 %v7483_v5 }
  0x8e   :  { %6603 = vmatpush3.bf16.msra.mxu0 %v7491_v11  ;;  %1338 = vmatprep.mubr.bf16.mxu0 %v7508_v21 }
  0x8f   :  { %1298 = vmatmul.mubr.bf16.vlgmr.msra.gmra.mrb[0].mxu1 %v7488_v9  ;;  %6604 = vmatprep.subr.bf16.mxu0 %v7492_v12 }
  0x92   :  { %6605 = vmatpush3.bf16.msra.mxu0 %v7493_v13 }
  0x93   :  { %6606 = vmatprep.subr.bf16.mxu0 %v7494_v14 }
  0x96   :  { %6607 = vmatpush3.bf16.msra.mxu0 %v7495_v15 }
  0x97   :  { %6608 = vmatprep.subr.bf16.mxu0 %v7496_v16 }
  0x9a   :  { %6609 = vmatpush3.bf16.msra.mxu0 %v7497_v17 }
  0x9b   :  { %6610 = vmatprep.subr.bf16.mxu0 %v7498_v18 }
  0x9e   :  { %6611 = vmatpush3.bf16.msra.mxu0 %v7499_v19 }
  0x9f   :  { %6612 = vmatprep.subr.bf16.mxu0 %v7500_v20 }
  0xa2   :  { %6613 = vmatpush3.bf16.msra.mxu0 %v7501_v22 }
  0xa3   :  { %6614 = vmatprep.subr.bf16.mxu0 %v7502_v23 }
  0xa6   :  { %6615 = vmatpush3.bf16.msra.mxu0 %v7503_v24 }
  0xa7   :  { %6616 = vmatprep.subr.bf16.mxu0 %v7504_v25 }
  0xaa   :  { %6617 = vmatpush3.bf16.msra.mxu0 %v7505_v26 }
  0xad   :  { %1339 = vmatmul.mubr.bf16.vlgmr.msra.gmra.mrb[4].mxu0 %v7506_v27 }
 0x160   :  { %v6574_v28 = vpop.f32.mrb[0].mxu0 }
 0x161   :  { %v6575_v30 = vpop.f32.mrb[1].mxu0 }
 0x162   :  { %v6576_v31 = vadd.f32 %v6575_v30, %v6574_v28  ;;  %v6577_v32 = vpop.f32.mrb[2].mxu0  ;;  %v6596_v33 = vpop.f32.mrb[0].mxu1 }
 0x163   :  { %v6578_v34 = vpop.f32.mrb[3].mxu0  ;;  %v6597_v37 = vpop.f32.mrb[1].mxu1 }
 0x164   :  { %v1259_v35 = vadd.f32 %v6576_v31, %v6377_v29  ;;  %v6579_v36 = vadd.f32 %v6578_v34, %v6577_v32  ;;  %v6598_v38 = vadd.f32 %v6597_v37, %v6596_v33  ;;  %v6599_v39 = vpop.f32.mrb[2].mxu1 }
 0x165   :  { %v6600_v41 = vpop.f32.mrb[3].mxu1 }
 0x166   :  { %v1262_v40 = vadd.f32 %v6579_v36, %v6377_v29  ;;  %v1300_v42 = vadd.f32 %v6598_v38, %v1259_v35  ;;  %v6601_v43 = vadd.f32 %v6600_v41, %v6599_v39 }
 0x168   :  { %v1303_v44 = vadd.f32 %v6601_v43, %v1262_v40 }
 0x180   :  { %v6618_v50 = vpop.f32.mrb[4].mxu0 }
 0x181   :  { %v6619_v51 = vpop.f32.mrb[5].mxu0 }
 0x182   :  { %v6620_v52 = vadd.f32 %v6619_v51, %v6618_v50  ;;  %v6621_v54 = vpop.f32.mrb[6].mxu0 }
 0x183   :  { %v6622_v55 = vpop.f32.mrb[7].mxu0 }
 0x184   :  { %v1341_v56 = vadd.f32 %v6620_v52, %v1300_v42  ;;  %v6623_v57 = vadd.f32 %v6622_v55, %v6621_v54 }
 0x186   :  { %v1349_v58 = vcombine.high %v1341_v56, %v1341_v56  ;;  %v1356_v59 = vrot.slane %v1341_v56, %v1355_v53  ;;  %v1344_v60 = vadd.f32 %v6623_v57, %v1303_v44 }
 0x188   :  { %v1363_v61 = vrot.slane %v1349_v58, %v1355_v53  ;;  %v1364_v62 = vcombine.high %v1356_v59, %v1356_v59  ;;  %1392 = vst.msk [vmem:[#allocation3] sm:$0x3] %vm1391_vm0, %v1356_v59  ;;  %v1366_v63 = vcombine.high %v1344_v60, %v1344_v60  ;;  %v1373_v0 = vrot.slane %v1344_v60, %v1355_v53 }
 0x18a   :  { %v1365_v1 = vcombine.high %v1363_v61, %v1363_v61  ;;  %1393 = vst.msk [vmem:[#allocation3 + $0x2] sm:$0x3] %vm1391_vm0, %v1364_v62  ;;  %1394 = vst.msk [vmem:[#allocation3 + $0x4] sm:$0x3] %vm1391_vm0, %v1363_v61  ;;  %v1380_v2 = vrot.slane %v1366_v63, %v1355_v53  ;;  %v1381_v3 = vcombine.high %v1373_v0, %v1373_v0 }
 0x18b   :  { %1396 = vst.msk [vmem:[#allocation3 + $0x8] sm:$0x3] %vm1391_vm0, %v1373_v0 }
 0x18c   :  { %1395 = vst.msk [vmem:[#allocation3 + $0x6] sm:$0x3] %vm1391_vm0, %v1365_v1  ;;  %v1382_v4 = vcombine.high %v1380_v2, %v1380_v2  ;;  %1397 = vst.msk [vmem:[#allocation3 + $0xa] sm:$0x3] %vm1391_vm0, %v1381_v3 }
 0x18d   :  { %1398 = vst.msk [vmem:[#allocation3 + $0xc] sm:$0x3] %vm1391_vm0, %v1380_v2 }
 0x18e   :  { %1399 = vst.msk [vmem:[#allocation3 + $0xe] sm:$0x3] %vm1391_vm0, %v1382_v4 }
 0x18f   :  { %7887 = dma.done.wait [#allocation5], 11520 }
 0x190   :  { %7888 = vsyncadd [#allocation5], 4294955776  ;;  %v7509_v5 = vld [vmem:[%s9305_s5 + $0x40] sm:$0xff]   ;;  %v7513_v9 = vld [vmem:[%s9305_s5 + $0x48] sm:$0xff]   ;;  %v7892_v46 = vmov 0.0|0.0   ;;  %vm7893_vm1 = vmmov 0  }
 0x191   :  { %v7510_v6 = vld [vmem:[%s9305_s5] sm:$0xff]   ;;  %6624 = vmatprep.subr.bf16.mxu1 %v7509_v5  ;;  %v7514_v10 = vld [vmem:[%s9305_s5 + $0x8] sm:$0xff]   ;;  %v7517_v13 = vld [vmem:[%s9305_s5 + $0x50] sm:$0xff]   ;;  %vm2344_vm2 = vcmask 523264   ;;  %s7896_s23 = smov 16   ;;  %s7897_s0 = smov 32  }
 0x192   :  { %v7511_v7 = vld [vmem:[%s9305_s5 + $0xc0] sm:$0xff]   ;;  %6625 = vmatpush3.bf16.msra.mxu1 %v7510_v6  ;;  %v7515_v11 = vld [vmem:[%s9305_s5 + $0xc8] sm:$0xff]   ;;  %v7518_v14 = vld [vmem:[%s9305_s5 + $0x10] sm:$0xff]   ;;  %s7898_s2 = smov 80   ;;  %vm2381_vm3 = vcmask 130048   ;;  %vm6327_vm4 = vcmask 58368  }
 0x193   :  { %v7512_v8 = vld [vmem:[%s9305_s5 + $0x80] sm:$0xff]   ;;  %6730 = vmatprep.subr.bf16.mxu0 %v7511_v7  ;;  %6626 = vmatprep.subr.bf16.mxu1 %v7513_v9  ;;  %v7516_v12 = vld [vmem:[%s9305_s5 + $0x88] sm:$0xff]   ;;  %v7519_v15 = vld [vmem:[%s9305_s5 + $0xd0] sm:$0xff]   ;;  %s7899_s3 = smov [#allocation6]   ;;  %vm6340_vm5 = vcmask 64512  }
 0x194   :  { %6731 = vmatpush3.bf16.msra.mxu0 %v7512_v8  ;;  %v7520_v16 = vld [vmem:[%s9305_s5 + $0x90] sm:$0xff]   ;;  %v7521_v17 = vld [vmem:[%s9305_s5 + $0x58] sm:$0xff]   ;;  %v7525_v21 = vld [vmem:[%s9305_s5 + $0x60] sm:$0xff]   ;;  %s6349_s24 = sshll.u32 %s7899_s3, 4  ;;  %s6350_s24 = int_to_ptr.vmem [resolvable:$true] %s6349_s24 }
 0x195   :  { %6732 = vmatprep.subr.bf16.mxu0 %v7515_v11  ;;  %v7522_v18 = vld [vmem:[%s9305_s5 + $0x18] sm:$0xff]   ;;  %v7526_v22 = vld [vmem:[%s9305_s5 + $0x20] sm:$0xff]   ;;  %v7529_v25 = vld [vmem:[%s9305_s5 + $0x68] sm:$0xff]   ;;  %s7865_s25 = scalar_lea.vmem %s6350_s24, 32  ;;  %p7870_p1 = scmp.lt.s32.totalorder %s6350_s24, %s6350_s24 }
 0x196   :  { %6627 = vmatpush3.bf16.msra.mxu1 %v7514_v10  ;;  %v7523_v19 = vld [vmem:[%s9305_s5 + $0xd8] sm:$0xff]   ;;  %v7527_v23 = vld [vmem:[%s9305_s5 + $0xe0] sm:$0xff]   ;;  %v7530_v26 = vld [vmem:[%s9305_s5 + $0x28] sm:$0xff]   ;;  %p7866_p0 = scmp.ne.s32.totalorder %s6350_s24, %s7865_s25  ;;  %p7871_p2 = scmp.lt.s32.totalorder %s7865_s25, %s7865_s25 }
 0x197   :  { %6628 = vmatprep.subr.bf16.mxu1 %v7517_v13  ;;  %v7524_v20 = vld [vmem:[%s9305_s5 + $0x98] sm:$0xff]   ;;  %v7528_v24 = vld [vmem:[%s9305_s5 + $0xa0] sm:$0xff]   ;;  %v7531_v27 = vld [vmem:[%s9305_s5 + $0xe8] sm:$0xff]  }
 0x198   :  { %6733 = vmatpush3.bf16.msra.mxu0 %v7516_v12  ;;  %v7532_v28 = vld [vmem:[%s9305_s5 + $0xa8] sm:$0xff]   ;;  %v7533_v29 = vld [vmem:[%s9305_s5 + $0x70] sm:$0xff]   ;;  %v7537_v33 = vld [vmem:[%s9305_s5 + $0x78] sm:$0xff]   ;;  %p7872_p3 = por %p7871_p2, %p7870_p1 }
 0x199   :  { %6734 = vmatprep.subr.bf16.mxu0 %v7519_v15  ;;  %v7534_v30 = vld [vmem:[%s9305_s5 + $0x30] sm:$0xff]   ;;  %v7538_v34 = vld [vmem:[%s9305_s5 + $0x38] sm:$0xff]   ;;  %v1405_v36 = vld [vmem:[#allocation2 + $0x8] sm:$0xff] }
 0x19a   :  { %6629 = vmatpush3.bf16.msra.mxu1 %v7518_v14  ;;  %v7535_v31 = vld [vmem:[%s9305_s5 + $0xf0] sm:$0xff]   ;;  %v7539_v35 = vld [vmem:[%s9305_s5 + $0xf8] sm:$0xff]   ;;  %1917 = vmatprep.mubr.bf16.mxu1 %v1405_v36  ;;  %v1404_v38 = vld [vmem:[#allocation2] sm:$0xff]  ;;  %p7873_p4 = pnand %p7872_p3, %p7866_p0 }
 0x19b   :  { %6630 = vmatprep.subr.bf16.mxu1 %v7521_v17  ;;  %v7536_v32 = vld [vmem:[%s9305_s5 + $0xb0] sm:$0xff]   ;;  %v7540_v37 = vld [vmem:[%s9305_s5 + $0xb8] sm:$0xff]   ;;  %v7541_v39 = vld [vmem:[%s9305_s5 + $0x140] sm:$0xff]  }
 0x19c   :  { %6735 = vmatpush3.bf16.msra.mxu0 %v7520_v16  ;;  %v1407_v40 = vld [vmem:[#allocation2 + $0x18] sm:$0xff]  ;;  %v7542_v41 = vld [vmem:[%s9305_s5 + $0x100] sm:$0xff]   ;;  %v1406_v42 = vld [vmem:[#allocation2 + $0x10] sm:$0xff] }
 0x19d   :  { %6736 = vmatprep.subr.bf16.mxu0 %v7523_v19  ;;  %2070 = vmatprep.mubr.bf16.mxu0 %v1407_v40  ;;  %v1411_v43 = vld [vmem:[#allocation2 + $0x38] sm:$0xff]  ;;  %v1413_v44 = vld [vmem:[#allocation2 + $0x48] sm:$0xff]  ;;  %v1410_v47 = vld [vmem:[#allocation2 + $0x30] sm:$0xff] }
 0x19e   :  { %6631 = vmatpush3.bf16.msra.mxu1 %v7522_v18  ;;  %v7543_v45 = vld [vmem:[%s9305_s5 + $0x148] sm:$0xff]   ;;  %v1412_v50 = vld [vmem:[#allocation2 + $0x40] sm:$0xff]  ;;  %v7545_v51 = vld [vmem:[%s9305_s5 + $0x150] sm:$0xff]  }
 0x19f   :  { %6632 = vmatprep.subr.bf16.mxu1 %v7525_v21  ;;  %v7544_v48 = vld [vmem:[%s9305_s5 + $0x108] sm:$0xff]   ;;  %v1419_v52 = vld [vmem:[#allocation2 + $0x78] sm:$0xff]  ;;  %v7546_v53 = vld [vmem:[%s9305_s5 + $0x110] sm:$0xff]  }
 0x1a0   :  { %6737 = vmatpush3.bf16.msra.mxu0 %v7524_v20  ;;  %v1417_v49 = vld [vmem:[#allocation2 + $0x68] sm:$0xff]  ;;  %v1416_v54 = vld [vmem:[#allocation2 + $0x60] sm:$0xff]  ;;  %v7547_v55 = vld [vmem:[%s9305_s5 + $0x158] sm:$0xff]  }
 0x1a1   :  { %6738 = vmatprep.subr.bf16.mxu0 %v7527_v23  ;;  %v7548_v56 = vld [vmem:[%s9305_s5 + $0x118] sm:$0xff]   ;;  %v1418_v58 = vld [vmem:[#allocation2 + $0x70] sm:$0xff]  ;;  %v1425_v59 = vld [vmem:[#allocation2 + $0xa8] sm:$0xff] }
 0x1a2   :  { %6633 = vmatpush3.bf16.msra.mxu1 %v7526_v22  ;;  %v1423_v57 = vld [vmem:[#allocation2 + $0x98] sm:$0xff]  ;;  %v7549_v60 = vld [vmem:[%s9305_s5 + $0x160] sm:$0xff]   ;;  %v1422_v62 = vld [vmem:[#allocation2 + $0x90] sm:$0xff] }
 0x1a3   :  { %6634 = vmatprep.subr.bf16.mxu1 %v7529_v25  ;;  %v7550_v61 = vld [vmem:[%s9305_s5 + $0x120] sm:$0xff]   ;;  %v1429_v63 = vld [vmem:[#allocation2 + $0xc8] sm:$0xff]  ;;  %v1431_v3 = vld [vmem:[#allocation2 + $0xd8] sm:$0xff] }
 0x1a4   :  { %6739 = vmatpush3.bf16.msra.mxu0 %v7528_v24  ;;  %v7551_v0 = vld [vmem:[%s9305_s5 + $0x168] sm:$0xff]   ;;  %v1424_v2 = vld [vmem:[#allocation2 + $0xa0] sm:$0xff]  ;;  %v7553_v4 = vld [vmem:[%s9305_s5 + $0x170] sm:$0xff]  }
 0x1a5   :  { %6740 = vmatprep.subr.bf16.mxu0 %v7531_v27  ;;  %v7552_v1 = vld [vmem:[%s9305_s5 + $0x128] sm:$0xff]   ;;  %v7554_v5 = vld [vmem:[%s9305_s5 + $0x130] sm:$0xff]   ;;  %v1428_v6 = vld [vmem:[#allocation2 + $0xc0] sm:$0xff] }
 0x1a6   :  { %6635 = vmatpush3.bf16.msra.mxu1 %v7530_v26  ;;  %v1435_v7 = vld [vmem:[#allocation2 + $0xf8] sm:$0xff]  ;;  %v1430_v9 = vld [vmem:[#allocation2 + $0xd0] sm:$0xff]  ;;  %v1437_v11 = vld [vmem:[#allocation2 + $0x108] sm:$0xff] }
 0x1a7   :  { %6636 = vmatprep.subr.bf16.mxu1 %v7533_v29  ;;  %v7555_v8 = vld [vmem:[%s9305_s5 + $0x178] sm:$0xff]   ;;  %v2377_v12 = vld [vmem:[%s9307_s7] sm:$0xff]  ;;  %v2378_v13 = vld [vmem:[%s9307_s7 + $0x8] sm:$0xff] }
 0x1a8   :  { %6741 = vmatpush3.bf16.msra.mxu0 %v7532_v28  ;;  %v7556_v10 = vld [vmem:[%s9305_s5 + $0x138] sm:$0xff]   ;;  %v8768_v14 = vpack.c.bf16 %v2378_v13, %v2377_v12  ;;  %v1434_v15 = vld [vmem:[#allocation2 + $0xf0] sm:$0xff]  ;;  %v1441_v16 = vld [vmem:[#allocation2 + $0x128] sm:$0xff] }
 0x1a9   :  { %6742 = vmatprep.subr.bf16.mxu0 %v7535_v31  ;;  %v1436_v17 = vld [vmem:[#allocation2 + $0x100] sm:$0xff]  ;;  %v1443_v18 = vld [vmem:[#allocation2 + $0x138] sm:$0xff]  ;;  %v1442_v21 = vld [vmem:[#allocation2 + $0x130] sm:$0xff] }
 0x1aa   :  { %6637 = vmatpush3.bf16.msra.mxu1 %v7534_v30  ;;  %v1440_v19 = vld [vmem:[#allocation2 + $0x120] sm:$0xff]  ;;  %v1447_v20 = vld [vmem:[#allocation2 + $0x158] sm:$0xff]  ;;  %v1449_v22 = vld [vmem:[#allocation2 + $0x168] sm:$0xff] }
 0x1ab   :  { %6638 = vmatprep.subr.bf16.mxu1 %v7537_v33  ;;  %v1446_v23 = vld [vmem:[#allocation2 + $0x150] sm:$0xff]  ;;  %v1453_v24 = vld [vmem:[#allocation2 + $0x188] sm:$0xff]  ;;  %v1448_v25 = vld [vmem:[#allocation2 + $0x160] sm:$0xff] }
 0x1ac   :  { %6743 = vmatpush3.bf16.msra.mxu0 %v7536_v32  ;;  %v1455_v26 = vld [vmem:[#allocation2 + $0x198] sm:$0xff]  ;;  %v1452_v27 = vld [vmem:[#allocation2 + $0x180] sm:$0xff]  ;;  %v1454_v29 = vld [vmem:[#allocation2 + $0x190] sm:$0xff] }
 0x1ad   :  { %6744 = vmatprep.subr.bf16.mxu0 %v7539_v35  ;;  %v1459_v28 = vld [vmem:[#allocation2 + $0x1b8] sm:$0xff]  ;;  %v1461_v30 = vld [vmem:[#allocation2 + $0x1c8] sm:$0xff]  ;;  %v1458_v31 = vld [vmem:[#allocation2 + $0x1b0] sm:$0xff] }
 0x1ae   :  { %6639 = vmatpush3.bf16.msra.mxu1 %v7538_v34  ;;  %v1465_v32 = vld [vmem:[#allocation2 + $0x1e8] sm:$0xff]  ;;  %v1460_v33 = vld [vmem:[#allocation2 + $0x1c0] sm:$0xff]  ;;  %v1467_v34 = vld [vmem:[#allocation2 + $0x1f8] sm:$0xff] }
 0x1af   :  { %6836 = vmatprep.subr.bf16.mxu1 %v7541_v39  ;;  %v1464_v35 = vld [vmem:[#allocation2 + $0x1e0] sm:$0xff]  ;;  %v1471_v36 = vld [vmem:[#allocation2 + $0x218] sm:$0xff]  ;;  %v1470_v39 = vld [vmem:[#allocation2 + $0x210] sm:$0xff] }
 0x1b0   :  { %6745 = vmatpush3.bf16.msra.mxu0 %v7540_v37  ;;  %v1466_v37 = vld [vmem:[#allocation2 + $0x1f0] sm:$0xff]  ;;  %v1477_v40 = vld [vmem:[#allocation2 + $0x248] sm:$0xff]  ;;  %v1468_v12 = vld [vmem:[#allocation2 + $0x200] sm:$0xff] }
 0x1b1   :  { %1918 = vmatmul.mubr.bf16.vlgmr.msra.gmra.mrb[4].mxu1 %v1404_v38  ;;  %7329 = vmatprep.subr.bf16.mxu0 %v7892_v46  ;;  %v1473_v38 = vld [vmem:[#allocation2 + $0x228] sm:$0xff]  ;;  %v1475_v13 = vld [vmem:[#allocation2 + $0x238] sm:$0xff] }
 0x1b2   :  { %6837 = vmatpush3.bf16.msra.mxu1 %v7542_v41  ;;  %1925 = vmatprep.mubr.bf16.mxu1 %v1411_v43  ;;  %v1472_v41 = vld [vmem:[#allocation2 + $0x220] sm:$0xff] }
 0x1b3   :  { %2071 = vmatmul.mubr.bf16.vlgmr.msra.gmra.mrb[8].mxu0 %v1406_v42  ;;  %6838 = vmatprep.subr.bf16.mxu1 %v7543_v45  ;;  %v1479_v42 = vld [vmem:[#allocation2 + $0x258] sm:$0xff]  ;;  %v1476_v43 = vld [vmem:[#allocation2 + $0x240] sm:$0xff]  ;;  %v1478_v45 = vld [vmem:[#allocation2 + $0x250] sm:$0xff] }
 0x1b4   :  { %2078 = vmatprep.mubr.bf16.mxu0 %v1413_v44  ;;  %7331 = vmatpush3.bf16.msra.mxu0 %v8768_v14  ;;  %v1483_v44 = vld [vmem:[#allocation2 + $0x278] sm:$0xff] }
 0x1b5   :  { %7332 = vmatprep.subr.bf16.mxu0 %v7892_v46 }
 0x1b6   :  { %6839 = vmatpush3.bf16.msra.mxu1 %v7544_v48  ;;  %v1482_v48 = vld [vmem:[#allocation2 + $0x270] sm:$0xff] }
 0x1b7   :  { %6840 = vmatprep.subr.bf16.mxu1 %v7545_v51  ;;  %v1491_v51 = vld [vmem:[#allocation2 + $0x2b8] sm:$0xff] }
 0x1b9   :  { %1926 = vmatmul.mubr.bf16.gmra.mrb[8].mxu1 %v1410_v47  ;;  %v1485_v47 = vld [vmem:[#allocation2 + $0x288] sm:$0xff] }
 0x1ba   :  { %1933 = vmatprep.mubr.bf16.mxu1 %v1417_v49  ;;  %6841 = vmatpush3.bf16.msra.mxu1 %v7546_v53  ;;  %v1489_v49 = vld [vmem:[#allocation2 + $0x2a8] sm:$0xff] }
 0x1bb   :  { %2079 = vmatmul.mubr.bf16.gmra.mrb[12].mxu0 %v1412_v50  ;;  %6842 = vmatprep.subr.bf16.mxu1 %v7547_v55  ;;  %v1484_v50 = vld [vmem:[#allocation2 + $0x280] sm:$0xff]  ;;  %v1409_v53 = vld [vmem:[#allocation2 + $0x28] sm:$0xff] }
 0x1bc   :  { %2086 = vmatprep.mubr.bf16.mxu0 %v1419_v52  ;;  %v1488_v52 = vld [vmem:[#allocation2 + $0x2a0] sm:$0xff] }
 0x1bd   :  { %v1408_v55 = vld [vmem:[#allocation2 + $0x20] sm:$0xff] }
 0x1be   :  { %6843 = vmatpush3.bf16.msra.mxu1 %v7548_v56  ;;  %v1415_v56 = vld [vmem:[#allocation2 + $0x58] sm:$0xff] }
 0x1bf   :  { %6844 = vmatprep.subr.bf16.mxu1 %v7549_v60  ;;  %v1420_v60 = vld [vmem:[#allocation2 + $0x80] sm:$0xff] }
 0x1c1   :  { %1934 = vmatmul.mubr.bf16.gmra.mrb[12].mxu1 %v1416_v54  ;;  %v1490_v54 = vld [vmem:[#allocation2 + $0x2b0] sm:$0xff] }
 0x1c2   :  { %1941 = vmatprep.mubr.bf16.mxu1 %v1423_v57  ;;  %6845 = vmatpush3.bf16.msra.mxu1 %v7550_v61  ;;  %v7894_v57 = vmov 0.0   ;;  %v1427_v61 = vld [vmem:[#allocation2 + $0xb8] sm:$0xff] }
 0x1c3   :  { %2087 = vmatmul.mubr.bf16.gmra.mrb[16].mxu0 %v1418_v58  ;;  %6846 = vmatprep.subr.bf16.mxu1 %v7551_v0  ;;  %v1414_v58 = vld [vmem:[#allocation2 + $0x50] sm:$0xff]  ;;  %v1432_v0 = vld [vmem:[#allocation2 + $0xe0] sm:$0xff] }
 0x1c4   :  { %2094 = vmatprep.mubr.bf16.mxu0 %v1425_v59  ;;  %v1421_v59 = vld [vmem:[#allocation2 + $0x88] sm:$0xff] }
 0x1c6   :  { %6847 = vmatpush3.bf16.msra.mxu1 %v7552_v1  ;;  %v1439_v1 = vld [vmem:[#allocation2 + $0x118] sm:$0xff] }
 0x1c7   :  { %6848 = vmatprep.subr.bf16.mxu1 %v7553_v4  ;;  %v1444_v4 = vld [vmem:[#allocation2 + $0x140] sm:$0xff] }
 0x1c9   :  { %1942 = vmatmul.mubr.bf16.gmra.mrb[16].mxu1 %v1422_v62  ;;  %v1426_v62 = vld [vmem:[#allocation2 + $0xb0] sm:$0xff] }
 0x1ca   :  { %1949 = vmatprep.mubr.bf16.mxu1 %v1429_v63  ;;  %6849 = vmatpush3.bf16.msra.mxu1 %v7554_v5  ;;  %v1433_v63 = vld [vmem:[#allocation2 + $0xe8] sm:$0xff]  ;;  %v1451_v5 = vld [vmem:[#allocation2 + $0x178] sm:$0xff] }
 0x1cb   :  { %2095 = vmatmul.mubr.bf16.gmra.mrb[20].mxu0 %v1424_v2  ;;  %6850 = vmatprep.subr.bf16.mxu1 %v7555_v8  ;;  %v1438_v2 = vld [vmem:[#allocation2 + $0x110] sm:$0xff]  ;;  %v1456_v8 = vld [vmem:[#allocation2 + $0x1a0] sm:$0xff] }
 0x1cc   :  { %2102 = vmatprep.mubr.bf16.mxu0 %v1431_v3  ;;  %v1445_v3 = vld [vmem:[#allocation2 + $0x148] sm:$0xff] }
 0x1ce   :  { %6851 = vmatpush3.bf16.msra.mxu1 %v7556_v10  ;;  %v1462_v10 = vld [vmem:[#allocation2 + $0x1d0] sm:$0xff] }
 0x1cf   :  { %7398 = vmatprep.subr.bf16.mxu1 %v7892_v46 }
 0x1d1   :  { %1950 = vmatmul.mubr.bf16.gmra.mrb[20].mxu1 %v1428_v6  ;;  %v1450_v6 = vld [vmem:[#allocation2 + $0x170] sm:$0xff] }
 0x1d2   :  { %1957 = vmatprep.mubr.bf16.mxu1 %v1435_v7  ;;  %v1457_v7 = vld [vmem:[#allocation2 + $0x1a8] sm:$0xff] }
 0x1d3   :  { %2103 = vmatmul.mubr.bf16.gmra.mrb[24].mxu0 %v1430_v9  ;;  %v1463_v9 = vld [vmem:[#allocation2 + $0x1d8] sm:$0xff] }
 0x1d4   :  { %2110 = vmatprep.mubr.bf16.mxu0 %v1437_v11  ;;  %v1469_v11 = vld [vmem:[#allocation2 + $0x208] sm:$0xff] }
 0x1d9   :  { %1958 = vmatmul.mubr.bf16.gmra.mrb[24].mxu1 %v1434_v15  ;;  %v1474_v15 = vld [vmem:[#allocation2 + $0x230] sm:$0xff] }
 0x1da   :  { %1965 = vmatprep.mubr.bf16.mxu1 %v1441_v16  ;;  %v1481_v16 = vld [vmem:[#allocation2 + $0x268] sm:$0xff] }
 0x1db   :  { %2111 = vmatmul.mubr.bf16.gmra.mrb[28].mxu0 %v1436_v17 }
 0x1dc   :  { %2118 = vmatprep.mubr.bf16.mxu0 %v1443_v18  ;;  %v8782_v18 = vld [vmem:[%s9306_s6] ss:$0 sm:$0xff] }
 0x1e1   :  { %1966 = vmatmul.mubr.bf16.gmra.mrb[28].mxu1 %v1440_v19 }
 0x1e2   :  { %1973 = vmatprep.mubr.bf16.mxu1 %v1447_v20 }
 0x1e3   :  { %2119 = vmatmul.mubr.bf16.gmra.mrb[32].mxu0 %v1442_v21 }
 0x1e4   :  { %2126 = vmatprep.mubr.bf16.mxu0 %v1449_v22  ;;  %v1480_v22 = vld [vmem:[#allocation2 + $0x260] sm:$0xff] }
 0x1e9   :  { %1974 = vmatmul.mubr.bf16.gmra.mrb[32].mxu1 %v1446_v23 }
 0x1ea   :  { %1981 = vmatprep.mubr.bf16.mxu1 %v1453_v24 }
 0x1eb   :  { %2127 = vmatmul.mubr.bf16.gmra.mrb[36].mxu0 %v1448_v25  ;;  %v1487_v25 = vld [vmem:[#allocation2 + $0x298] sm:$0xff] }
 0x1ec   :  { %2134 = vmatprep.mubr.bf16.mxu0 %v1455_v26 }
 0x1f1   :  { %1982 = vmatmul.mubr.bf16.gmra.mrb[36].mxu1 %v1452_v27 }
 0x1f2   :  { %1989 = vmatprep.mubr.bf16.mxu1 %v1459_v28 }
 0x1f3   :  { %2135 = vmatmul.mubr.bf16.gmra.mrb[40].mxu0 %v1454_v29 }
 0x1f4   :  { %2142 = vmatprep.mubr.bf16.mxu0 %v1461_v30 }
 0x1f9   :  { %1990 = vmatmul.mubr.bf16.gmra.mrb[40].mxu1 %v1458_v31 }
 0x1fa   :  { %1997 = vmatprep.mubr.bf16.mxu1 %v1465_v32 }
 0x1fb   :  { %2143 = vmatmul.mubr.bf16.gmra.mrb[44].mxu0 %v1460_v33 }
 0x1fc   :  { %2150 = vmatprep.mubr.bf16.mxu0 %v1467_v34 }
 0x201   :  { %1998 = vmatmul.mubr.bf16.gmra.mrb[44].mxu1 %v1464_v35 }
 0x202   :  { %2005 = vmatprep.mubr.bf16.mxu1 %v1471_v36 }
 0x203   :  { %2151 = vmatmul.mubr.bf16.gmra.mrb[48].mxu0 %v1466_v37 }
 0x204   :  { %2158 = vmatprep.mubr.bf16.mxu0 %v1473_v38 }
 0x209   :  { %2006 = vmatmul.mubr.bf16.gmra.mrb[48].mxu1 %v1470_v39 }
 0x20a   :  { %2013 = vmatprep.mubr.bf16.mxu1 %v1477_v40  ;;  %v1486_v40 = vld [vmem:[#allocation2 + $0x290] sm:$0xff] }
 0x20b   :  { %2159 = vmatmul.mubr.bf16.gmra.mrb[52].mxu0 %v1472_v41 }
 0x20c   :  { %2166 = vmatprep.mubr.bf16.mxu0 %v1479_v42 }
 0x211   :  { %2014 = vmatmul.mubr.bf16.gmra.mrb[52].mxu1 %v1476_v43  ;;  %v1493_v43 = vld [vmem:[#allocation2 + $0x2c8] sm:$0xff] }
 0x212   :  { %2021 = vmatprep.mubr.bf16.mxu1 %v1483_v44 }
 0x213   :  { %2167 = vmatmul.mubr.bf16.gmra.mrb[56].mxu0 %v1478_v45 }
 0x214   :  { %2174 = vmatprep.mubr.bf16.mxu0 %v1485_v47 }
 0x219   :  { %2022 = vmatmul.mubr.bf16.gmra.mrb[56].mxu1 %v1482_v48 }
 0x21a   :  { %2029 = vmatprep.mubr.bf16.mxu1 %v1489_v49 }
 0x21b   :  { %2175 = vmatmul.mubr.bf16.gmra.mrb[60].mxu0 %v1484_v50 }
 0x21c   :  { %2182 = vmatprep.mubr.bf16.mxu0 %v1491_v51 }
 0x221   :  { %2030 = vmatmul.mubr.bf16.gmra.mrb[60].mxu1 %v1488_v52 }
 0x222   :  { %2223 = vmatprep.mubr.bf16.mxu1 %v1409_v53 }
 0x223   :  { %2183 = vmatmul.mubr.bf16.gmra.mrb[64].mxu0 %v1490_v54 }
 0x224   :  { %7062 = vmatprep.mubr.msk.f32.mxu0 %vm7893_vm1, %v7894_v57 }
 0x229   :  { %2224 = vmatmul.mubr.bf16.vlgmr.msra.gmra.mrb[64].mxu1 %v1408_v55 }
 0x22a   :  { %2231 = vmatprep.mubr.bf16.mxu1 %v1415_v56  ;;  %7400 = vmatpush3.bf16.msra.mxu1 %v8768_v14 }
 0x22b   :  { %7404 = vmatprep.subr.bf16.mxu1 %v7892_v46  ;;  %7063 = vmatmul.mubr.f32.vlgmr.msra.gmra.mrb[68].mxu0 %v7894_v57 }
 0x22c   :  { %7069 = vmatprep.mubr.msk.f32.mxu0 %vm7893_vm1, %v7894_v57 }
 0x231   :  { %2232 = vmatmul.mubr.bf16.gmra.mrb[68].mxu1 %v1414_v58 }
 0x232   :  { %2239 = vmatprep.mubr.bf16.mxu1 %v1421_v59 }
 0x239   :  { %2240 = vmatmul.mubr.bf16.gmra.mrb[72].mxu1 %v1420_v60  ;;  %v1492_v60 = vld [vmem:[#allocation2 + $0x2c0] sm:$0xff] }
 0x23a   :  { %2247 = vmatprep.mubr.bf16.mxu1 %v1427_v61 }
 0x241   :  { %2248 = vmatmul.mubr.bf16.gmra.mrb[76].mxu1 %v1426_v62 }
 0x242   :  { %2255 = vmatprep.mubr.bf16.mxu1 %v1433_v63 }
 0x249   :  { %2256 = vmatmul.mubr.bf16.gmra.mrb[80].mxu1 %v1432_v0 }
 0x24a   :  { %2263 = vmatprep.mubr.bf16.mxu1 %v1439_v1 }
 0x251   :  { %2264 = vmatmul.mubr.bf16.gmra.mrb[84].mxu1 %v1438_v2 }
 0x252   :  { %2271 = vmatprep.mubr.bf16.mxu1 %v1445_v3 }
 0x259   :  { %2272 = vmatmul.mubr.bf16.gmra.mrb[88].mxu1 %v1444_v4 }
 0x25a   :  { %2279 = vmatprep.mubr.bf16.mxu1 %v1451_v5 }
 0x261   :  { %2280 = vmatmul.mubr.bf16.gmra.mrb[92].mxu1 %v1450_v6 }
 0x262   :  { %2287 = vmatprep.mubr.bf16.mxu1 %v1457_v7 }
 0x269   :  { %2288 = vmatmul.mubr.bf16.gmra.mrb[96].mxu1 %v1456_v8 }
 0x26a   :  { %2295 = vmatprep.mubr.bf16.mxu1 %v1463_v9  ;;  %v2375_v9 = vld [vmem:[%s9304_s4] sm:$0xff] }
 0x271   :  { %2296 = vmatmul.mubr.bf16.gmra.mrb[100].mxu1 %v1462_v10  ;;  %v2376_v10 = vld [vmem:[%s9304_s4 + $0x8] sm:$0xff]  ;;  %s7895_s4 = smov 96  }
 0x272   :  { %2303 = vmatprep.mubr.bf16.mxu1 %v1469_v11 }
 0x279   :  { %2304 = vmatmul.mubr.bf16.gmra.mrb[104].mxu1 %v1468_v12 }
 0x27a   :  { %2311 = vmatprep.mubr.bf16.mxu1 %v1475_v13  ;;  %v8810_v13 = vpack.c.bf16 %v2376_v10, %v2375_v9 }
 0x27c   :  { %7334 = vmatpush3.bf16.msra.mxu0 %v8810_v13 }
 0x27d   :  { %7335 = vmatprep.subr.bf16.mxu0 %v7892_v46 }
 0x27f   :  { %7070 = vmatmul.mubr.f32.vlgmr.msra.gmra.mrb[70].mxu0 %v7894_v57 }
 0x280   :  { %7337 = vmatpush3.bf16.msra.mxu0 %v8768_v14  ;;  %7076 = vmatprep.mubr.msk.f32.mxu0 %vm7893_vm1, %v7894_v57 }
 0x281   :  { %2312 = vmatmul.mubr.bf16.gmra.mrb[108].mxu1 %v1474_v15  ;;  %7338 = vmatprep.subr.bf16.mxu0 %v7892_v46 }
 0x282   :  { %2319 = vmatprep.mubr.bf16.mxu1 %v1481_v16 }
 0x284   :  { %v6640_v17 = vpop.f32.mrb[4].mxu1 }
 0x285   :  { %v6641_v19 = vpop.f32.mrb[5].mxu1 }
 0x286   :  { %v6642_v20 = vadd.f32 %v6641_v19, %v6640_v17  ;;  %v6643_v21 = vpop.f32.mrb[6].mxu1  ;;  %v6746_v23 = vpop.f32.mrb[8].mxu0 }
 0x287   :  { %v6644_v24 = vpop.f32.mrb[7].mxu1  ;;  %v6747_v28 = vpop.f32.mrb[9].mxu0 }
 0x288   :  { %v1920_v26 = vadd.f32 %v6642_v20, %v8782_v18  ;;  %v6645_v27 = vadd.f32 %v6644_v24, %v6643_v21  ;;  %v6748_v29 = vadd.f32 %v6747_v28, %v6746_v23  ;;  %v6749_v30 = vpop.f32.mrb[10].mxu0 }
 0x289   :  { %2320 = vmatmul.mubr.bf16.gmra.mrb[112].mxu1 %v1480_v22  ;;  %v6750_v32 = vpop.f32.mrb[11].mxu0 }
 0x28a   :  { %v1923_v31 = vadd.f32 %v6645_v27, %v8782_v18  ;;  %2327 = vmatprep.mubr.bf16.mxu1 %v1487_v25  ;;  %v8786_v33 = vadd.f32 %v6748_v29, %v1920_v26  ;;  %v6751_v34 = vadd.f32 %v6750_v32, %v6749_v30 }
 0x28c   :  { %v6646_v35 = vpop.f32.mrb[8].mxu1  ;;  %v8788_v36 = vadd.f32 %v6751_v34, %v1923_v31 }
 0x28d   :  { %v6647_v37 = vpop.f32.mrb[9].mxu1 }
 0x28e   :  { %v6648_v38 = vadd.f32 %v6647_v37, %v6646_v35  ;;  %v6649_v39 = vpop.f32.mrb[10].mxu1  ;;  %v6752_v41 = vpop.f32.mrb[12].mxu0 }
 0x28f   :  { %v6650_v42 = vpop.f32.mrb[11].mxu1  ;;  %v6753_v47 = vpop.f32.mrb[13].mxu0 }
 0x290   :  { %v1928_v44 = vadd.f32 %v6648_v38, %v8782_v18  ;;  %v6651_v45 = vadd.f32 %v6650_v42, %v6649_v39  ;;  %v6754_v48 = vadd.f32 %v6753_v47, %v6752_v41  ;;  %v6755_v49 = vpop.f32.mrb[14].mxu0 }
 0x291   :  { %2328 = vmatmul.mubr.bf16.gmra.mrb[116].mxu1 %v1486_v40  ;;  %v6756_v51 = vpop.f32.mrb[15].mxu0 }
 0x292   :  { %v1931_v50 = vadd.f32 %v6651_v45, %v8782_v18  ;;  %2335 = vmatprep.mubr.bf16.mxu1 %v1493_v43  ;;  %v8792_v52 = vadd.f32 %v6754_v48, %v1928_v44  ;;  %v6757_v53 = vadd.f32 %v6756_v51, %v6755_v49 }
 0x294   :  { %v6652_v54 = vpop.f32.mrb[12].mxu1  ;;  %v8794_v55 = vadd.f32 %v6757_v53, %v1931_v50 }
 0x295   :  { %v6653_v56 = vpop.f32.mrb[13].mxu1 }
 0x296   :  { %v6654_v58 = vadd.f32 %v6653_v56, %v6652_v54  ;;  %v6655_v59 = vpop.f32.mrb[14].mxu1  ;;  %v6758_v61 = vpop.f32.mrb[16].mxu0 }
 0x297   :  { %v6656_v62 = vpop.f32.mrb[15].mxu1  ;;  %v6759_v1 = vpop.f32.mrb[17].mxu0 }
 0x298   :  { %v1936_v63 = vadd.f32 %v6654_v58, %v8782_v18  ;;  %v6657_v0 = vadd.f32 %v6656_v62, %v6655_v59  ;;  %v6760_v2 = vadd.f32 %v6759_v1, %v6758_v61  ;;  %v6761_v3 = vpop.f32.mrb[18].mxu0 }
 0x299   :  { %2336 = vmatmul.mubr.bf16.gmra.mrb[120].mxu1 %v1492_v60  ;;  %v6762_v5 = vpop.f32.mrb[19].mxu0 }
 0x29a   :  { %v1939_v4 = vadd.f32 %v6657_v0, %v8782_v18  ;;  %7223 = vmatprep.mubr.msk.f32.mxu1 %vm7893_vm1, %v7894_v57  ;;  %v8800_v6 = vadd.f32 %v6760_v2, %v1936_v63  ;;  %v6763_v7 = vadd.f32 %v6762_v5, %v6761_v3 }
 0x29c   :  { %v6658_v8 = vpop.f32.mrb[16].mxu1  ;;  %v8808_v11 = vadd.f32 %v6763_v7, %v1939_v4 }
 0x29d   :  { %v6659_v12 = vpop.f32.mrb[17].mxu1 }
 0x29e   :  { %v6660_v15 = vadd.f32 %v6659_v12, %v6658_v8  ;;  %v6661_v16 = vpop.f32.mrb[18].mxu1  ;;  %v6764_v17 = vpop.f32.mrb[20].mxu0 }
 0x29f   :  { %v6662_v19 = vpop.f32.mrb[19].mxu1  ;;  %v6765_v22 = vpop.f32.mrb[21].mxu0 }
 0x2a0   :  { %v1944_v20 = vadd.f32 %v6660_v15, %v8782_v18  ;;  %v6663_v21 = vadd.f32 %v6662_v19, %v6661_v16  ;;  %v6766_v23 = vadd.f32 %v6765_v22, %v6764_v17  ;;  %v6767_v24 = vpop.f32.mrb[22].mxu0 }
 0x2a1   :  { %v6768_v26 = vpop.f32.mrb[23].mxu0 }
 0x2a2   :  { %v1947_v25 = vadd.f32 %v6663_v21, %v8782_v18  ;;  %v8817_v27 = vadd.f32 %v6766_v23, %v1944_v20  ;;  %v6769_v28 = vadd.f32 %v6768_v26, %v6767_v24 }
 0x2a4   :  { %v6664_v29 = vpop.f32.mrb[20].mxu1  ;;  %v8823_v30 = vadd.f32 %v6769_v28, %v1947_v25 }
 0x2a5   :  { %v6665_v31 = vpop.f32.mrb[21].mxu1 }
 0x2a6   :  { %v6666_v32 = vadd.f32 %v6665_v31, %v6664_v29  ;;  %v6667_v34 = vpop.f32.mrb[22].mxu1  ;;  %v6770_v35 = vpop.f32.mrb[24].mxu0 }
 0x2a7   :  { %v6668_v37 = vpop.f32.mrb[23].mxu1  ;;  %v6771_v40 = vpop.f32.mrb[25].mxu0 }
 0x2a8   :  { %v1952_v38 = vadd.f32 %v6666_v32, %v8782_v18  ;;  %v6669_v39 = vadd.f32 %v6668_v37, %v6667_v34  ;;  %v6772_v41 = vadd.f32 %v6771_v40, %v6770_v35  ;;  %v6773_v42 = vpop.f32.mrb[26].mxu0 }
 0x2a9   :  { %v6774_v44 = vpop.f32.mrb[27].mxu0 }
 0x2aa   :  { %v1955_v43 = vadd.f32 %v6669_v39, %v8782_v18  ;;  %v8827_v45 = vadd.f32 %v6772_v41, %v1952_v38  ;;  %v6775_v47 = vadd.f32 %v6774_v44, %v6773_v42 }
 0x2ac   :  { %v6670_v48 = vpop.f32.mrb[24].mxu1  ;;  %v8829_v49 = vadd.f32 %v6775_v47, %v1955_v43 }
 0x2ad   :  { %v6671_v50 = vpop.f32.mrb[25].mxu1 }
 0x2ae   :  { %v6672_v51 = vadd.f32 %v6671_v50, %v6670_v48  ;;  %v6673_v53 = vpop.f32.mrb[26].mxu1  ;;  %v6776_v54 = vpop.f32.mrb[28].mxu0 }
 0x2af   :  { %v6674_v56 = vpop.f32.mrb[27].mxu1  ;;  %v6777_v60 = vpop.f32.mrb[29].mxu0 }
 0x2b0   :  { %v1960_v58 = vadd.f32 %v6672_v51, %v8782_v18  ;;  %v6675_v59 = vadd.f32 %v6674_v56, %v6673_v53  ;;  %v6778_v61 = vadd.f32 %v6777_v60, %v6776_v54  ;;  %v6779_v62 = vpop.f32.mrb[30].mxu0 }
 0x2b1   :  { %v6780_v0 = vpop.f32.mrb[31].mxu0 }
 0x2b2   :  { %v1963_v63 = vadd.f32 %v6675_v59, %v8782_v18  ;;  %v8833_v1 = vadd.f32 %v6778_v61, %v1960_v58  ;;  %v6781_v2 = vadd.f32 %v6780_v0, %v6779_v62 }
 0x2b4   :  { %v6676_v3 = vpop.f32.mrb[28].mxu1  ;;  %v8835_v4 = vadd.f32 %v6781_v2, %v1963_v63 }
 0x2b5   :  { %v6677_v5 = vpop.f32.mrb[29].mxu1 }
 0x2b6   :  { %v6678_v7 = vadd.f32 %v6677_v5, %v6676_v3  ;;  %v6679_v8 = vpop.f32.mrb[30].mxu1  ;;  %v6782_v9 = vpop.f32.mrb[32].mxu0 }
 0x2b7   :  { %v6680_v10 = vpop.f32.mrb[31].mxu1  ;;  %v6783_v16 = vpop.f32.mrb[33].mxu0 }
 0x2b8   :  { %v1968_v12 = vadd.f32 %v6678_v7, %v8782_v18  ;;  %v6681_v15 = vadd.f32 %v6680_v10, %v6679_v8  ;;  %v6784_v17 = vadd.f32 %v6783_v16, %v6782_v9  ;;  %v6785_v19 = vpop.f32.mrb[34].mxu0 }
 0x2b9   :  { %v6786_v21 = vpop.f32.mrb[35].mxu0 }
 0x2ba   :  { %v1971_v20 = vadd.f32 %v6681_v15, %v8782_v18  ;;  %v8839_v22 = vadd.f32 %v6784_v17, %v1968_v12  ;;  %v6787_v23 = vadd.f32 %v6786_v21, %v6785_v19 }
 0x2bc   :  { %v6682_v24 = vpop.f32.mrb[32].mxu1  ;;  %v8841_v25 = vadd.f32 %v6787_v23, %v1971_v20 }
 0x2bd   :  { %v6683_v26 = vpop.f32.mrb[33].mxu1 }
 0x2be   :  { %v6684_v28 = vadd.f32 %v6683_v26, %v6682_v24  ;;  %v6685_v29 = vpop.f32.mrb[34].mxu1  ;;  %v6788_v31 = vpop.f32.mrb[36].mxu0 }
 0x2bf   :  { %v6686_v32 = vpop.f32.mrb[35].mxu1  ;;  %v6789_v37 = vpop.f32.mrb[37].mxu0 }
 0x2c0   :  { %v1976_v34 = vadd.f32 %v6684_v28, %v8782_v18  ;;  %v6687_v35 = vadd.f32 %v6686_v32, %v6685_v29  ;;  %v6790_v38 = vadd.f32 %v6789_v37, %v6788_v31  ;;  %v6791_v39 = vpop.f32.mrb[38].mxu0 }
 0x2c1   :  { %v6792_v41 = vpop.f32.mrb[39].mxu0 }
 0x2c2   :  { %v1979_v40 = vadd.f32 %v6687_v35, %v8782_v18  ;;  %v8845_v42 = vadd.f32 %v6790_v38, %v1976_v34  ;;  %v6793_v43 = vadd.f32 %v6792_v41, %v6791_v39 }
 0x2c4   :  { %v6688_v44 = vpop.f32.mrb[36].mxu1  ;;  %v8847_v47 = vadd.f32 %v6793_v43, %v1979_v40 }
 0x2c5   :  { %v6689_v48 = vpop.f32.mrb[37].mxu1 }
 0x2c6   :  { %v6690_v50 = vadd.f32 %v6689_v48, %v6688_v44  ;;  %v6691_v51 = vpop.f32.mrb[38].mxu1  ;;  %v6794_v53 = vpop.f32.mrb[40].mxu0 }
 0x2c7   :  { %v6692_v54 = vpop.f32.mrb[39].mxu1  ;;  %v6795_v59 = vpop.f32.mrb[41].mxu0 }
 0x2c8   :  { %v1984_v56 = vadd.f32 %v6690_v50, %v8782_v18  ;;  %v6693_v58 = vadd.f32 %v6692_v54, %v6691_v51  ;;  %v6796_v60 = vadd.f32 %v6795_v59, %v6794_v53  ;;  %v6797_v61 = vpop.f32.mrb[42].mxu0 }
 0x2c9   :  { %v6798_v63 = vpop.f32.mrb[43].mxu0 }
 0x2ca   :  { %v1987_v62 = vadd.f32 %v6693_v58, %v8782_v18  ;;  %v8851_v0 = vadd.f32 %v6796_v60, %v1984_v56  ;;  %v6799_v2 = vadd.f32 %v6798_v63, %v6797_v61 }
 0x2cc   :  { %v6694_v3 = vpop.f32.mrb[40].mxu1  ;;  %v8853_v5 = vadd.f32 %v6799_v2, %v1987_v62 }
 0x2cd   :  { %v6695_v7 = vpop.f32.mrb[41].mxu1 }
 0x2ce   :  { %v6696_v8 = vadd.f32 %v6695_v7, %v6694_v3  ;;  %v6697_v9 = vpop.f32.mrb[42].mxu1  ;;  %v6800_v10 = vpop.f32.mrb[44].mxu0 }
 0x2cf   :  { %v6698_v12 = vpop.f32.mrb[43].mxu1  ;;  %v6801_v17 = vpop.f32.mrb[45].mxu0 }
 0x2d0   :  { %v1992_v15 = vadd.f32 %v6696_v8, %v8782_v18  ;;  %v6699_v16 = vadd.f32 %v6698_v12, %v6697_v9  ;;  %v6802_v19 = vadd.f32 %v6801_v17, %v6800_v10  ;;  %v6803_v20 = vpop.f32.mrb[46].mxu0 }
 0x2d1   :  { %v6804_v23 = vpop.f32.mrb[47].mxu0 }
 0x2d2   :  { %v1995_v21 = vadd.f32 %v6699_v16, %v8782_v18  ;;  %v8857_v24 = vadd.f32 %v6802_v19, %v1992_v15  ;;  %v6805_v26 = vadd.f32 %v6804_v23, %v6803_v20 }
 0x2d4   :  { %v6700_v28 = vpop.f32.mrb[44].mxu1  ;;  %v8859_v29 = vadd.f32 %v6805_v26, %v1995_v21 }
 0x2d5   :  { %v6701_v31 = vpop.f32.mrb[45].mxu1 }
 0x2d6   :  { %v6702_v32 = vadd.f32 %v6701_v31, %v6700_v28  ;;  %v6703_v34 = vpop.f32.mrb[46].mxu1  ;;  %v6806_v35 = vpop.f32.mrb[48].mxu0 }
 0x2d7   :  { %v6704_v37 = vpop.f32.mrb[47].mxu1  ;;  %v6807_v40 = vpop.f32.mrb[49].mxu0 }
 0x2d8   :  { %v2000_v38 = vadd.f32 %v6702_v32, %v8782_v18  ;;  %v6705_v39 = vadd.f32 %v6704_v37, %v6703_v34  ;;  %v6808_v41 = vadd.f32 %v6807_v40, %v6806_v35  ;;  %v6809_v43 = vpop.f32.mrb[50].mxu0 }
 0x2d9   :  { %v6810_v48 = vpop.f32.mrb[51].mxu0 }
 0x2da   :  { %v2003_v44 = vadd.f32 %v6705_v39, %v8782_v18  ;;  %v8863_v50 = vadd.f32 %v6808_v41, %v2000_v38  ;;  %v6811_v51 = vadd.f32 %v6810_v48, %v6809_v43 }
 0x2dc   :  { %v6706_v53 = vpop.f32.mrb[48].mxu1  ;;  %v8865_v54 = vadd.f32 %v6811_v51, %v2003_v44 }
 0x2dd   :  { %v6707_v56 = vpop.f32.mrb[49].mxu1 }
 0x2de   :  { %v6708_v58 = vadd.f32 %v6707_v56, %v6706_v53  ;;  %v6709_v59 = vpop.f32.mrb[50].mxu1  ;;  %v6812_v60 = vpop.f32.mrb[52].mxu0 }
 0x2df   :  { %v6710_v61 = vpop.f32.mrb[51].mxu1  ;;  %v6813_v2 = vpop.f32.mrb[53].mxu0 }
 0x2e0   :  { %v2008_v62 = vadd.f32 %v6708_v58, %v8782_v18  ;;  %v6711_v63 = vadd.f32 %v6710_v61, %v6709_v59  ;;  %v6814_v3 = vadd.f32 %v6813_v2, %v6812_v60  ;;  %v6815_v7 = vpop.f32.mrb[54].mxu0 }
 0x2e1   :  { %v6816_v9 = vpop.f32.mrb[55].mxu0 }
 0x2e2   :  { %v2011_v8 = vadd.f32 %v6711_v63, %v8782_v18  ;;  %v8869_v10 = vadd.f32 %v6814_v3, %v2008_v62  ;;  %v6817_v12 = vadd.f32 %v6816_v9, %v6815_v7 }
 0x2e4   :  { %v6712_v15 = vpop.f32.mrb[52].mxu1  ;;  %v8871_v16 = vadd.f32 %v6817_v12, %v2011_v8 }
 0x2e5   :  { %v6713_v17 = vpop.f32.mrb[53].mxu1 }
 0x2e6   :  { %v6714_v19 = vadd.f32 %v6713_v17, %v6712_v15  ;;  %v6715_v20 = vpop.f32.mrb[54].mxu1  ;;  %v6818_v21 = vpop.f32.mrb[56].mxu0 }
 0x2e7   :  { %v6716_v23 = vpop.f32.mrb[55].mxu1  ;;  %v6819_v31 = vpop.f32.mrb[57].mxu0 }
 0x2e8   :  { %v2016_v26 = vadd.f32 %v6714_v19, %v8782_v18  ;;  %v6717_v28 = vadd.f32 %v6716_v23, %v6715_v20  ;;  %v6820_v32 = vadd.f32 %v6819_v31, %v6818_v21  ;;  %v6821_v34 = vpop.f32.mrb[58].mxu0 }
 0x2e9   :  { %v6822_v37 = vpop.f32.mrb[59].mxu0 }
 0x2ea   :  { %v2019_v35 = vadd.f32 %v6717_v28, %v8782_v18  ;;  %v8875_v38 = vadd.f32 %v6820_v32, %v2016_v26  ;;  %v6823_v39 = vadd.f32 %v6822_v37, %v6821_v34 }
 0x2ec   :  { %v6718_v40 = vpop.f32.mrb[56].mxu1  ;;  %v8877_v41 = vadd.f32 %v6823_v39, %v2019_v35 }
 0x2ed   :  { %v6719_v43 = vpop.f32.mrb[57].mxu1 }
 0x2ee   :  { %v6720_v44 = vadd.f32 %v6719_v43, %v6718_v40  ;;  %v6721_v48 = vpop.f32.mrb[58].mxu1  ;;  %v6824_v51 = vpop.f32.mrb[60].mxu0 }
 0x2ef   :  { %v6722_v53 = vpop.f32.mrb[59].mxu1  ;;  %v6825_v59 = vpop.f32.mrb[61].mxu0 }
 0x2f0   :  { %v2024_v56 = vadd.f32 %v6720_v44, %v8782_v18  ;;  %v6723_v58 = vadd.f32 %v6722_v53, %v6721_v48  ;;  %v6826_v60 = vadd.f32 %v6825_v59, %v6824_v51  ;;  %v6827_v61 = vpop.f32.mrb[62].mxu0 }
 0x2f1   :  { %v6828_v63 = vpop.f32.mrb[63].mxu0 }
 0x2f2   :  { %v2027_v62 = vadd.f32 %v6723_v58, %v8782_v18  ;;  %v8881_v2 = vadd.f32 %v6826_v60, %v2024_v56  ;;  %v6829_v3 = vadd.f32 %v6828_v63, %v6827_v61 }
 0x2f4   :  { %v6724_v7 = vpop.f32.mrb[60].mxu1  ;;  %v8883_v8 = vadd.f32 %v6829_v3, %v2027_v62 }
 0x2f5   :  { %v6725_v9 = vpop.f32.mrb[61].mxu1 }
 0x2f6   :  { %v6726_v12 = vadd.f32 %v6725_v9, %v6724_v7  ;;  %v6727_v15 = vpop.f32.mrb[62].mxu1  ;;  %v6830_v17 = vpop.f32.mrb[64].mxu0 }
 0x2f7   :  { %v6728_v19 = vpop.f32.mrb[63].mxu1  ;;  %v6831_v23 = vpop.f32.mrb[65].mxu0 }
 0x2f8   :  { %v2032_v20 = vadd.f32 %v6726_v12, %v8782_v18  ;;  %v6729_v21 = vadd.f32 %v6728_v19, %v6727_v15  ;;  %v6832_v26 = vadd.f32 %v6831_v23, %v6830_v17  ;;  %v6833_v28 = vpop.f32.mrb[66].mxu0 }
 0x2f9   :  { %v6834_v32 = vpop.f32.mrb[67].mxu0 }
 0x2fa   :  { %v2035_v31 = vadd.f32 %v6729_v21, %v8782_v18  ;;  %v8887_v34 = vadd.f32 %v6832_v26, %v2032_v20  ;;  %v6835_v35 = vadd.f32 %v6834_v32, %v6833_v28 }
 0x2fc   :  { %v6852_v37 = vpop.f32.mrb[64].mxu1  ;;  %v8889_v39 = vadd.f32 %v6835_v35, %v2035_v31 }
 0x2fd   :  { %v6853_v40 = vpop.f32.mrb[65].mxu1 }
 0x2fe   :  { %v6854_v43 = vadd.f32 %v6853_v40, %v6852_v37  ;;  %v6855_v44 = vpop.f32.mrb[66].mxu1  ;;  %v8891_v51 = vpop.f32.mrb[68].mxu0 }
 0x2ff   :  { %v6856_v48 = vpop.f32.mrb[67].mxu1  ;;  %v7064_v58 = vpop.f32.mrb[69].mxu0 }
 0x300   :  { %v2226_v53 = vadd.f32 %v6854_v43, %v8786_v33  ;;  %v6857_v56 = vadd.f32 %v6856_v48, %v6855_v44 }
 0x302   :  { %2345 = vst.msk [vmem:[#allocation4] sm:$0xff] %vm2344_vm2, %v2226_v53  ;;  %v2229_v18 = vadd.f32 %v6857_v56, %v8788_v36 }
 0x304   :  { %2346 = vst.msk [vmem:[#allocation4 + $0x8] sm:$0xff] %vm2344_vm2, %v2229_v18  ;;  %v6858_v59 = vpop.f32.mrb[68].mxu1 }
 0x305   :  { %v6859_v60 = vpop.f32.mrb[69].mxu1 }
 0x306   :  { %v6860_v61 = vadd.f32 %v6859_v60, %v6858_v59  ;;  %v6861_v62 = vpop.f32.mrb[70].mxu1 }
 0x307   :  { %v6862_v63 = vpop.f32.mrb[71].mxu1 }
 0x308   :  { %v2234_v3 = vadd.f32 %v6860_v61, %v8792_v52  ;;  %v6863_v7 = vadd.f32 %v6862_v63, %v6861_v62 }
 0x30a   :  { %2347 = vst.msk [vmem:[#allocation4 + $0x10] sm:$0xff] %vm2344_vm2, %v2234_v3  ;;  %v2237_v33 = vadd.f32 %v6863_v7, %v8794_v55 }
 0x30c   :  { %2348 = vst.msk [vmem:[#allocation4 + $0x18] sm:$0xff] %vm2344_vm2, %v2237_v33  ;;  %v6864_v9 = vpop.f32.mrb[72].mxu1 }
 0x30d   :  { %v6865_v12 = vpop.f32.mrb[73].mxu1 }
 0x30e   :  { %v6866_v15 = vadd.f32 %v6865_v12, %v6864_v9  ;;  %v6867_v36 = vpop.f32.mrb[74].mxu1 }
 0x30f   :  { %v6868_v17 = vpop.f32.mrb[75].mxu1 }
 0x310   :  { %v2242_v19 = vadd.f32 %v6866_v15, %v8800_v6  ;;  %v6869_v20 = vadd.f32 %v6868_v17, %v6867_v36 }
 0x312   :  { %2349 = vst.msk [vmem:[#allocation4 + $0x20] sm:$0xff] %vm2344_vm2, %v2242_v19  ;;  %v2245_v21 = vadd.f32 %v6869_v20, %v8808_v11 }
 0x314   :  { %2350 = vst.msk [vmem:[#allocation4 + $0x28] sm:$0xff] %vm2344_vm2, %v2245_v21  ;;  %v6870_v52 = vpop.f32.mrb[76].mxu1 }
 0x315   :  { %v6871_v23 = vpop.f32.mrb[77].mxu1 }
 0x316   :  { %v6872_v26 = vadd.f32 %v6871_v23, %v6870_v52  ;;  %v6873_v55 = vpop.f32.mrb[78].mxu1 }
 0x317   :  { %v6874_v28 = vpop.f32.mrb[79].mxu1 }
 0x318   :  { %v2250_v31 = vadd.f32 %v6872_v26, %v8817_v27  ;;  %v6875_v32 = vadd.f32 %v6874_v28, %v6873_v55 }
 0x31a   :  { %2351 = vst.msk [vmem:[#allocation4 + $0x30] sm:$0xff] %vm2344_vm2, %v2250_v31  ;;  %v2253_v35 = vadd.f32 %v6875_v32, %v8823_v30 }
 0x31c   :  { %2352 = vst.msk [vmem:[#allocation4 + $0x38] sm:$0xff] %vm2344_vm2, %v2253_v35  ;;  %v6876_v6 = vpop.f32.mrb[80].mxu1 }
 0x31d   :  { %v6877_v37 = vpop.f32.mrb[81].mxu1 }
 0x31e   :  { %v6878_v40 = vadd.f32 %v6877_v37, %v6876_v6  ;;  %v6879_v11 = vpop.f32.mrb[82].mxu1 }
 0x31f   :  { %v6880_v43 = vpop.f32.mrb[83].mxu1 }
 0x320   :  { %v2258_v44 = vadd.f32 %v6878_v40, %v8827_v45  ;;  %v6881_v48 = vadd.f32 %v6880_v43, %v6879_v11 }
 0x322   :  { %2353 = vst.msk [vmem:[#allocation4 + $0x40] sm:$0xff] %vm2344_vm2, %v2258_v44  ;;  %v2261_v53 = vadd.f32 %v6881_v48, %v8829_v49 }
 0x324   :  { %2354 = vst.msk [vmem:[#allocation4 + $0x48] sm:$0xff] %vm2344_vm2, %v2261_v53  ;;  %v6882_v27 = vpop.f32.mrb[84].mxu1 }
 0x325   :  { %v6883_v56 = vpop.f32.mrb[85].mxu1 }
 0x326   :  { %v6884_v58 = vadd.f32 %v6883_v56, %v6882_v27  ;;  %v6885_v30 = vpop.f32.mrb[86].mxu1 }
 0x327   :  { %v6886_v18 = vpop.f32.mrb[87].mxu1 }
 0x328   :  { %v2266_v59 = vadd.f32 %v6884_v58, %v8833_v1  ;;  %v6887_v60 = vadd.f32 %v6886_v18, %v6885_v30 }
 0x32a   :  { %2355 = vst.msk [vmem:[#allocation4 + $0x50] sm:$0xff] %vm2344_vm2, %v2266_v59  ;;  %v2269_v61 = vadd.f32 %v6887_v60, %v8835_v4 }
 0x32c   :  { %2356 = vst.msk [vmem:[#allocation4 + $0x58] sm:$0xff] %vm2344_vm2, %v2269_v61  ;;  %v6888_v45 = vpop.f32.mrb[88].mxu1 }
 0x32d   :  { %v6889_v62 = vpop.f32.mrb[89].mxu1 }
 0x32e   :  { %v6890_v63 = vadd.f32 %v6889_v62, %v6888_v45  ;;  %v6891_v49 = vpop.f32.mrb[90].mxu1 }
 0x32f   :  { %v6892_v3 = vpop.f32.mrb[91].mxu1 }
 0x330   :  { %v2274_v7 = vadd.f32 %v6890_v63, %v8839_v22  ;;  %v6893_v33 = vadd.f32 %v6892_v3, %v6891_v49 }
 0x332   :  { %2357 = vst.msk [vmem:[#allocation4 + $0x60] sm:$0xff] %vm2344_vm2, %v2274_v7  ;;  %v2277_v9 = vadd.f32 %v6893_v33, %v8841_v25 }
 0x334   :  { %2358 = vst.msk [vmem:[#allocation4 + $0x68] sm:$0xff] %vm2344_vm2, %v2277_v9  ;;  %v6894_v1 = vpop.f32.mrb[92].mxu1 }
 0x335   :  { %v6895_v12 = vpop.f32.mrb[93].mxu1 }
 0x336   :  { %v6896_v15 = vadd.f32 %v6895_v12, %v6894_v1  ;;  %v6897_v4 = vpop.f32.mrb[94].mxu1 }
 0x337   :  { %v6898_v36 = vpop.f32.mrb[95].mxu1 }
 0x338   :  { %v2282_v17 = vadd.f32 %v6896_v15, %v8845_v42  ;;  %v6899_v19 = vadd.f32 %v6898_v36, %v6897_v4 }
 0x33a   :  { %2359 = vst.msk [vmem:[#allocation4 + $0x70] sm:$0xff] %vm2344_vm2, %v2282_v17  ;;  %v2285_v20 = vadd.f32 %v6899_v19, %v8847_v47 }
 0x33c   :  { %2360 = vst.msk [vmem:[#allocation4 + $0x78] sm:$0xff] %vm2344_vm2, %v2285_v20  ;;  %v6900_v22 = vpop.f32.mrb[96].mxu1 }
 0x33d   :  { %v6901_v21 = vpop.f32.mrb[97].mxu1 }
 0x33e   :  { %v6902_v52 = vadd.f32 %v6901_v21, %v6900_v22  ;;  %v6903_v25 = vpop.f32.mrb[98].mxu1 }
 0x33f   :  { %v6904_v23 = vpop.f32.mrb[99].mxu1 }
 0x340   :  { %v2290_v26 = vadd.f32 %v6902_v52, %v8851_v0  ;;  %v6905_v55 = vadd.f32 %v6904_v23, %v6903_v25 }
 0x342   :  { %2361 = vst.msk [vmem:[#allocation4 + $0x80] sm:$0xff] %vm2344_vm2, %v2290_v26  ;;  %v2293_v28 = vadd.f32 %v6905_v55, %v8853_v5  ;;  %v2481_v55 = vld [vmem:[#allocation3 + $0xe] sm:$0x3] }
 0x344   :  { %2362 = vst.msk [vmem:[#allocation4 + $0x88] sm:$0xff] %vm2344_vm2, %v2293_v28  ;;  %v6906_v42 = vpop.f32.mrb[100].mxu1 }
 0x345   :  { %v6907_v31 = vpop.f32.mrb[101].mxu1 }
 0x346   :  { %v6908_v32 = vadd.f32 %v6907_v31, %v6906_v42  ;;  %v6909_v47 = vpop.f32.mrb[102].mxu1 }
 0x347   :  { %v6910_v35 = vpop.f32.mrb[103].mxu1 }
 0x348   :  { %v2298_v6 = vadd.f32 %v6908_v32, %v8857_v24  ;;  %v6911_v37 = vadd.f32 %v6910_v35, %v6909_v47 }
 0x34a   :  { %2363 = vst.msk [vmem:[#allocation4 + $0x90] sm:$0xff] %vm2344_vm2, %v2298_v6  ;;  %v2301_v40 = vadd.f32 %v6911_v37, %v8859_v29 }
 0x34c   :  { %2364 = vst.msk [vmem:[#allocation4 + $0x98] sm:$0xff] %vm2344_vm2, %v2301_v40  ;;  %v6912_v0 = vpop.f32.mrb[104].mxu1 }
 0x34d   :  { %v6913_v11 = vpop.f32.mrb[105].mxu1 }
 0x34e   :  { %v6914_v43 = vadd.f32 %v6913_v11, %v6912_v0  ;;  %v6915_v5 = vpop.f32.mrb[106].mxu1 }
 0x34f   :  { %v6916_v44 = vpop.f32.mrb[107].mxu1 }
 0x350   :  { %v2306_v48 = vadd.f32 %v6914_v43, %v8863_v50  ;;  %v6917_v53 = vadd.f32 %v6916_v44, %v6915_v5 }
 0x352   :  { %2365 = vst.msk [vmem:[#allocation4 + $0xa0] sm:$0xff] %vm2344_vm2, %v2306_v48  ;;  %v2309_v27 = vadd.f32 %v6917_v53, %v8865_v54 }
 0x354   :  { %2366 = vst.msk [vmem:[#allocation4 + $0xa8] sm:$0xff] %vm2344_vm2, %v2309_v27  ;;  %v6918_v24 = vpop.f32.mrb[108].mxu1 }
 0x355   :  { %v6919_v56 = vpop.f32.mrb[109].mxu1 }
 0x356   :  { %v6920_v58 = vadd.f32 %v6919_v56, %v6918_v24  ;;  %v6921_v29 = vpop.f32.mrb[110].mxu1 }
 0x357   :  { %v6922_v30 = vpop.f32.mrb[111].mxu1 }
 0x358   :  { %v2314_v18 = vadd.f32 %v6920_v58, %v8869_v10  ;;  %v6923_v59 = vadd.f32 %v6922_v30, %v6921_v29 }
 0x35a   :  { %2367 = vst.msk [vmem:[#allocation4 + $0xb0] sm:$0xff] %vm2344_vm2, %v2314_v18  ;;  %v2317_v60 = vadd.f32 %v6923_v59, %v8871_v16 }
 0x35c   :  { %2368 = vst.msk [vmem:[#allocation4 + $0xb8] sm:$0xff] %vm2344_vm2, %v2317_v60  ;;  %v6924_v50 = vpop.f32.mrb[112].mxu1 }
 0x35d   :  { %v6925_v61 = vpop.f32.mrb[113].mxu1 }
 0x35e   :  { %v6926_v45 = vadd.f32 %v6925_v61, %v6924_v50  ;;  %v6927_v54 = vpop.f32.mrb[114].mxu1 }
 0x35f   :  { %v6928_v62 = vpop.f32.mrb[115].mxu1 }
 0x360   :  { %v2322_v63 = vadd.f32 %v6926_v45, %v8875_v38  ;;  %v6929_v49 = vadd.f32 %v6928_v62, %v6927_v54 }
 0x362   :  { %2369 = vst.msk [vmem:[#allocation4 + $0xc0] sm:$0xff] %vm2344_vm2, %v2322_v63  ;;  %v2325_v3 = vadd.f32 %v6929_v49, %v8877_v41  ;;  %v2680_v49 = vld [vmem:[#allocation3 + $0xc] sm:$0x3] }
 0x364   :  { %2370 = vst.msk [vmem:[#allocation4 + $0xc8] sm:$0xff] %vm2344_vm2, %v2325_v3  ;;  %v6930_v10 = vpop.f32.mrb[116].mxu1 }
 0x365   :  { %v6931_v7 = vpop.f32.mrb[117].mxu1 }
 0x366   :  { %v6932_v33 = vadd.f32 %v6931_v7, %v6930_v10  ;;  %v6933_v16 = vpop.f32.mrb[118].mxu1 }
 0x367   :  { %v6934_v9 = vpop.f32.mrb[119].mxu1 }
 0x368   :  { %v2330_v1 = vadd.f32 %v6932_v33, %v8881_v2  ;;  %v6935_v12 = vadd.f32 %v6934_v9, %v6933_v16  ;;  %v2548_v2 = vpop.f32.mrb[70].mxu0 }
 0x369   :  { %v7071_v21 = vpop.f32.mrb[71].mxu0  ;;  %v2552_v28 = vadd.f32 %v2548_v2, %v2481_v55 }
 0x36a   :  { %2371 = vst.msk [vmem:[#allocation4 + $0xd0] sm:$0xff] %vm2344_vm2, %v2330_v1  ;;  %v2333_v15 = vadd.f32 %v6935_v12, %v8883_v8 }
 0x36b   :  { %v6482_v32 = vmul.f32 -1.442695, %v2552_v28 }
 0x36c   :  { %2372 = vst.msk [vmem:[#allocation4 + $0xd8] sm:$0xff] %vm2344_vm2, %v2333_v15  ;;  %v6936_v38 = vpop.f32.mrb[120].mxu1 }
 0x36d   :  { %v6937_v4 = vpop.f32.mrb[121].mxu1 }
 0x36e   :  { %v6938_v36 = vadd.f32 %v6937_v4, %v6936_v38  ;;  %v6939_v41 = vpop.f32.mrb[122].mxu1 }
 0x36f   :  { %v6940_v17 = vpop.f32.mrb[123].mxu1 }
 0x370   :  { %v2338_v19 = vadd.f32 %v6938_v36, %v8887_v34  ;;  %v6941_v20 = vadd.f32 %v6940_v17, %v6939_v41 }
 0x372   :  { %2373 = vst.msk [vmem:[#allocation4 + $0xe0] sm:$0xff] %vm2344_vm2, %v2338_v19  ;;  %v2341_v22 = vadd.f32 %v6941_v20, %v8889_v39 }
 0x374   :  { %2374 = vst.msk [vmem:[#allocation4 + $0xe8] sm:$0xff] %vm2344_vm2, %v2341_v22 }
 0x379   :  { %v2578_v59 = vld [vmem:[#allocation4 + $0xe0] sm:$0xff] }
 0x37b   :  { %v2380_v52 = vld [vmem:[#allocation4 + $0xe8] sm:$0xff] }
 0x37c   :  { %v2455_v8 = vadd.f32 %v8891_v51, %v2380_v52 }
 0x37e   :  { %7557 = vtanh.f32 %v2455_v8  ;;  %v6481_v23 = vmul.f32 -1.442695, %v2455_v8 }
 0x380   :  { %7559 = vpow2.f32 %v6481_v23 }
 0x388   :  { %v7558_v25 = vpop.eup %7557 }
 0x389   :  { %2465 = vrot.lane.b32.xlu0 %v7558_v25, %s7895_s4 }
 0x38a   :  { %v7560_v34 = vpop.eup %7559 }
 0x38b   :  { %v2459_v26 = vadd.f32 1.0, %v7560_v34 }
 0x38d   :  { %7561 = vrcp.f32 %v2459_v26 }
 0x38e   :  { %7563 = vtanh.f32 %v2552_v28 }
 0x38f   :  { %7565 = vpow2.f32 %v6482_v32 }
 0x397   :  { %v7562_v39 = vpop.eup %7561 }
 0x398   :  { %v7564_v51 = vpop.eup %7563  ;;  %v2463_v6 = vmul.f32 0.0, %v7562_v39 }
 0x399   :  { %v7566_v47 = vpop.eup %7565 }
 0x39a   :  { %v2556_v35 = vadd.f32 1.0, %v7566_v47 }
 0x39c   :  { %7567 = vrcp.f32 %v2556_v35 }
 0x3a6   :  { %v7568_v0 = vpop.eup %7567 }
 0x3a7   :  { %v2560_v44 = vmul.f32 0.0, %v7568_v0 }
 0x3fb   :  { %v2466_v42 = vpop.permute.xlu0 %2465 }
 0x3fc   :  { %v2468_v31 = vmul.f32 %v7562_v39, %v2466_v42 }
 0x3fe   :  { %2470 = vrot.lane.b32.xlu0 %v2468_v31, %s7896_s23 }
 0x402   :  { %2562 = vrot.lane.b32.xlu0 %v7564_v51, %s7895_s4 }
 0x470   :  { %v2471_v37 = vpop.permute.xlu0 %2470 }
 0x471   :  { %v2473_v40 = vadd.f32 %v2471_v37, %v2463_v6  ;;  %v2884_v37 = vld [vmem:[#allocation3 + $0xa] sm:$0x3] }
 0x473   :  { %7569 = vtanh.f32 %v2473_v40 }
 0x474   :  { %v2563_v11 = vpop.permute.xlu0 %2562 }
 0x475   :  { %v2565_v43 = vmul.f32 %v7568_v0, %v2563_v11 }
 0x477   :  { %2567 = vrot.lane.b32.xlu0 %v2565_v43, %s7896_s23 }
 0x47d   :  { %v7570_v5 = vpop.eup %7569 }
 0x47e   :  { %2476 = vrot.lane.b32.xlu1 %v7570_v5, %s7897_s0 }
 0x4e9   :  { %v2568_v48 = vpop.permute.xlu0 %2567 }
 0x4ea   :  { %v2570_v53 = vadd.f32 %v2568_v48, %v2560_v44 }
 0x4ec   :  { %7571 = vtanh.f32 %v2570_v53 }
 0x4f0   :  { %v2477_v27 = vpop.permute.xlu1 %2476 }
 0x4f1   :  { %v2479_v24 = vmul.f32 %v7562_v39, %v2477_v27  ;;  %v2782_v39 = vld [vmem:[#allocation4 + $0xd8] sm:$0xff] }
 0x4f3   :  { %2580 = vrot.lane.b32.xlu1 %v2479_v24, %s7898_s2 }
 0x4f6   :  { %v7572_v56 = vpop.eup %7571 }
 0x4f7   :  { %2573 = vrot.lane.b32.xlu0 %v7572_v56, %s7897_s0 }
 0x565   :  { %v2581_v58 = vpop.permute.xlu1 %2580 }
 0x566   :  { %7077 = vmatmul.mubr.msk.f32.vlgmr.msra.gmra.mrb[72].mxu0 %vm2381_vm3, %v2581_v58 }
 0x567   :  { %7340 = vmatpush3.bf16.msra.mxu0 %v8810_v13  ;;  %7083 = vmatprep.mubr.msk.f32.mxu0 %vm7893_vm1, %v7894_v57 }
 0x568   :  { %7341 = vmatprep.subr.bf16.mxu0 %v7892_v46 }
 0x569   :  { %v2574_v29 = vpop.permute.xlu0 %2573 }
 0x56a   :  { %v2576_v30 = vmul.f32 %v7568_v0, %v2574_v29 }
 0x56c   :  { %2682 = vrot.lane.b32.xlu0 %v2576_v30, %s7898_s2 }
 0x5de   :  { %v2683_v18 = vpop.permute.xlu0 %2682 }
 0x5df   :  { %7084 = vmatmul.mubr.msk.f32.vlgmr.msra.gmra.mrb[74].mxu0 %vm2381_vm3, %v2683_v18 }
 0x5e0   :  { %7343 = vmatpush3.bf16.msra.mxu0 %v8768_v14  ;;  %7090 = vmatprep.mubr.msk.f32.mxu0 %vm7893_vm1, %v7894_v57 }
 0x5e1   :  { %7344 = vmatprep.subr.bf16.mxu0 %v7892_v46 }
 0x639   :  { %v2650_v60 = vpop.f32.mrb[72].mxu0 }
 0x63a   :  { %v2654_v50 = vadd.f32 %v2650_v60, %v2578_v59  ;;  %v7078_v61 = vpop.f32.mrb[73].mxu0 }
 0x63c   :  { %7573 = vtanh.f32 %v2654_v50  ;;  %v6484_v54 = vmul.f32 -1.442695, %v2654_v50 }
 0x63e   :  { %7575 = vpow2.f32 %v6484_v54 }
 0x646   :  { %v7574_v45 = vpop.eup %7573 }
 0x647   :  { %2664 = vrot.lane.b32.xlu1 %v7574_v45, %s7895_s4 }
 0x648   :  { %v7576_v62 = vpop.eup %7575 }
 0x649   :  { %v2658_v63 = vadd.f32 1.0, %v7576_v62 }
 0x64b   :  { %7577 = vrcp.f32 %v2658_v63 }
 0x655   :  { %v7578_v33 = vpop.eup %7577 }
 0x656   :  { %v2662_v4 = vmul.f32 %v7578_v33, %v2473_v40 }
 0x6b2   :  { %v2752_v3 = vpop.f32.mrb[74].mxu0 }
 0x6b3   :  { %v2756_v10 = vadd.f32 %v2752_v3, %v2680_v49  ;;  %v7085_v7 = vpop.f32.mrb[75].mxu0 }
 0x6b5   :  { %7579 = vtanh.f32 %v2756_v10  ;;  %v6486_v12 = vmul.f32 -1.442695, %v2756_v10 }
 0x6b7   :  { %7581 = vpow2.f32 %v6486_v12 }
 0x6b9   :  { %v2665_v16 = vpop.permute.xlu1 %2664 }
 0x6ba   :  { %v2667_v9 = vmul.f32 %v7578_v33, %v2665_v16 }
 0x6bc   :  { %2669 = vrot.lane.b32.xlu1 %v2667_v9, %s7896_s23 }
 0x6bf   :  { %v7580_v1 = vpop.eup %7579 }
 0x6c0   :  { %2766 = vrot.lane.b32.xlu0 %v7580_v1, %s7895_s4 }
 0x6c1   :  { %v7582_v15 = vpop.eup %7581 }
 0x6c2   :  { %v2760_v38 = vadd.f32 1.0, %v7582_v15 }
 0x6c4   :  { %7583 = vrcp.f32 %v2760_v38 }
 0x6ce   :  { %v7584_v17 = vpop.eup %7583 }
 0x6cf   :  { %v2764_v2 = vmul.f32 %v7584_v17, %v2570_v53 }
 0x72e   :  { %v2670_v36 = vpop.permute.xlu1 %2669 }
 0x72f   :  { %v2672_v41 = vadd.f32 %v2670_v36, %v2662_v4  ;;  %v3088_v36 = vld [vmem:[#allocation3 + $0x8] sm:$0x3] }
 0x731   :  { %7585 = vtanh.f32 %v2672_v41 }
 0x732   :  { %v2767_v19 = vpop.permute.xlu0 %2766 }
 0x733   :  { %v2769_v20 = vmul.f32 %v7584_v17, %v2767_v19 }
 0x735   :  { %2771 = vrot.lane.b32.xlu0 %v2769_v20, %s7896_s23 }
 0x73b   :  { %v7586_v22 = vpop.eup %7585 }
 0x73c   :  { %2675 = vrot.lane.b32.xlu1 %v7586_v22, %s7897_s0 }
 0x7a7   :  { %v2772_v21 = vpop.permute.xlu0 %2771 }
 0x7a8   :  { %v2774_v52 = vadd.f32 %v2772_v21, %v2764_v2 }
 0x7aa   :  { %7587 = vtanh.f32 %v2774_v52 }
 0x7ae   :  { %v2676_v8 = vpop.permute.xlu1 %2675 }
 0x7af   :  { %v2678_v25 = vmul.f32 %v7578_v33, %v2676_v8  ;;  %v2986_v33 = vld [vmem:[#allocation4 + $0xd0] sm:$0xff] }
 0x7b1   :  { %2784 = vrot.lane.b32.xlu1 %v2678_v25, %s7898_s2 }
 0x7b4   :  { %v7588_v23 = vpop.eup %7587 }
 0x7b5   :  { %2777 = vrot.lane.b32.xlu0 %v7588_v23, %s7897_s0 }
 0x823   :  { %v2785_v34 = vpop.permute.xlu1 %2784 }
 0x824   :  { %7091 = vmatmul.mubr.msk.f32.vlgmr.msra.gmra.mrb[76].mxu0 %vm2381_vm3, %v2785_v34 }
 0x825   :  { %7346 = vmatpush3.bf16.msra.mxu0 %v8810_v13  ;;  %7097 = vmatprep.mubr.msk.f32.mxu0 %vm7893_vm1, %v7894_v57 }
 0x826   :  { %7347 = vmatprep.subr.bf16.mxu0 %v7892_v46 }
 0x827   :  { %v2778_v26 = vpop.permute.xlu0 %2777 }
 0x828   :  { %v2780_v55 = vmul.f32 %v7584_v17, %v2778_v26 }
 0x82a   :  { %2886 = vrot.lane.b32.xlu0 %v2780_v55, %s7898_s2 }
 0x89c   :  { %v2887_v28 = vpop.permute.xlu0 %2886 }
 0x89d   :  { %7098 = vmatmul.mubr.msk.f32.vlgmr.msra.gmra.mrb[78].mxu0 %vm2381_vm3, %v2887_v28 }
 0x89e   :  { %7349 = vmatpush3.bf16.msra.mxu0 %v8768_v14  ;;  %7104 = vmatprep.mubr.msk.f32.mxu0 %vm7893_vm1, %v7894_v57 }
 0x89f   :  { %7350 = vmatprep.subr.bf16.mxu0 %v7892_v46 }
 0x8f7   :  { %v2854_v42 = vpop.f32.mrb[76].mxu0 }
 0x8f8   :  { %v2858_v31 = vadd.f32 %v2854_v42, %v2782_v39  ;;  %v7092_v51 = vpop.f32.mrb[77].mxu0 }
 0x8fa   :  { %7589 = vtanh.f32 %v2858_v31  ;;  %v6488_v47 = vmul.f32 -1.442695, %v2858_v31 }
 0x8fc   :  { %7591 = vpow2.f32 %v6488_v47 }
 0x904   :  { %v7590_v32 = vpop.eup %7589 }
 0x905   :  { %2868 = vrot.lane.b32.xlu1 %v7590_v32, %s7895_s4 }
 0x906   :  { %v7592_v35 = vpop.eup %7591 }
 0x907   :  { %v2862_v6 = vadd.f32 1.0, %v7592_v35 }
 0x909   :  { %7593 = vrcp.f32 %v2862_v6 }
 0x913   :  { %v7594_v43 = vpop.eup %7593 }
 0x914   :  { %v2866_v56 = vmul.f32 %v7594_v43, %v2672_v41 }
 0x970   :  { %v2956_v40 = vpop.f32.mrb[78].mxu0 }
 0x971   :  { %v2960_v0 = vadd.f32 %v2956_v40, %v2884_v37  ;;  %v7099_v11 = vpop.f32.mrb[79].mxu0 }
 0x973   :  { %7595 = vtanh.f32 %v2960_v0  ;;  %v6490_v53 = vmul.f32 -1.442695, %v2960_v0 }
 0x975   :  { %7597 = vpow2.f32 %v6490_v53 }
 0x977   :  { %v2869_v5 = vpop.permute.xlu1 %2868 }
 0x978   :  { %v2871_v44 = vmul.f32 %v7594_v43, %v2869_v5 }
 0x97a   :  { %2873 = vrot.lane.b32.xlu1 %v2871_v44, %s7896_s23 }
 0x97d   :  { %v7596_v48 = vpop.eup %7595 }
 0x97e   :  { %2970 = vrot.lane.b32.xlu0 %v7596_v48, %s7895_s4 }
 0x97f   :  { %v7598_v27 = vpop.eup %7597 }
 0x980   :  { %v2964_v24 = vadd.f32 1.0, %v7598_v27 }
 0x982   :  { %7599 = vrcp.f32 %v2964_v24 }
 0x98c   :  { %v7600_v30 = vpop.eup %7599 }
 0x98d   :  { %v2968_v50 = vmul.f32 %v7600_v30, %v2774_v52 }
 0x9ec   :  { %v2874_v58 = vpop.permute.xlu1 %2873 }
 0x9ed   :  { %v2876_v29 = vadd.f32 %v2874_v58, %v2866_v56  ;;  %v3292_v58 = vld [vmem:[#allocation3 + $0x6] sm:$0x3] }
 0x9ef   :  { %7601 = vtanh.f32 %v2876_v29 }
 0x9f0   :  { %v2971_v18 = vpop.permute.xlu0 %2970 }
 0x9f1   :  { %v2973_v59 = vmul.f32 %v7600_v30, %v2971_v18 }
 0x9f3   :  { %2975 = vrot.lane.b32.xlu0 %v2973_v59, %s7896_s23 }
 0x9f9   :  { %v7602_v60 = vpop.eup %7601 }
 0x9fa   :  { %2879 = vrot.lane.b32.xlu1 %v7602_v60, %s7897_s0 }
 0xa65   :  { %v2976_v61 = vpop.permute.xlu0 %2975 }
 0xa66   :  { %v2978_v45 = vadd.f32 %v2976_v61, %v2968_v50 }
 0xa68   :  { %7603 = vtanh.f32 %v2978_v45 }
 0xa6c   :  { %v2880_v54 = vpop.permute.xlu1 %2879 }
 0xa6d   :  { %v2882_v62 = vmul.f32 %v7594_v43, %v2880_v54  ;;  %v3190_v43 = vld [vmem:[#allocation4 + $0xc8] sm:$0xff] }
 0xa6f   :  { %2988 = vrot.lane.b32.xlu1 %v2882_v62, %s7898_s2 }
 0xa72   :  { %v7604_v63 = vpop.eup %7603 }
 0xa73   :  { %2981 = vrot.lane.b32.xlu0 %v7604_v63, %s7897_s0 }
 0xae1   :  { %v2989_v49 = vpop.permute.xlu1 %2988 }
 0xae2   :  { %7105 = vmatmul.mubr.msk.f32.vlgmr.msra.gmra.mrb[80].mxu0 %vm2381_vm3, %v2989_v49 }
 0xae3   :  { %7352 = vmatpush3.bf16.msra.mxu0 %v8810_v13  ;;  %7111 = vmatprep.mubr.msk.f32.mxu0 %vm7893_vm1, %v7894_v57 }
 0xae4   :  { %7353 = vmatprep.subr.bf16.mxu0 %v7892_v46 }
 0xae5   :  { %v2982_v3 = vpop.permute.xlu0 %2981 }
 0xae6   :  { %v2984_v10 = vmul.f32 %v7600_v30, %v2982_v3 }
 0xae8   :  { %3090 = vrot.lane.b32.xlu0 %v2984_v10, %s7898_s2 }
 0xb5a   :  { %v3091_v7 = vpop.permute.xlu0 %3090 }
 0xb5b   :  { %7112 = vmatmul.mubr.msk.f32.vlgmr.msra.gmra.mrb[82].mxu0 %vm2381_vm3, %v3091_v7 }
 0xb5c   :  { %7355 = vmatpush3.bf16.msra.mxu0 %v8768_v14  ;;  %7118 = vmatprep.mubr.msk.f32.mxu0 %vm7893_vm1, %v7894_v57 }
 0xb5d   :  { %7356 = vmatprep.subr.bf16.mxu0 %v7892_v46 }
 0xbb5   :  { %v3058_v16 = vpop.f32.mrb[80].mxu0 }
 0xbb6   :  { %v3062_v9 = vadd.f32 %v3058_v16, %v2986_v33  ;;  %v7106_v1 = vpop.f32.mrb[81].mxu0 }
 0xbb8   :  { %7605 = vtanh.f32 %v3062_v9  ;;  %v6492_v15 = vmul.f32 -1.442695, %v3062_v9 }
 0xbba   :  { %7607 = vpow2.f32 %v6492_v15 }
 0xbc2   :  { %v7606_v12 = vpop.eup %7605 }
 0xbc3   :  { %3072 = vrot.lane.b32.xlu1 %v7606_v12, %s7895_s4 }
 0xbc4   :  { %v7608_v38 = vpop.eup %7607 }
 0xbc5   :  { %v3066_v4 = vadd.f32 1.0, %v7608_v38 }
 0xbc7   :  { %7609 = vrcp.f32 %v3066_v4 }
 0xbd1   :  { %v7610_v20 = vpop.eup %7609 }
 0xbd2   :  { %v3070_v23 = vmul.f32 %v7610_v20, %v2876_v29 }
 0xc2e   :  { %v3160_v41 = vpop.f32.mrb[82].mxu0 }
 0xc2f   :  { %v3164_v17 = vadd.f32 %v3160_v41, %v3088_v36  ;;  %v7113_v19 = vpop.f32.mrb[83].mxu0 }
 0xc31   :  { %7611 = vtanh.f32 %v3164_v17  ;;  %v6494_v52 = vmul.f32 -1.442695, %v3164_v17 }
 0xc33   :  { %7613 = vpow2.f32 %v6494_v52 }
 0xc35   :  { %v3073_v22 = vpop.permute.xlu1 %3072 }
 0xc36   :  { %v3075_v2 = vmul.f32 %v7610_v20, %v3073_v22 }
 0xc38   :  { %3077 = vrot.lane.b32.xlu1 %v3075_v2, %s7896_s23 }
 0xc3b   :  { %v7612_v21 = vpop.eup %7611 }
 0xc3c   :  { %3174 = vrot.lane.b32.xlu0 %v7612_v21, %s7895_s4 }
 0xc3d   :  { %v7614_v8 = vpop.eup %7613 }
 0xc3e   :  { %v3168_v25 = vadd.f32 1.0, %v7614_v8 }
 0xc40   :  { %7615 = vrcp.f32 %v3168_v25 }
 0xc4a   :  { %v7616_v55 = vpop.eup %7615 }
 0xc4b   :  { %v3172_v31 = vmul.f32 %v7616_v55, %v2978_v45 }
 0xcaa   :  { %v3078_v34 = vpop.permute.xlu1 %3077 }
 0xcab   :  { %v3080_v26 = vadd.f32 %v3078_v34, %v3070_v23  ;;  %v3496_v34 = vld [vmem:[#allocation3 + $0x4] sm:$0x3] }
 0xcad   :  { %7617 = vtanh.f32 %v3080_v26 }
 0xcae   :  { %v3175_v28 = vpop.permute.xlu0 %3174 }
 0xcaf   :  { %v3177_v39 = vmul.f32 %v7616_v55, %v3175_v28 }
 0xcb1   :  { %3179 = vrot.lane.b32.xlu0 %v3177_v39, %s7896_s23 }
 0xcb7   :  { %v7618_v42 = vpop.eup %7617 }
 0xcb8   :  { %3083 = vrot.lane.b32.xlu1 %v7618_v42, %s7897_s0 }
 0xd23   :  { %v3180_v51 = vpop.permute.xlu0 %3179 }
 0xd24   :  { %v3182_v32 = vadd.f32 %v3180_v51, %v3172_v31 }
 0xd26   :  { %7619 = vtanh.f32 %v3182_v32 }
 0xd2a   :  { %v3084_v47 = vpop.permute.xlu1 %3083 }
 0xd2b   :  { %v3086_v35 = vmul.f32 %v7610_v20, %v3084_v47  ;;  %v3394_v20 = vld [vmem:[#allocation4 + $0xc0] sm:$0xff] }
 0xd2d   :  { %3192 = vrot.lane.b32.xlu1 %v3086_v35, %s7898_s2 }
 0xd30   :  { %v7620_v6 = vpop.eup %7619 }
 0xd31   :  { %3185 = vrot.lane.b32.xlu0 %v7620_v6, %s7897_s0 }
 0xd9f   :  { %v3193_v37 = vpop.permute.xlu1 %3192 }
 0xda0   :  { %7119 = vmatmul.mubr.msk.f32.vlgmr.msra.gmra.mrb[84].mxu0 %vm2381_vm3, %v3193_v37 }
 0xda1   :  { %7358 = vmatpush3.bf16.msra.mxu0 %v8810_v13  ;;  %7125 = vmatprep.mubr.msk.f32.mxu0 %vm7893_vm1, %v7894_v57 }
 0xda2   :  { %7359 = vmatprep.subr.bf16.mxu0 %v7892_v46 }
 0xda3   :  { %v3186_v40 = vpop.permute.xlu0 %3185 }
 0xda4   :  { %v3188_v0 = vmul.f32 %v7616_v55, %v3186_v40 }
 0xda6   :  { %3294 = vrot.lane.b32.xlu0 %v3188_v0, %s7898_s2 }
 0xe18   :  { %v3295_v11 = vpop.permute.xlu0 %3294 }
 0xe19   :  { %7126 = vmatmul.mubr.msk.f32.vlgmr.msra.gmra.mrb[86].mxu0 %vm2381_vm3, %v3295_v11 }
 0xe1a   :  { %7361 = vmatpush3.bf16.msra.mxu0 %v8768_v14  ;;  %7132 = vmatprep.mubr.msk.f32.mxu0 %vm7893_vm1, %v7894_v57 }
 0xe1b   :  { %7362 = vmatprep.subr.bf16.mxu0 %v7892_v46 }
 0xe73   :  { %v3262_v5 = vpop.f32.mrb[84].mxu0 }
 0xe74   :  { %v3266_v44 = vadd.f32 %v3262_v5, %v3190_v43  ;;  %v7120_v48 = vpop.f32.mrb[85].mxu0 }
 0xe76   :  { %7621 = vtanh.f32 %v3266_v44  ;;  %v6496_v27 = vmul.f32 -1.442695, %v3266_v44 }
 0xe78   :  { %7623 = vpow2.f32 %v6496_v27 }
 0xe80   :  { %v7622_v53 = vpop.eup %7621 }
 0xe81   :  { %3276 = vrot.lane.b32.xlu1 %v7622_v53, %s7895_s4 }
 0xe82   :  { %v7624_v24 = vpop.eup %7623 }
 0xe83   :  { %v3270_v56 = vadd.f32 1.0, %v7624_v24 }
 0xe85   :  { %7625 = vrcp.f32 %v3270_v56 }
 0xe8f   :  { %v7626_v59 = vpop.eup %7625 }
 0xe90   :  { %v3274_v63 = vmul.f32 %v7626_v59, %v3080_v26 }
 0xeec   :  { %v3364_v29 = vpop.f32.mrb[86].mxu0 }
 0xeed   :  { %v3368_v30 = vadd.f32 %v3364_v29, %v3292_v58  ;;  %v7127_v18 = vpop.f32.mrb[87].mxu0 }
 0xeef   :  { %7627 = vtanh.f32 %v3368_v30  ;;  %v6498_v45 = vmul.f32 -1.442695, %v3368_v30 }
 0xef1   :  { %7629 = vpow2.f32 %v6498_v45 }
 0xef3   :  { %v3277_v60 = vpop.permute.xlu1 %3276 }
 0xef4   :  { %v3279_v50 = vmul.f32 %v7626_v59, %v3277_v60 }
 0xef6   :  { %3281 = vrot.lane.b32.xlu1 %v3279_v50, %s7896_s23 }
 0xef9   :  { %v7628_v61 = vpop.eup %7627 }
 0xefa   :  { %3378 = vrot.lane.b32.xlu0 %v7628_v61, %s7895_s4 }
 0xefb   :  { %v7630_v54 = vpop.eup %7629 }
 0xefc   :  { %v3372_v62 = vadd.f32 1.0, %v7630_v54 }
 0xefe   :  { %7631 = vrcp.f32 %v3372_v62 }
 0xf08   :  { %v7632_v10 = vpop.eup %7631 }
 0xf09   :  { %v3376_v9 = vmul.f32 %v7632_v10, %v3182_v32 }
 0xf68   :  { %v3282_v49 = vpop.permute.xlu1 %3281 }
 0xf69   :  { %v3284_v3 = vadd.f32 %v3282_v49, %v3274_v63  ;;  %v3700_v49 = vld [vmem:[#allocation3 + $0x2] sm:$0x3] }
 0xf6b   :  { %7633 = vtanh.f32 %v3284_v3 }
 0xf6c   :  { %v3379_v7 = vpop.permute.xlu0 %3378 }
 0xf6d   :  { %v3381_v33 = vmul.f32 %v7632_v10, %v3379_v7 }
 0xf6f   :  { %3383 = vrot.lane.b32.xlu0 %v3381_v33, %s7896_s23 }
 0xf75   :  { %v7634_v16 = vpop.eup %7633 }
 0xf76   :  { %3287 = vrot.lane.b32.xlu1 %v7634_v16, %s7897_s0 }
 0xfe1   :  { %v3384_v1 = vpop.permute.xlu0 %3383 }
 0xfe2   :  { %v3386_v12 = vadd.f32 %v3384_v1, %v3376_v9 }
 0xfe4   :  { %7635 = vtanh.f32 %v3386_v12 }
 0xfe8   :  { %v3288_v15 = vpop.permute.xlu1 %3287 }
 0xfe9   :  { %v3290_v38 = vmul.f32 %v7626_v59, %v3288_v15  ;;  %v3598_v59 = vld [vmem:[#allocation4 + $0xb8] sm:$0xff] }
 0xfeb   :  { %3396 = vrot.lane.b32.xlu1 %v3290_v38, %s7898_s2 }
 0xfee   :  { %v7636_v4 = vpop.eup %7635 }
 0xfef   :  { %3389 = vrot.lane.b32.xlu0 %v7636_v4, %s7897_s0 }
0x105d   :  { %v3397_v36 = vpop.permute.xlu1 %3396 }
0x105e   :  { %7133 = vmatmul.mubr.msk.f32.vlgmr.msra.gmra.mrb[88].mxu0 %vm2381_vm3, %v3397_v36 }
0x105f   :  { %7364 = vmatpush3.bf16.msra.mxu0 %v8810_v13  ;;  %7139 = vmatprep.mubr.msk.f32.mxu0 %vm7893_vm1, %v7894_v57 }
0x1060   :  { %7365 = vmatprep.subr.bf16.mxu0 %v7892_v46 }
0x1061   :  { %v3390_v41 = vpop.permute.xlu0 %3389 }
0x1062   :  { %v3392_v17 = vmul.f32 %v7632_v10, %v3390_v41 }
0x1064   :  { %3498 = vrot.lane.b32.xlu0 %v3392_v17, %s7898_s2 }
0x10d6   :  { %v3499_v19 = vpop.permute.xlu0 %3498 }
0x10d7   :  { %7140 = vmatmul.mubr.msk.f32.vlgmr.msra.gmra.mrb[90].mxu0 %vm2381_vm3, %v3499_v19 }
0x10d8   :  { %7367 = vmatpush3.bf16.msra.mxu0 %v8768_v14  ;;  %7146 = vmatprep.mubr.msk.f32.mxu0 %vm7893_vm1, %v7894_v57 }
0x10d9   :  { %7368 = vmatprep.subr.bf16.mxu0 %v7892_v46 }
0x1131   :  { %v3466_v22 = vpop.f32.mrb[88].mxu0 }
0x1132   :  { %v3470_v2 = vadd.f32 %v3466_v22, %v3394_v20  ;;  %v7134_v21 = vpop.f32.mrb[89].mxu0 }
0x1134   :  { %7637 = vtanh.f32 %v3470_v2  ;;  %v6500_v8 = vmul.f32 -1.442695, %v3470_v2 }
0x1136   :  { %7639 = vpow2.f32 %v6500_v8 }
0x113e   :  { %v7638_v52 = vpop.eup %7637 }
0x113f   :  { %3480 = vrot.lane.b32.xlu1 %v7638_v52, %s7895_s4 }
0x1140   :  { %v7640_v25 = vpop.eup %7639 }
0x1141   :  { %v3474_v23 = vadd.f32 1.0, %v7640_v25 }
0x1143   :  { %7641 = vrcp.f32 %v3474_v23 }
0x114d   :  { %v7642_v39 = vpop.eup %7641 }
0x114e   :  { %v3478_v6 = vmul.f32 %v7642_v39, %v3284_v3 }
0x11aa   :  { %v3568_v26 = vpop.f32.mrb[90].mxu0 }
0x11ab   :  { %v3572_v55 = vadd.f32 %v3568_v26, %v3496_v34  ;;  %v7141_v28 = vpop.f32.mrb[91].mxu0 }
0x11ad   :  { %7643 = vtanh.f32 %v3572_v55  ;;  %v6502_v32 = vmul.f32 -1.442695, %v3572_v55 }
0x11af   :  { %7645 = vpow2.f32 %v6502_v32 }
0x11b1   :  { %v3481_v42 = vpop.permute.xlu1 %3480 }
0x11b2   :  { %v3483_v31 = vmul.f32 %v7642_v39, %v3481_v42 }
0x11b4   :  { %3485 = vrot.lane.b32.xlu1 %v3483_v31, %s7896_s23 }
0x11b7   :  { %v7644_v51 = vpop.eup %7643 }
0x11b8   :  { %3582 = vrot.lane.b32.xlu0 %v7644_v51, %s7895_s4 }
0x11b9   :  { %v7646_v47 = vpop.eup %7645 }
0x11ba   :  { %v3576_v35 = vadd.f32 1.0, %v7646_v47 }
0x11bc   :  { %7647 = vrcp.f32 %v3576_v35 }
0x11c6   :  { %v7648_v0 = vpop.eup %7647 }
0x11c7   :  { %v3580_v44 = vmul.f32 %v7648_v0, %v3386_v12 }
0x1226   :  { %v3486_v37 = vpop.permute.xlu1 %3485 }
0x1227   :  { %v3488_v40 = vadd.f32 %v3486_v37, %v3478_v6 }
0x1229   :  { %7649 = vtanh.f32 %v3488_v40 }
0x122a   :  { %v3583_v11 = vpop.permute.xlu0 %3582 }
0x122b   :  { %v3585_v43 = vmul.f32 %v7648_v0, %v3583_v11 }
0x122d   :  { %3587 = vrot.lane.b32.xlu0 %v3585_v43, %s7896_s23 }
0x1233   :  { %v7650_v5 = vpop.eup %7649 }
0x1234   :  { %3491 = vrot.lane.b32.xlu1 %v7650_v5, %s7897_s0 }
0x129f   :  { %v3588_v48 = vpop.permute.xlu0 %3587 }
0x12a0   :  { %v3590_v53 = vadd.f32 %v3588_v48, %v3580_v44 }
0x12a2   :  { %7651 = vtanh.f32 %v3590_v53 }
0x12a6   :  { %v3492_v27 = vpop.permute.xlu1 %3491 }
0x12a7   :  { %v3494_v24 = vmul.f32 %v7642_v39, %v3492_v27 }
0x12a9   :  { %3600 = vrot.lane.b32.xlu1 %v3494_v24, %s7898_s2 }
0x12ac   :  { %v7652_v56 = vpop.eup %7651 }
0x12ad   :  { %3593 = vrot.lane.b32.xlu0 %v7652_v56, %s7897_s0  ;;  %v4005_v56 = vld [vmem:[#allocation4 + $0xa8] sm:$0xff] }
0x131b   :  { %v3601_v58 = vpop.permute.xlu1 %3600 }
0x131c   :  { %7147 = vmatmul.mubr.msk.f32.vlgmr.msra.gmra.mrb[92].mxu0 %vm2381_vm3, %v3601_v58 }
0x131d   :  { %7370 = vmatpush3.bf16.msra.mxu0 %v8810_v13  ;;  %7153 = vmatprep.mubr.msk.f32.mxu0 %vm7893_vm1, %v7894_v57 }
0x131e   :  { %7371 = vmatprep.subr.bf16.mxu0 %v7892_v46 }
0x131f   :  { %v3594_v29 = vpop.permute.xlu0 %3593 }
0x1320   :  { %v3596_v30 = vmul.f32 %v7648_v0, %v3594_v29 }
0x1322   :  { %3702 = vrot.lane.b32.xlu0 %v3596_v30, %s7898_s2 }
0x1394   :  { %v3703_v18 = vpop.permute.xlu0 %3702 }
0x1395   :  { %7154 = vmatmul.mubr.msk.f32.vlgmr.msra.gmra.mrb[94].mxu0 %vm2381_vm3, %v3703_v18 }
0x1396   :  { %7373 = vmatpush3.bf16.msra.mxu0 %v8768_v14  ;;  %7160 = vmatprep.mubr.msk.f32.mxu0 %vm7893_vm1, %v7894_v57 }
0x1397   :  { %7374 = vmatprep.subr.bf16.mxu0 %v7892_v46 }
0x13ef   :  { %v3670_v60 = vpop.f32.mrb[92].mxu0 }
0x13f0   :  { %v3674_v50 = vadd.f32 %v3670_v60, %v3598_v59  ;;  %v7148_v61 = vpop.f32.mrb[93].mxu0 }
0x13f2   :  { %7653 = vtanh.f32 %v3674_v50  ;;  %v6504_v54 = vmul.f32 -1.442695, %v3674_v50 }
0x13f4   :  { %7655 = vpow2.f32 %v6504_v54 }
0x13fc   :  { %v7654_v45 = vpop.eup %7653 }
0x13fd   :  { %3684 = vrot.lane.b32.xlu1 %v7654_v45, %s7895_s4 }
0x13fe   :  { %v7656_v62 = vpop.eup %7655 }
0x13ff   :  { %v3678_v63 = vadd.f32 1.0, %v7656_v62 }
0x1401   :  { %7657 = vrcp.f32 %v3678_v63 }
0x140b   :  { %v7658_v33 = vpop.eup %7657 }
0x140c   :  { %v3682_v4 = vmul.f32 %v7658_v33, %v3488_v40 }
0x1468   :  { %v3772_v3 = vpop.f32.mrb[94].mxu0 }
0x1469   :  { %v3776_v10 = vadd.f32 %v3772_v3, %v3700_v49  ;;  %v7155_v7 = vpop.f32.mrb[95].mxu0 }
0x146b   :  { %7659 = vtanh.f32 %v3776_v10  ;;  %v6506_v12 = vmul.f32 -1.442695, %v3776_v10 }
0x146d   :  { %7661 = vpow2.f32 %v6506_v12 }
0x146f   :  { %v3685_v16 = vpop.permute.xlu1 %3684 }
0x1470   :  { %v3687_v9 = vmul.f32 %v7658_v33, %v3685_v16  ;;  %v4107_v16 = vld [vmem:[#allocation4 + $0xa0] sm:$0xff] }
0x1472   :  { %3689 = vrot.lane.b32.xlu1 %v3687_v9, %s7896_s23 }
0x1475   :  { %v7660_v1 = vpop.eup %7659 }
0x1476   :  { %3786 = vrot.lane.b32.xlu0 %v7660_v1, %s7895_s4 }
0x1477   :  { %v7662_v15 = vpop.eup %7661 }
0x1478   :  { %v3780_v38 = vadd.f32 1.0, %v7662_v15 }
0x147a   :  { %7663 = vrcp.f32 %v3780_v38 }
0x1484   :  { %v7664_v17 = vpop.eup %7663 }
0x1485   :  { %v3784_v2 = vmul.f32 %v7664_v17, %v3590_v53 }
0x14e4   :  { %v3690_v36 = vpop.permute.xlu1 %3689 }
0x14e5   :  { %v3692_v41 = vadd.f32 %v3690_v36, %v3682_v4 }
0x14e7   :  { %7665 = vtanh.f32 %v3692_v41 }
0x14e8   :  { %v3787_v19 = vpop.permute.xlu0 %3786 }
0x14e9   :  { %v3789_v20 = vmul.f32 %v7664_v17, %v3787_v19 }
0x14eb   :  { %3791 = vrot.lane.b32.xlu0 %v3789_v20, %s7896_s23 }
0x14f1   :  { %v7666_v22 = vpop.eup %7665 }
0x14f2   :  { %3695 = vrot.lane.b32.xlu1 %v7666_v22, %s7897_s0 }
0x155d   :  { %v3792_v21 = vpop.permute.xlu0 %3791 }
0x155e   :  { %v9067_v52 = vadd.f32 %v3792_v21, %v3784_v2 }
0x1560   :  { %7667 = vtanh.f32 %v9067_v52 }
0x1564   :  { %v3696_v8 = vpop.permute.xlu1 %3695 }
0x1565   :  { %v3698_v25 = vmul.f32 %v7658_v33, %v3696_v8 }
0x1567   :  { %3804 = vrot.lane.b32.xlu1 %v3698_v25, %s7898_s2 }
0x156a   :  { %v7668_v23 = vpop.eup %7667 }
0x156b   :  { %3797 = vrot.lane.b32.xlu0 %v7668_v23, %s7897_s0 }
0x15d9   :  { %v3805_v34 = vpop.permute.xlu1 %3804 }
0x15da   :  { %7161 = vmatmul.mubr.msk.f32.vlgmr.msra.gmra.mrb[96].mxu0 %vm2381_vm3, %v3805_v34  ;;  %v4209_v34 = vld [vmem:[#allocation4 + $0x98] sm:$0xff] }
0x15db   :  { %7376 = vmatpush3.bf16.msra.mxu0 %v8810_v13  ;;  %7167 = vmatprep.mubr.msk.f32.mxu0 %vm7893_vm1, %v7894_v57  ;;  %v3802_v13 = vld [vmem:[#allocation4 + $0xb0] sm:$0xff] }
0x15dc   :  { %7377 = vmatprep.subr.bf16.mxu0 %v7892_v46 }
0x15dd   :  { %v3798_v26 = vpop.permute.xlu0 %3797 }
0x15de   :  { %v3800_v55 = vmul.f32 %v7664_v17, %v3798_v26 }
0x15e0   :  { %3905 = vrot.lane.b32.xlu0 %v3800_v55, %s7898_s2 }
0x1652   :  { %v3906_v28 = vpop.permute.xlu0 %3905 }
0x1653   :  { %7168 = vmatmul.mubr.msk.f32.vlgmr.msra.gmra.mrb[98].mxu0 %vm2381_vm3, %v3906_v28 }
0x1654   :  { %7379 = vmatpush3.bf16.msra.mxu0 %v8768_v14  ;;  %7174 = vmatprep.mubr.msk.f32.mxu0 %vm7893_vm1, %v7894_v57 }
0x1655   :  { %7380 = vmatprep.subr.bf16.mxu0 %v7892_v46 }
0x16ad   :  { %v3874_v39 = vpop.f32.mrb[96].mxu0 }
0x16ae   :  { %v3878_v42 = vadd.f32 %v3874_v39, %v3802_v13  ;;  %v7162_v31 = vpop.f32.mrb[97].mxu0 }
0x16b0   :  { %7669 = vtanh.f32 %v3878_v42  ;;  %v6508_v32 = vmul.f32 -1.442695, %v3878_v42 }
0x16b2   :  { %7671 = vpow2.f32 %v6508_v32 }
0x16ba   :  { %v7670_v51 = vpop.eup %7669 }
0x16bb   :  { %3888 = vrot.lane.b32.xlu1 %v7670_v51, %s7895_s4 }
0x16bc   :  { %v7672_v47 = vpop.eup %7671 }
0x16bd   :  { %v3882_v35 = vadd.f32 1.0, %v7672_v47 }
0x16bf   :  { %7673 = vrcp.f32 %v3882_v35 }
0x16c9   :  { %v7674_v40 = vpop.eup %7673 }
0x16ca   :  { %v3886_v43 = vmul.f32 %v7674_v40, %v3692_v41 }
0x1726   :  { %v9084_v6 = vpop.f32.mrb[98].mxu0 }
0x1727   :  { %v7169_v37 = vpop.f32.mrb[99].mxu0 }
0x172d   :  { %v3889_v0 = vpop.permute.xlu1 %3888 }
0x172e   :  { %v3891_v11 = vmul.f32 %v7674_v40, %v3889_v0 }
0x1730   :  { %3893 = vrot.lane.b32.xlu1 %v3891_v11, %s7896_s23 }
0x17a2   :  { %v3894_v5 = vpop.permute.xlu1 %3893 }
0x17a3   :  { %v3896_v44 = vadd.f32 %v3894_v5, %v3886_v43 }
0x17a5   :  { %7675 = vtanh.f32 %v3896_v44 }
0x17af   :  { %v7676_v48 = vpop.eup %7675 }
0x17b0   :  { %3899 = vrot.lane.b32.xlu1 %v7676_v48, %s7897_s0 }
0x1822   :  { %v3900_v53 = vpop.permute.xlu1 %3899 }
0x1823   :  { %v3902_v27 = vmul.f32 %v7674_v40, %v3900_v53 }
0x1825   :  { %4007 = vrot.lane.b32.xlu1 %v3902_v27, %s7898_s2 }
0x1897   :  { %v4008_v24 = vpop.permute.xlu1 %4007 }
0x1898   :  { %7175 = vmatmul.mubr.msk.f32.vlgmr.msra.gmra.mrb[100].mxu0 %vm2381_vm3, %v4008_v24 }
0x1899   :  { %7382 = vmatpush3.bf16.msra.mxu0 %v8768_v14  ;;  %7181 = vmatprep.mubr.msk.f32.mxu0 %vm7893_vm1, %v7894_v57 }
0x189a   :  { %7383 = vmatprep.subr.bf16.mxu0 %v7892_v46 }
0x196b   :  { %v4077_v58 = vpop.f32.mrb[100].mxu0 }
0x196c   :  { %v4081_v29 = vadd.f32 %v4077_v58, %v4005_v56  ;;  %v7176_v30 = vpop.f32.mrb[101].mxu0 }
0x196e   :  { %7677 = vtanh.f32 %v4081_v29  ;;  %v6512_v59 = vmul.f32 -1.442695, %v4081_v29 }
0x1970   :  { %7679 = vpow2.f32 %v6512_v59 }
0x1978   :  { %v7678_v18 = vpop.eup %7677 }
0x1979   :  { %4091 = vrot.lane.b32.xlu0 %v7678_v18, %s7895_s4 }
0x197a   :  { %v7680_v60 = vpop.eup %7679 }
0x197b   :  { %v4085_v50 = vadd.f32 1.0, %v7680_v60 }
0x197d   :  { %7681 = vrcp.f32 %v4085_v50 }
0x1987   :  { %v7682_v61 = vpop.eup %7681 }
0x1988   :  { %v4089_v62 = vmul.f32 %v7682_v61, %v3896_v44  ;;  %v4311_v44 = vld [vmem:[#allocation4 + $0x90] sm:$0xff] }
0x19eb   :  { %v4092_v45 = vpop.permute.xlu0 %4091 }
0x19ec   :  { %v4094_v54 = vmul.f32 %v7682_v61, %v4092_v45 }
0x19ee   :  { %4096 = vrot.lane.b32.xlu1 %v4094_v54, %s7896_s23 }
0x1a60   :  { %v4097_v63 = vpop.permute.xlu1 %4096 }
0x1a61   :  { %v4099_v49 = vadd.f32 %v4097_v63, %v4089_v62 }
0x1a63   :  { %7683 = vtanh.f32 %v4099_v49 }
0x1a6d   :  { %v7684_v3 = vpop.eup %7683 }
0x1a6e   :  { %4102 = vrot.lane.b32.xlu0 %v7684_v3, %s7897_s0 }
0x1ae0   :  { %v4103_v10 = vpop.permute.xlu0 %4102 }
0x1ae1   :  { %v4105_v7 = vmul.f32 %v7682_v61, %v4103_v10 }
0x1ae3   :  { %4109 = vrot.lane.b32.xlu1 %v4105_v7, %s7898_s2 }
0x1b55   :  { %v4110_v33 = vpop.permute.xlu1 %4109 }
0x1b56   :  { %7182 = vmatmul.mubr.msk.f32.vlgmr.msra.gmra.mrb[102].mxu0 %vm2381_vm3, %v4110_v33 }
0x1b57   :  { %7385 = vmatpush3.bf16.msra.mxu0 %v8768_v14  ;;  %7188 = vmatprep.mubr.msk.f32.mxu0 %vm7893_vm1, %v7894_v57 }
0x1b58   :  { %7386 = vmatprep.subr.bf16.mxu0 %v7892_v46 }
0x1c29   :  { %v4179_v9 = vpop.f32.mrb[102].mxu0 }
0x1c2a   :  { %v4183_v1 = vadd.f32 %v4179_v9, %v4107_v16  ;;  %v7183_v12 = vpop.f32.mrb[103].mxu0 }
0x1c2c   :  { %7685 = vtanh.f32 %v4183_v1  ;;  %v6514_v38 = vmul.f32 -1.442695, %v4183_v1 }
0x1c2e   :  { %7687 = vpow2.f32 %v6514_v38 }
0x1c36   :  { %v7686_v15 = vpop.eup %7685 }
0x1c37   :  { %4193 = vrot.lane.b32.xlu0 %v7686_v15, %s7895_s4 }
0x1c38   :  { %v7688_v4 = vpop.eup %7687 }
0x1c39   :  { %v4187_v36 = vadd.f32 1.0, %v7688_v4 }
0x1c3b   :  { %7689 = vrcp.f32 %v4187_v36 }
0x1c45   :  { %v7690_v41 = vpop.eup %7689 }
0x1c46   :  { %v4191_v20 = vmul.f32 %v7690_v41, %v4099_v49  ;;  %v4413_v49 = vld [vmem:[#allocation4 + $0x88] sm:$0xff] }
0x1ca9   :  { %v4194_v17 = vpop.permute.xlu0 %4193 }
0x1caa   :  { %v4196_v19 = vmul.f32 %v7690_v41, %v4194_v17 }
0x1cac   :  { %4198 = vrot.lane.b32.xlu1 %v4196_v19, %s7896_s23 }
0x1d1e   :  { %v4199_v22 = vpop.permute.xlu1 %4198 }
0x1d1f   :  { %v4201_v2 = vadd.f32 %v4199_v22, %v4191_v20 }
0x1d21   :  { %7691 = vtanh.f32 %v4201_v2 }
0x1d2b   :  { %v7692_v21 = vpop.eup %7691 }
0x1d2c   :  { %4204 = vrot.lane.b32.xlu0 %v7692_v21, %s7897_s0 }
0x1d9e   :  { %v4205_v8 = vpop.permute.xlu0 %4204 }
0x1d9f   :  { %v4207_v25 = vmul.f32 %v7690_v41, %v4205_v8 }
0x1da1   :  { %4211 = vrot.lane.b32.xlu1 %v4207_v25, %s7898_s2 }
0x1e13   :  { %v4212_v23 = vpop.permute.xlu1 %4211 }
0x1e14   :  { %7189 = vmatmul.mubr.msk.f32.vlgmr.msra.gmra.mrb[104].mxu0 %vm2381_vm3, %v4212_v23 }
0x1e15   :  { %7388 = vmatpush3.bf16.msra.mxu0 %v8768_v14  ;;  %7195 = vmatprep.mubr.msk.f32.mxu0 %vm7893_vm1, %v7894_v57 }
0x1e16   :  { %7389 = vmatprep.subr.bf16.mxu0 %v7892_v46 }
0x1ee7   :  { %v4281_v26 = vpop.f32.mrb[104].mxu0 }
0x1ee8   :  { %v4285_v55 = vadd.f32 %v4281_v26, %v4209_v34  ;;  %v7190_v28 = vpop.f32.mrb[105].mxu0 }
0x1eea   :  { %7693 = vtanh.f32 %v4285_v55  ;;  %v6516_v39 = vmul.f32 -1.442695, %v4285_v55 }
0x1eec   :  { %7695 = vpow2.f32 %v6516_v39 }
0x1ef4   :  { %v7694_v13 = vpop.eup %7693 }
0x1ef5   :  { %4295 = vrot.lane.b32.xlu0 %v7694_v13, %s7895_s4 }
0x1ef6   :  { %v7696_v42 = vpop.eup %7695 }
0x1ef7   :  { %v4289_v31 = vadd.f32 1.0, %v7696_v42 }
0x1ef9   :  { %7697 = vrcp.f32 %v4289_v31 }
0x1f03   :  { %v7698_v51 = vpop.eup %7697 }
0x1f04   :  { %v4293_v35 = vmul.f32 %v7698_v51, %v4201_v2  ;;  %v4515_v2 = vld [vmem:[#allocation4 + $0x80] sm:$0xff] }
0x1f67   :  { %v4296_v32 = vpop.permute.xlu0 %4295 }
0x1f68   :  { %v4298_v47 = vmul.f32 %v7698_v51, %v4296_v32 }
0x1f6a   :  { %4300 = vrot.lane.b32.xlu1 %v4298_v47, %s7896_s23 }
0x1fdc   :  { %v4301_v37 = vpop.permute.xlu1 %4300 }
0x1fdd   :  { %v4303_v40 = vadd.f32 %v4301_v37, %v4293_v35 }
0x1fdf   :  { %7699 = vtanh.f32 %v4303_v40 }
0x1fe9   :  { %v7700_v0 = vpop.eup %7699 }
0x1fea   :  { %4306 = vrot.lane.b32.xlu0 %v7700_v0, %s7897_s0 }
0x205c   :  { %v4307_v11 = vpop.permute.xlu0 %4306 }
0x205d   :  { %v4309_v43 = vmul.f32 %v7698_v51, %v4307_v11 }
0x205f   :  { %4313 = vrot.lane.b32.xlu1 %v4309_v43, %s7898_s2 }
0x20d1   :  { %v4314_v5 = vpop.permute.xlu1 %4313 }
0x20d2   :  { %7196 = vmatmul.mubr.msk.f32.vlgmr.msra.gmra.mrb[106].mxu0 %vm2381_vm3, %v4314_v5 }
0x20d3   :  { %7391 = vmatpush3.bf16.msra.mxu0 %v8768_v14  ;;  %7202 = vmatprep.mubr.msk.f32.mxu0 %vm7893_vm1, %v7894_v57 }
0x20d4   :  { %7392 = vmatprep.subr.bf16.mxu0 %v7892_v46 }
0x21a5   :  { %v4383_v48 = vpop.f32.mrb[106].mxu0 }
0x21a6   :  { %v4387_v53 = vadd.f32 %v4383_v48, %v4311_v44  ;;  %v7197_v27 = vpop.f32.mrb[107].mxu0 }
0x21a8   :  { %7701 = vtanh.f32 %v4387_v53  ;;  %v6518_v56 = vmul.f32 -1.442695, %v4387_v53 }
0x21aa   :  { %7703 = vpow2.f32 %v6518_v56 }
0x21b2   :  { %v7702_v24 = vpop.eup %7701 }
0x21b3   :  { %4397 = vrot.lane.b32.xlu0 %v7702_v24, %s7895_s4 }
0x21b4   :  { %v7704_v58 = vpop.eup %7703 }
0x21b5   :  { %v4391_v29 = vadd.f32 1.0, %v7704_v58 }
0x21b7   :  { %7705 = vrcp.f32 %v4391_v29 }
0x21c1   :  { %v7706_v30 = vpop.eup %7705 }
0x21c2   :  { %v4395_v60 = vmul.f32 %v7706_v30, %v4303_v40  ;;  %v4617_v40 = vld [vmem:[#allocation4 + $0x78] sm:$0xff] }
0x2225   :  { %v4398_v18 = vpop.permute.xlu0 %4397 }
0x2226   :  { %v4400_v59 = vmul.f32 %v7706_v30, %v4398_v18 }
0x2228   :  { %4402 = vrot.lane.b32.xlu1 %v4400_v59, %s7896_s23 }
0x229a   :  { %v4403_v50 = vpop.permute.xlu1 %4402 }
0x229b   :  { %v4405_v61 = vadd.f32 %v4403_v50, %v4395_v60 }
0x229d   :  { %7707 = vtanh.f32 %v4405_v61 }
0x22a7   :  { %v7708_v45 = vpop.eup %7707 }
0x22a8   :  { %4408 = vrot.lane.b32.xlu0 %v7708_v45, %s7897_s0 }
0x231a   :  { %v4409_v54 = vpop.permute.xlu0 %4408 }
0x231b   :  { %v4411_v62 = vmul.f32 %v7706_v30, %v4409_v54 }
0x231d   :  { %4415 = vrot.lane.b32.xlu1 %v4411_v62, %s7898_s2 }
0x238f   :  { %v4416_v63 = vpop.permute.xlu1 %4415 }
0x2390   :  { %7203 = vmatmul.mubr.msk.f32.vlgmr.msra.gmra.mrb[108].mxu0 %vm2381_vm3, %v4416_v63 }
0x2391   :  { %7394 = vmatpush3.bf16.msra.mxu0 %v8768_v14  ;;  %7209 = vmatprep.mubr.msk.f32.mxu0 %vm7893_vm1, %v7894_v57 }
0x2392   :  { %7395 = vmatprep.subr.bf16.mxu0 %v7892_v46 }
0x2463   :  { %v4485_v3 = vpop.f32.mrb[108].mxu0 }
0x2464   :  { %v4489_v10 = vadd.f32 %v4485_v3, %v4413_v49  ;;  %v7204_v7 = vpop.f32.mrb[109].mxu0 }
0x2466   :  { %7709 = vtanh.f32 %v4489_v10  ;;  %v6520_v16 = vmul.f32 -1.442695, %v4489_v10 }
0x2468   :  { %7711 = vpow2.f32 %v6520_v16 }
0x2470   :  { %v7710_v33 = vpop.eup %7709 }
0x2471   :  { %4499 = vrot.lane.b32.xlu0 %v7710_v33, %s7895_s4 }
0x2472   :  { %v7712_v9 = vpop.eup %7711 }
0x2473   :  { %v4493_v1 = vadd.f32 1.0, %v7712_v9 }
0x2475   :  { %7713 = vrcp.f32 %v4493_v1 }
0x247f   :  { %v7714_v12 = vpop.eup %7713 }
0x2480   :  { %v4497_v4 = vmul.f32 %v7714_v12, %v4405_v61  ;;  %v4719_v61 = vld [vmem:[#allocation4 + $0x70] sm:$0xff] }
0x24e3   :  { %v4500_v15 = vpop.permute.xlu0 %4499 }
0x24e4   :  { %v4502_v38 = vmul.f32 %v7714_v12, %v4500_v15 }
0x24e6   :  { %4504 = vrot.lane.b32.xlu1 %v4502_v38, %s7896_s23 }
0x2558   :  { %v4505_v36 = vpop.permute.xlu1 %4504 }
0x2559   :  { %v4507_v41 = vadd.f32 %v4505_v36, %v4497_v4 }
0x255b   :  { %7715 = vtanh.f32 %v4507_v41 }
0x2565   :  { %v7716_v17 = vpop.eup %7715 }
0x2566   :  { %4510 = vrot.lane.b32.xlu0 %v7716_v17, %s7897_s0 }
0x25d8   :  { %v4511_v19 = vpop.permute.xlu0 %4510 }
0x25d9   :  { %v4513_v20 = vmul.f32 %v7714_v12, %v4511_v19 }
0x25db   :  { %4517 = vrot.lane.b32.xlu1 %v4513_v20, %s7898_s2 }
0x264d   :  { %v4518_v22 = vpop.permute.xlu1 %4517 }
0x264e   :  { %7210 = vmatmul.mubr.msk.f32.vlgmr.msra.gmra.mrb[110].mxu0 %vm2381_vm3, %v4518_v22 }
0x264f   :  { %7397 = vmatpush3.bf16.msra.mxu0 %v8768_v14  ;;  %7216 = vmatprep.mubr.msk.f32.mxu0 %vm7893_vm1, %v7894_v57 }
0x2650   :  { %7401 = vmatprep.subr.bf16.mxu0 %v7892_v46 }
0x2721   :  { %v4587_v21 = vpop.f32.mrb[110].mxu0 }
0x2722   :  { %v4591_v8 = vadd.f32 %v4587_v21, %v4515_v2  ;;  %v7211_v25 = vpop.f32.mrb[111].mxu0 }
0x2724   :  { %7717 = vtanh.f32 %v4591_v8  ;;  %v6522_v34 = vmul.f32 -1.442695, %v4591_v8 }
0x2726   :  { %7719 = vpow2.f32 %v6522_v34 }
0x272e   :  { %v7718_v23 = vpop.eup %7717 }
0x272f   :  { %4601 = vrot.lane.b32.xlu0 %v7718_v23, %s7895_s4 }
0x2730   :  { %v7720_v26 = vpop.eup %7719 }
0x2731   :  { %v4595_v55 = vadd.f32 1.0, %v7720_v26 }
0x2733   :  { %7721 = vrcp.f32 %v4595_v55 }
0x273d   :  { %v7722_v28 = vpop.eup %7721 }
0x273e   :  { %v4599_v42 = vmul.f32 %v7722_v28, %v4507_v41  ;;  %v4821_v41 = vld [vmem:[#allocation4 + $0x68] sm:$0xff] }
0x27a1   :  { %v4602_v13 = vpop.permute.xlu0 %4601 }
0x27a2   :  { %v4604_v39 = vmul.f32 %v7722_v28, %v4602_v13 }
0x27a4   :  { %4606 = vrot.lane.b32.xlu1 %v4604_v39, %s7896_s23 }
0x2816   :  { %v4607_v31 = vpop.permute.xlu1 %4606 }
0x2817   :  { %v4609_v51 = vadd.f32 %v4607_v31, %v4599_v42 }
0x2819   :  { %7723 = vtanh.f32 %v4609_v51 }
0x2823   :  { %v7724_v32 = vpop.eup %7723 }
0x2824   :  { %4612 = vrot.lane.b32.xlu0 %v7724_v32, %s7897_s0 }
0x2896   :  { %v4613_v47 = vpop.permute.xlu0 %4612 }
0x2897   :  { %v4615_v35 = vmul.f32 %v7722_v28, %v4613_v47 }
0x2899   :  { %4619 = vrot.lane.b32.xlu1 %v4615_v35, %s7898_s2 }
0x290b   :  { %v4620_v37 = vpop.permute.xlu1 %4619 }
0x290c   :  { %7217 = vmatmul.mubr.msk.f32.vlgmr.msra.gmra.mrb[112].mxu0 %vm2381_vm3, %v4620_v37 }
0x290d   :  { %7403 = vmatpush3.bf16.msra.mxu0 %v8768_v14  ;;  %7230 = vmatprep.mubr.msk.f32.mxu0 %vm7893_vm1, %v7894_v57 }
0x290e   :  { %7407 = vmatprep.subr.bf16.mxu0 %v7892_v46 }
0x29df   :  { %v4689_v0 = vpop.f32.mrb[112].mxu0 }
0x29e0   :  { %v4693_v11 = vadd.f32 %v4689_v0, %v4617_v40  ;;  %v7218_v43 = vpop.f32.mrb[113].mxu0 }
0x29e2   :  { %7725 = vtanh.f32 %v4693_v11  ;;  %v6524_v44 = vmul.f32 -1.442695, %v4693_v11 }
0x29e4   :  { %7727 = vpow2.f32 %v6524_v44 }
0x29ec   :  { %v7726_v5 = vpop.eup %7725 }
0x29ed   :  { %4703 = vrot.lane.b32.xlu0 %v7726_v5, %s7895_s4 }
0x29ee   :  { %v7728_v48 = vpop.eup %7727 }
0x29ef   :  { %v4697_v53 = vadd.f32 1.0, %v7728_v48 }
0x29f1   :  { %7729 = vrcp.f32 %v4697_v53 }
0x29fb   :  { %v7730_v27 = vpop.eup %7729 }
0x29fc   :  { %v4701_v58 = vmul.f32 %v7730_v27, %v4609_v51  ;;  %v4923_v51 = vld [vmem:[#allocation4 + $0x60] sm:$0xff] }
0x2a5f   :  { %v4704_v24 = vpop.permute.xlu0 %4703 }
0x2a60   :  { %v4706_v56 = vmul.f32 %v7730_v27, %v4704_v24 }
0x2a62   :  { %4708 = vrot.lane.b32.xlu1 %v4706_v56, %s7896_s23 }
0x2ad4   :  { %v4709_v29 = vpop.permute.xlu1 %4708 }
0x2ad5   :  { %v4711_v30 = vadd.f32 %v4709_v29, %v4701_v58 }
0x2ad7   :  { %7731 = vtanh.f32 %v4711_v30 }
0x2ae1   :  { %v7732_v18 = vpop.eup %7731 }
0x2ae2   :  { %4714 = vrot.lane.b32.xlu0 %v7732_v18, %s7897_s0 }
0x2b54   :  { %v4715_v59 = vpop.permute.xlu0 %4714 }
0x2b55   :  { %v4717_v60 = vmul.f32 %v7730_v27, %v4715_v59 }
0x2b57   :  { %4721 = vrot.lane.b32.xlu1 %v4717_v60, %s7898_s2 }
0x2bc9   :  { %v4722_v50 = vpop.permute.xlu1 %4721 }
0x2bca   :  { %7224 = vmatmul.mubr.msk.f32.vlgmr.msra.gmra.mrb[124].mxu1 %vm2381_vm3, %v4722_v50 }
0x2bcb   :  { %7406 = vmatpush3.bf16.msra.mxu1 %v8768_v14  ;;  %7237 = vmatprep.mubr.msk.f32.mxu1 %vm7893_vm1, %v7894_v57 }
0x2bcc   :  { %7410 = vmatprep.subr.bf16.mxu1 %v7892_v46 }
0x2c9d   :  { %v4791_v45 = vpop.f32.mrb[124].mxu1 }
0x2c9e   :  { %v4795_v54 = vadd.f32 %v4791_v45, %v4719_v61  ;;  %v7225_v62 = vpop.f32.mrb[125].mxu1 }
0x2ca0   :  { %7733 = vtanh.f32 %v4795_v54  ;;  %v6526_v49 = vmul.f32 -1.442695, %v4795_v54 }
0x2ca2   :  { %7735 = vpow2.f32 %v6526_v49 }
0x2caa   :  { %v7734_v63 = vpop.eup %7733 }
0x2cab   :  { %4805 = vrot.lane.b32.xlu0 %v7734_v63, %s7895_s4 }
0x2cac   :  { %v7736_v3 = vpop.eup %7735 }
0x2cad   :  { %v4799_v10 = vadd.f32 1.0, %v7736_v3 }
0x2caf   :  { %7737 = vrcp.f32 %v4799_v10 }
0x2cb9   :  { %v7738_v7 = vpop.eup %7737 }
0x2cba   :  { %v4803_v9 = vmul.f32 %v7738_v7, %v4711_v30  ;;  %v5025_v30 = vld [vmem:[#allocation4 + $0x58] sm:$0xff] }
0x2d1d   :  { %v4806_v33 = vpop.permute.xlu0 %4805 }
0x2d1e   :  { %v4808_v16 = vmul.f32 %v7738_v7, %v4806_v33 }
0x2d20   :  { %4810 = vrot.lane.b32.xlu1 %v4808_v16, %s7896_s23 }
0x2d92   :  { %v4811_v1 = vpop.permute.xlu1 %4810 }
0x2d93   :  { %v4813_v12 = vadd.f32 %v4811_v1, %v4803_v9 }
0x2d95   :  { %7739 = vtanh.f32 %v4813_v12 }
0x2d9f   :  { %v7740_v15 = vpop.eup %7739 }
0x2da0   :  { %4816 = vrot.lane.b32.xlu0 %v7740_v15, %s7897_s0 }
0x2e12   :  { %v4817_v38 = vpop.permute.xlu0 %4816 }
0x2e13   :  { %v4819_v4 = vmul.f32 %v7738_v7, %v4817_v38 }
0x2e15   :  { %4823 = vrot.lane.b32.xlu1 %v4819_v4, %s7898_s2 }
0x2e87   :  { %v4824_v36 = vpop.permute.xlu1 %4823 }
0x2e88   :  { %7231 = vmatmul.mubr.msk.f32.vlgmr.msra.gmra.mrb[114].mxu0 %vm2381_vm3, %v4824_v36 }
0x2e89   :  { %7409 = vmatpush3.bf16.msra.mxu0 %v8768_v14  ;;  %7244 = vmatprep.mubr.msk.f32.mxu0 %vm7893_vm1, %v7894_v57 }
0x2e8a   :  { %7413 = vmatprep.subr.bf16.mxu0 %v7892_v46 }
0x2f5b   :  { %v4893_v17 = vpop.f32.mrb[114].mxu0 }
0x2f5c   :  { %v4897_v19 = vadd.f32 %v4893_v17, %v4821_v41  ;;  %v7232_v20 = vpop.f32.mrb[115].mxu0 }
0x2f5e   :  { %7741 = vtanh.f32 %v4897_v19  ;;  %v6528_v2 = vmul.f32 -1.442695, %v4897_v19 }
0x2f60   :  { %7743 = vpow2.f32 %v6528_v2 }
0x2f68   :  { %v7742_v22 = vpop.eup %7741 }
0x2f69   :  { %4907 = vrot.lane.b32.xlu0 %v7742_v22, %s7895_s4 }
0x2f6a   :  { %v7744_v21 = vpop.eup %7743 }
0x2f6b   :  { %v4901_v8 = vadd.f32 1.0, %v7744_v21 }
0x2f6d   :  { %7745 = vrcp.f32 %v4901_v8 }
0x2f77   :  { %v7746_v25 = vpop.eup %7745 }
0x2f78   :  { %v4905_v26 = vmul.f32 %v7746_v25, %v4813_v12  ;;  %v5127_v12 = vld [vmem:[#allocation4 + $0x50] sm:$0xff] }
0x2fdb   :  { %v4908_v23 = vpop.permute.xlu0 %4907 }
0x2fdc   :  { %v4910_v34 = vmul.f32 %v7746_v25, %v4908_v23 }
0x2fde   :  { %4912 = vrot.lane.b32.xlu1 %v4910_v34, %s7896_s23 }
0x3050   :  { %v4913_v55 = vpop.permute.xlu1 %4912 }
0x3051   :  { %v4915_v28 = vadd.f32 %v4913_v55, %v4905_v26 }
0x3053   :  { %7747 = vtanh.f32 %v4915_v28 }
0x305d   :  { %v7748_v13 = vpop.eup %7747 }
0x305e   :  { %4918 = vrot.lane.b32.xlu0 %v7748_v13, %s7897_s0 }
0x30d0   :  { %v4919_v39 = vpop.permute.xlu0 %4918 }
0x30d1   :  { %v4921_v42 = vmul.f32 %v7746_v25, %v4919_v39 }
0x30d3   :  { %4925 = vrot.lane.b32.xlu1 %v4921_v42, %s7898_s2 }
0x3145   :  { %v4926_v31 = vpop.permute.xlu1 %4925 }
0x3146   :  { %7238 = vmatmul.mubr.msk.f32.vlgmr.msra.gmra.mrb[126].mxu1 %vm2381_vm3, %v4926_v31 }
0x3147   :  { %7412 = vmatpush3.bf16.msra.mxu1 %v8768_v14  ;;  %7251 = vmatprep.mubr.msk.f32.mxu1 %vm7893_vm1, %v7894_v57 }
0x3148   :  { %7416 = vmatprep.subr.bf16.mxu1 %v7892_v46 }
0x3219   :  { %v4995_v32 = vpop.f32.mrb[126].mxu1 }
0x321a   :  { %v4999_v47 = vadd.f32 %v4995_v32, %v4923_v51  ;;  %v7239_v35 = vpop.f32.mrb[127].mxu1 }
0x321c   :  { %7749 = vtanh.f32 %v4999_v47  ;;  %v6530_v40 = vmul.f32 -1.442695, %v4999_v47 }
0x321e   :  { %7751 = vpow2.f32 %v6530_v40 }
0x3226   :  { %v7750_v37 = vpop.eup %7749 }
0x3227   :  { %5009 = vrot.lane.b32.xlu0 %v7750_v37, %s7895_s4 }
0x3228   :  { %v7752_v0 = vpop.eup %7751 }
0x3229   :  { %v5003_v11 = vadd.f32 1.0, %v7752_v0 }
0x322b   :  { %7753 = vrcp.f32 %v5003_v11 }
0x3235   :  { %v7754_v43 = vpop.eup %7753 }
0x3236   :  { %v5007_v48 = vmul.f32 %v7754_v43, %v4915_v28  ;;  %v5229_v28 = vld [vmem:[#allocation4 + $0x48] sm:$0xff] }
0x3299   :  { %v5010_v5 = vpop.permute.xlu0 %5009 }
0x329a   :  { %v5012_v44 = vmul.f32 %v7754_v43, %v5010_v5 }
0x329c   :  { %5014 = vrot.lane.b32.xlu1 %v5012_v44, %s7896_s23 }
0x330e   :  { %v5015_v53 = vpop.permute.xlu1 %5014 }
0x330f   :  { %v5017_v27 = vadd.f32 %v5015_v53, %v5007_v48 }
0x3311   :  { %7755 = vtanh.f32 %v5017_v27 }
0x331b   :  { %v7756_v24 = vpop.eup %7755 }
0x331c   :  { %5020 = vrot.lane.b32.xlu0 %v7756_v24, %s7897_s0 }
0x338e   :  { %v5021_v56 = vpop.permute.xlu0 %5020 }
0x338f   :  { %v5023_v58 = vmul.f32 %v7754_v43, %v5021_v56 }
0x3391   :  { %5027 = vrot.lane.b32.xlu1 %v5023_v58, %s7898_s2 }
0x3403   :  { %v5028_v29 = vpop.permute.xlu1 %5027 }
0x3404   :  { %7245 = vmatmul.mubr.msk.f32.vlgmr.msra.gmra.mrb[116].mxu0 %vm2381_vm3, %v5028_v29 }
0x3405   :  { %7415 = vmatpush3.bf16.msra.mxu0 %v8768_v14  ;;  %7258 = vmatprep.mubr.msk.f32.mxu0 %vm7893_vm1, %v7894_v57 }
0x3406   :  { %7419 = vmatprep.subr.bf16.mxu0 %v7892_v46 }
0x34d7   :  { %v5097_v18 = vpop.f32.mrb[116].mxu0 }
0x34d8   :  { %v5101_v59 = vadd.f32 %v5097_v18, %v5025_v30  ;;  %v7246_v60 = vpop.f32.mrb[117].mxu0 }
0x34da   :  { %7757 = vtanh.f32 %v5101_v59  ;;  %v6532_v61 = vmul.f32 -1.442695, %v5101_v59 }
0x34dc   :  { %7759 = vpow2.f32 %v6532_v61 }
0x34e4   :  { %v7758_v50 = vpop.eup %7757 }
0x34e5   :  { %5111 = vrot.lane.b32.xlu0 %v7758_v50, %s7895_s4 }
0x34e6   :  { %v7760_v45 = vpop.eup %7759 }
0x34e7   :  { %v5105_v54 = vadd.f32 1.0, %v7760_v45 }
0x34e9   :  { %7761 = vrcp.f32 %v5105_v54 }
0x34f3   :  { %v7762_v62 = vpop.eup %7761 }
0x34f4   :  { %v5109_v3 = vmul.f32 %v7762_v62, %v5017_v27  ;;  %v5331_v27 = vld [vmem:[#allocation4 + $0x40] sm:$0xff] }
0x3557   :  { %v5112_v63 = vpop.permute.xlu0 %5111 }
0x3558   :  { %v5114_v49 = vmul.f32 %v7762_v62, %v5112_v63 }
0x355a   :  { %5116 = vrot.lane.b32.xlu1 %v5114_v49, %s7896_s23 }
0x35cc   :  { %v5117_v10 = vpop.permute.xlu1 %5116 }
0x35cd   :  { %v5119_v7 = vadd.f32 %v5117_v10, %v5109_v3 }
0x35cf   :  { %7763 = vtanh.f32 %v5119_v7 }
0x35d9   :  { %v7764_v33 = vpop.eup %7763 }
0x35da   :  { %5122 = vrot.lane.b32.xlu0 %v7764_v33, %s7897_s0 }
0x364c   :  { %v5123_v16 = vpop.permute.xlu0 %5122 }
0x364d   :  { %v5125_v9 = vmul.f32 %v7762_v62, %v5123_v16 }
0x364f   :  { %5129 = vrot.lane.b32.xlu1 %v5125_v9, %s7898_s2 }
0x36c1   :  { %v5130_v1 = vpop.permute.xlu1 %5129 }
0x36c2   :  { %7252 = vmatmul.mubr.msk.f32.vlgmr.msra.gmra.mrb[128].mxu1 %vm2381_vm3, %v5130_v1 }
0x36c3   :  { %7418 = vmatpush3.bf16.msra.mxu1 %v8768_v14  ;;  %7265 = vmatprep.mubr.msk.f32.mxu1 %vm7893_vm1, %v7894_v57 }
0x36c4   :  { %7422 = vmatprep.subr.bf16.mxu1 %v7892_v46 }
0x3795   :  { %v5199_v15 = vpop.f32.mrb[128].mxu1 }
0x3796   :  { %v5203_v38 = vadd.f32 %v5199_v15, %v5127_v12  ;;  %v7253_v4 = vpop.f32.mrb[129].mxu1 }
0x3798   :  { %7765 = vtanh.f32 %v5203_v38  ;;  %v6534_v41 = vmul.f32 -1.442695, %v5203_v38 }
0x379a   :  { %7767 = vpow2.f32 %v6534_v41 }
0x37a2   :  { %v7766_v36 = vpop.eup %7765 }
0x37a3   :  { %5213 = vrot.lane.b32.xlu0 %v7766_v36, %s7895_s4 }
0x37a4   :  { %v7768_v17 = vpop.eup %7767 }
0x37a5   :  { %v5207_v19 = vadd.f32 1.0, %v7768_v17 }
0x37a7   :  { %7769 = vrcp.f32 %v5207_v19 }
0x37b1   :  { %v7770_v20 = vpop.eup %7769 }
0x37b2   :  { %v5211_v21 = vmul.f32 %v7770_v20, %v5119_v7  ;;  %v5433_v7 = vld [vmem:[#allocation4 + $0x38] sm:$0xff] }
0x3815   :  { %v5214_v22 = vpop.permute.xlu0 %5213 }
0x3816   :  { %v5216_v2 = vmul.f32 %v7770_v20, %v5214_v22 }
0x3818   :  { %5218 = vrot.lane.b32.xlu1 %v5216_v2, %s7896_s23 }
0x388a   :  { %v5219_v8 = vpop.permute.xlu1 %5218 }
0x388b   :  { %v5221_v25 = vadd.f32 %v5219_v8, %v5211_v21 }
0x388d   :  { %7771 = vtanh.f32 %v5221_v25 }
0x3897   :  { %v7772_v23 = vpop.eup %7771 }
0x3898   :  { %5224 = vrot.lane.b32.xlu0 %v7772_v23, %s7897_s0 }
0x390a   :  { %v5225_v34 = vpop.permute.xlu0 %5224 }
0x390b   :  { %v5227_v26 = vmul.f32 %v7770_v20, %v5225_v34 }
0x390d   :  { %5231 = vrot.lane.b32.xlu1 %v5227_v26, %s7898_s2 }
0x397f   :  { %v5232_v55 = vpop.permute.xlu1 %5231 }
0x3980   :  { %7259 = vmatmul.mubr.msk.f32.vlgmr.msra.gmra.mrb[118].mxu0 %vm2381_vm3, %v5232_v55 }
0x3981   :  { %7421 = vmatpush3.bf16.msra.mxu0 %v8768_v14  ;;  %7272 = vmatprep.mubr.msk.f32.mxu0 %vm7893_vm1, %v7894_v57 }
0x3982   :  { %7425 = vmatprep.subr.bf16.mxu0 %v7892_v46 }
0x3a53   :  { %v5301_v13 = vpop.f32.mrb[118].mxu0 }
0x3a54   :  { %v5305_v39 = vadd.f32 %v5301_v13, %v5229_v28  ;;  %v7260_v42 = vpop.f32.mrb[119].mxu0 }
0x3a56   :  { %7773 = vtanh.f32 %v5305_v39  ;;  %v6536_v51 = vmul.f32 -1.442695, %v5305_v39 }
0x3a58   :  { %7775 = vpow2.f32 %v6536_v51 }
0x3a60   :  { %v7774_v31 = vpop.eup %7773 }
0x3a61   :  { %5315 = vrot.lane.b32.xlu0 %v7774_v31, %s7895_s4 }
0x3a62   :  { %v7776_v32 = vpop.eup %7775 }
0x3a63   :  { %v5309_v47 = vadd.f32 1.0, %v7776_v32 }
0x3a65   :  { %7777 = vrcp.f32 %v5309_v47 }
0x3a6f   :  { %v7778_v35 = vpop.eup %7777 }
0x3a70   :  { %v5313_v0 = vmul.f32 %v7778_v35, %v5221_v25  ;;  %v5535_v25 = vld [vmem:[#allocation4 + $0x30] sm:$0xff] }
0x3ad3   :  { %v5316_v37 = vpop.permute.xlu0 %5315 }
0x3ad4   :  { %v5318_v40 = vmul.f32 %v7778_v35, %v5316_v37 }
0x3ad6   :  { %5320 = vrot.lane.b32.xlu1 %v5318_v40, %s7896_s23 }
0x3b48   :  { %v5321_v11 = vpop.permute.xlu1 %5320 }
0x3b49   :  { %v5323_v43 = vadd.f32 %v5321_v11, %v5313_v0 }
0x3b4b   :  { %7779 = vtanh.f32 %v5323_v43 }
0x3b55   :  { %v7780_v5 = vpop.eup %7779 }
0x3b56   :  { %5326 = vrot.lane.b32.xlu0 %v7780_v5, %s7897_s0 }
0x3bc8   :  { %v5327_v44 = vpop.permute.xlu0 %5326 }
0x3bc9   :  { %v5329_v48 = vmul.f32 %v7778_v35, %v5327_v44 }
0x3bcb   :  { %5333 = vrot.lane.b32.xlu1 %v5329_v48, %s7898_s2 }
0x3c3d   :  { %v5334_v53 = vpop.permute.xlu1 %5333 }
0x3c3e   :  { %7266 = vmatmul.mubr.msk.f32.vlgmr.msra.gmra.mrb[130].mxu1 %vm2381_vm3, %v5334_v53 }
0x3c3f   :  { %7424 = vmatpush3.bf16.msra.mxu1 %v8768_v14  ;;  %7279 = vmatprep.mubr.msk.f32.mxu1 %vm7893_vm1, %v7894_v57 }
0x3c40   :  { %7428 = vmatprep.subr.bf16.mxu1 %v7892_v46 }
0x3d11   :  { %v5403_v24 = vpop.f32.mrb[130].mxu1 }
0x3d12   :  { %v5407_v56 = vadd.f32 %v5403_v24, %v5331_v27  ;;  %v7267_v58 = vpop.f32.mrb[131].mxu1 }
0x3d14   :  { %7781 = vtanh.f32 %v5407_v56  ;;  %v6538_v30 = vmul.f32 -1.442695, %v5407_v56 }
0x3d16   :  { %7783 = vpow2.f32 %v6538_v30 }
0x3d1e   :  { %v7782_v29 = vpop.eup %7781 }
0x3d1f   :  { %5417 = vrot.lane.b32.xlu0 %v7782_v29, %s7895_s4 }
0x3d20   :  { %v7784_v18 = vpop.eup %7783 }
0x3d21   :  { %v5411_v59 = vadd.f32 1.0, %v7784_v18 }
0x3d23   :  { %7785 = vrcp.f32 %v5411_v59 }
0x3d2d   :  { %v7786_v60 = vpop.eup %7785 }
0x3d2e   :  { %v5415_v45 = vmul.f32 %v7786_v60, %v5323_v43  ;;  %v5637_v43 = vld [vmem:[#allocation4 + $0x28] sm:$0xff] }
0x3d91   :  { %v5418_v50 = vpop.permute.xlu0 %5417 }
0x3d92   :  { %v5420_v61 = vmul.f32 %v7786_v60, %v5418_v50 }
0x3d94   :  { %5422 = vrot.lane.b32.xlu1 %v5420_v61, %s7896_s23 }
0x3e06   :  { %v5423_v54 = vpop.permute.xlu1 %5422 }
0x3e07   :  { %v5425_v62 = vadd.f32 %v5423_v54, %v5415_v45 }
0x3e09   :  { %7787 = vtanh.f32 %v5425_v62 }
0x3e13   :  { %v7788_v63 = vpop.eup %7787 }
0x3e14   :  { %5428 = vrot.lane.b32.xlu0 %v7788_v63, %s7897_s0 }
0x3e86   :  { %v5429_v49 = vpop.permute.xlu0 %5428 }
0x3e87   :  { %v5431_v3 = vmul.f32 %v7786_v60, %v5429_v49 }
0x3e89   :  { %5435 = vrot.lane.b32.xlu1 %v5431_v3, %s7898_s2 }
0x3efb   :  { %v5436_v10 = vpop.permute.xlu1 %5435 }
0x3efc   :  { %7273 = vmatmul.mubr.msk.f32.vlgmr.msra.gmra.mrb[120].mxu0 %vm2381_vm3, %v5436_v10 }
0x3efd   :  { %7427 = vmatpush3.bf16.msra.mxu0 %v8768_v14  ;;  %7286 = vmatprep.mubr.msk.f32.mxu0 %vm7893_vm1, %v7894_v57 }
0x3efe   :  { %7431 = vmatprep.subr.bf16.mxu0 %v7892_v46 }
0x3fcf   :  { %v5505_v33 = vpop.f32.mrb[120].mxu0 }
0x3fd0   :  { %v5509_v16 = vadd.f32 %v5505_v33, %v5433_v7  ;;  %v7274_v9 = vpop.f32.mrb[121].mxu0 }
0x3fd2   :  { %7789 = vtanh.f32 %v5509_v16  ;;  %v6540_v12 = vmul.f32 -1.442695, %v5509_v16 }
0x3fd4   :  { %7791 = vpow2.f32 %v6540_v12 }
0x3fdc   :  { %v7790_v1 = vpop.eup %7789 }
0x3fdd   :  { %5519 = vrot.lane.b32.xlu0 %v7790_v1, %s7895_s4 }
0x3fde   :  { %v7792_v15 = vpop.eup %7791 }
0x3fdf   :  { %v5513_v38 = vadd.f32 1.0, %v7792_v15 }
0x3fe1   :  { %7793 = vrcp.f32 %v5513_v38 }
0x3feb   :  { %v7794_v4 = vpop.eup %7793 }
0x3fec   :  { %v5517_v17 = vmul.f32 %v7794_v4, %v5425_v62  ;;  %v5739_v62 = vld [vmem:[#allocation4 + $0x20] sm:$0xff] }
0x404f   :  { %v5520_v36 = vpop.permute.xlu0 %5519 }
0x4050   :  { %v5522_v41 = vmul.f32 %v7794_v4, %v5520_v36 }
0x4052   :  { %5524 = vrot.lane.b32.xlu1 %v5522_v41, %s7896_s23 }
0x40c4   :  { %v5525_v19 = vpop.permute.xlu1 %5524 }
0x40c5   :  { %v5527_v20 = vadd.f32 %v5525_v19, %v5517_v17  ;;  %v5841_v19 = vld [vmem:[#allocation4 + $0x18] sm:$0xff] }
0x40c7   :  { %7795 = vtanh.f32 %v5527_v20 }
0x40d1   :  { %v7796_v22 = vpop.eup %7795 }
0x40d2   :  { %5530 = vrot.lane.b32.xlu0 %v7796_v22, %s7897_s0 }
0x4144   :  { %v5531_v2 = vpop.permute.xlu0 %5530 }
0x4145   :  { %v5533_v21 = vmul.f32 %v7794_v4, %v5531_v2 }
0x4147   :  { %5537 = vrot.lane.b32.xlu1 %v5533_v21, %s7898_s2 }
0x41b9   :  { %v5538_v8 = vpop.permute.xlu1 %5537 }
0x41ba   :  { %7280 = vmatmul.mubr.msk.f32.vlgmr.msra.gmra.mrb[132].mxu1 %vm2381_vm3, %v5538_v8 }
0x41bb   :  { %7430 = vmatpush3.bf16.msra.mxu1 %v8768_v14  ;;  %7293 = vmatprep.mubr.msk.f32.mxu1 %vm7893_vm1, %v7894_v57 }
0x41bc   :  { %7434 = vmatprep.subr.bf16.mxu1 %v7892_v46 }
0x428d   :  { %v5607_v23 = vpop.f32.mrb[132].mxu1 }
0x428e   :  { %v5611_v34 = vadd.f32 %v5607_v23, %v5535_v25  ;;  %v7281_v26 = vpop.f32.mrb[133].mxu1 }
0x4290   :  { %7797 = vtanh.f32 %v5611_v34  ;;  %v6542_v28 = vmul.f32 -1.442695, %v5611_v34 }
0x4292   :  { %7799 = vpow2.f32 %v6542_v28 }
0x429a   :  { %v7798_v55 = vpop.eup %7797 }
0x429b   :  { %5621 = vrot.lane.b32.xlu0 %v7798_v55, %s7895_s4 }
0x429c   :  { %v7800_v13 = vpop.eup %7799 }
0x429d   :  { %v5615_v39 = vadd.f32 1.0, %v7800_v13 }
0x429f   :  { %7801 = vrcp.f32 %v5615_v39 }
0x42a9   :  { %v7802_v42 = vpop.eup %7801 }
0x42aa   :  { %v5619_v32 = vmul.f32 %v7802_v42, %v5527_v20 }
0x430d   :  { %v5622_v31 = vpop.permute.xlu0 %5621 }
0x430e   :  { %v5624_v51 = vmul.f32 %v7802_v42, %v5622_v31 }
0x4310   :  { %5626 = vrot.lane.b32.xlu1 %v5624_v51, %s7896_s23 }
0x4382   :  { %v5627_v47 = vpop.permute.xlu1 %5626 }
0x4383   :  { %v5629_v35 = vadd.f32 %v5627_v47, %v5619_v32  ;;  %v5943_v47 = vld [vmem:[#allocation4 + $0x10] sm:$0xff] }
0x4385   :  { %7803 = vtanh.f32 %v5629_v35 }
0x438f   :  { %v7804_v37 = vpop.eup %7803 }
0x4390   :  { %5632 = vrot.lane.b32.xlu0 %v7804_v37, %s7897_s0 }
0x4402   :  { %v5633_v40 = vpop.permute.xlu0 %5632 }
0x4403   :  { %v5635_v0 = vmul.f32 %v7802_v42, %v5633_v40 }
0x4405   :  { %5639 = vrot.lane.b32.xlu1 %v5635_v0, %s7898_s2 }
0x4477   :  { %v5640_v11 = vpop.permute.xlu1 %5639 }
0x4478   :  { %7287 = vmatmul.mubr.msk.f32.vlgmr.msra.gmra.mrb[122].mxu0 %vm2381_vm3, %v5640_v11 }
0x4479   :  { %7433 = vmatpush3.bf16.msra.mxu0 %v8768_v14  ;;  %7300 = vmatprep.mubr.msk.f32.mxu0 %vm7893_vm1, %v7894_v57 }
0x447a   :  { %7437 = vmatprep.subr.bf16.mxu0 %v7892_v46 }
0x454b   :  { %v5709_v5 = vpop.f32.mrb[122].mxu0 }
0x454c   :  { %v5713_v44 = vadd.f32 %v5709_v5, %v5637_v43  ;;  %v7288_v48 = vpop.f32.mrb[123].mxu0 }
0x454e   :  { %7805 = vtanh.f32 %v5713_v44  ;;  %v6544_v27 = vmul.f32 -1.442695, %v5713_v44 }
0x4550   :  { %7807 = vpow2.f32 %v6544_v27 }
0x4558   :  { %v7806_v53 = vpop.eup %7805 }
0x4559   :  { %5723 = vrot.lane.b32.xlu0 %v7806_v53, %s7895_s4 }
0x455a   :  { %v7808_v24 = vpop.eup %7807 }
0x455b   :  { %v5717_v56 = vadd.f32 1.0, %v7808_v24 }
0x455d   :  { %7809 = vrcp.f32 %v5717_v56 }
0x4567   :  { %v7810_v58 = vpop.eup %7809 }
0x4568   :  { %v5721_v18 = vmul.f32 %v7810_v58, %v5629_v35 }
0x45cb   :  { %v5724_v29 = vpop.permute.xlu0 %5723 }
0x45cc   :  { %v5726_v30 = vmul.f32 %v7810_v58, %v5724_v29 }
0x45ce   :  { %5728 = vrot.lane.b32.xlu1 %v5726_v30, %s7896_s23 }
0x4640   :  { %v5729_v59 = vpop.permute.xlu1 %5728 }
0x4641   :  { %v5731_v60 = vadd.f32 %v5729_v59, %v5721_v18  ;;  %v6045_v18 = vld [vmem:[#allocation4 + $0x8] sm:$0xff] }
0x4643   :  { %7811 = vtanh.f32 %v5731_v60 }
0x464d   :  { %v7812_v50 = vpop.eup %7811 }
0x464e   :  { %5734 = vrot.lane.b32.xlu0 %v7812_v50, %s7897_s0 }
0x46c0   :  { %v5735_v61 = vpop.permute.xlu0 %5734 }
0x46c1   :  { %v5737_v45 = vmul.f32 %v7810_v58, %v5735_v61 }
0x46c3   :  { %5741 = vrot.lane.b32.xlu1 %v5737_v45, %s7898_s2 }
0x4735   :  { %v5742_v54 = vpop.permute.xlu1 %5741 }
0x4736   :  { %7294 = vmatmul.mubr.msk.f32.vlgmr.msra.gmra.mrb[134].mxu1 %vm2381_vm3, %v5742_v54 }
0x4737   :  { %7436 = vmatpush3.bf16.msra.mxu1 %v8768_v14  ;;  %7307 = vmatprep.mubr.msk.f32.mxu1 %vm7893_vm1, %v7894_v57 }
0x4738   :  { %7440 = vmatprep.subr.bf16.mxu1 %v7892_v46 }
0x4809   :  { %v5811_v63 = vpop.f32.mrb[134].mxu1 }
0x480a   :  { %v5815_v49 = vadd.f32 %v5811_v63, %v5739_v62  ;;  %v7295_v3 = vpop.f32.mrb[135].mxu1 }
0x480c   :  { %7813 = vtanh.f32 %v5815_v49  ;;  %v6546_v7 = vmul.f32 -1.442695, %v5815_v49 }
0x480e   :  { %7815 = vpow2.f32 %v6546_v7 }
0x4816   :  { %v7814_v10 = vpop.eup %7813 }
0x4817   :  { %5825 = vrot.lane.b32.xlu0 %v7814_v10, %s7895_s4 }
0x4818   :  { %v7816_v33 = vpop.eup %7815 }
0x4819   :  { %v5819_v16 = vadd.f32 1.0, %v7816_v33 }
0x481b   :  { %7817 = vrcp.f32 %v5819_v16  ;;  %v3903_v16 = vld [vmem:[#allocation3] sm:$0x3] }
0x4825   :  { %v7818_v9 = vpop.eup %7817 }
0x4826   :  { %v5823_v15 = vmul.f32 %v7818_v9, %v5731_v60 }
0x4889   :  { %v5826_v1 = vpop.permute.xlu0 %5825 }
0x488a   :  { %v5828_v12 = vmul.f32 %v7818_v9, %v5826_v1 }
0x488c   :  { %5830 = vrot.lane.b32.xlu1 %v5828_v12, %s7896_s23 }
0x48fe   :  { %v5831_v46 = vpop.permute.xlu1 %5830 }
0x48ff   :  { %v5833_v38 = vadd.f32 %v5831_v46, %v5823_v15 }
0x4901   :  { %7819 = vtanh.f32 %v5833_v38 }
0x490b   :  { %v7820_v4 = vpop.eup %7819 }
0x490c   :  { %5836 = vrot.lane.b32.xlu0 %v7820_v4, %s7897_s0 }
0x497e   :  { %v5837_v36 = vpop.permute.xlu0 %5836 }
0x497f   :  { %v5839_v41 = vmul.f32 %v7818_v9, %v5837_v36  ;;  %v3979_v9 = vadd.f32 %v9084_v6, %v3903_v16 }
0x4981   :  { %5843 = vrot.lane.b32.xlu1 %v5839_v41, %s7898_s2  ;;  %v6510_v46 = vmul.f32 -1.442695, %v3979_v9 }
0x49f3   :  { %v5844_v17 = vpop.permute.xlu1 %5843 }
0x49f4   :  { %7301 = vmatmul.mubr.msk.f32.vlgmr.msra.gmra.mrb[124].mxu0 %vm2381_vm3, %v5844_v17 }
0x49f5   :  { %7439 = vmatpush3.bf16.msra.mxu0 %v8768_v14  ;;  %7314 = vmatprep.mubr.msk.f32.mxu0 %vm7893_vm1, %v7894_v57 }
0x49f6   :  { %7324 = vmatprep.subr.mxu0 %v7894_v57 }
0x4ac7   :  { %v5913_v20 = vpop.f32.mrb[124].mxu0 }
0x4ac8   :  { %v5917_v22 = vadd.f32 %v5913_v20, %v5841_v19  ;;  %v7302_v2 = vpop.f32.mrb[125].mxu0 }
0x4aca   :  { %7821 = vtanh.f32 %v5917_v22  ;;  %v6548_v8 = vmul.f32 -1.442695, %v5917_v22 }
0x4acc   :  { %7823 = vpow2.f32 %v6548_v8 }
0x4ad4   :  { %v7822_v21 = vpop.eup %7821 }
0x4ad5   :  { %5927 = vrot.lane.b32.xlu0 %v7822_v21, %s7895_s4  ;;  %v6146_v21 = vld [vmem:[#allocation4] sm:$0xff] }
0x4ad6   :  { %v7824_v25 = vpop.eup %7823 }
0x4ad7   :  { %v5921_v23 = vadd.f32 1.0, %v7824_v25 }
0x4ad9   :  { %7825 = vrcp.f32 %v5921_v23 }
0x4ae3   :  { %v7826_v34 = vpop.eup %7825 }
0x4ae4   :  { %v5925_v28 = vmul.f32 %v7826_v34, %v5833_v38 }
0x4b47   :  { %v5928_v26 = vpop.permute.xlu0 %5927 }
0x4b48   :  { %v5930_v55 = vmul.f32 %v7826_v34, %v5928_v26 }
0x4b4a   :  { %5932 = vrot.lane.b32.xlu1 %v5930_v55, %s7896_s23 }
0x4bbc   :  { %v5933_v13 = vpop.permute.xlu1 %5932 }
0x4bbd   :  { %v5935_v39 = vadd.f32 %v5933_v13, %v5925_v28 }
0x4bbf   :  { %7827 = vtanh.f32 %v5935_v39 }
0x4bc9   :  { %v7828_v42 = vpop.eup %7827 }
0x4bca   :  { %5938 = vrot.lane.b32.xlu0 %v7828_v42, %s7897_s0 }
0x4c3c   :  { %v5939_v31 = vpop.permute.xlu0 %5938 }
0x4c3d   :  { %v5941_v51 = vmul.f32 %v7826_v34, %v5939_v31 }
0x4c3f   :  { %5945 = vrot.lane.b32.xlu1 %v5941_v51, %s7898_s2 }
0x4cb1   :  { %v5946_v32 = vpop.permute.xlu1 %5945 }
0x4cb2   :  { %7308 = vmatmul.mubr.msk.f32.vlgmr.msra.gmra.mrb[136].mxu1 %vm2381_vm3, %v5946_v32 }
0x4cb3   :  { %7442 = vmatpush3.bf16.msra.mxu1 %v8768_v14  ;;  %7321 = vmatprep.mubr.msk.f32.mxu1 %vm7893_vm1, %v7894_v57 }
0x4d85   :  { %v6015_v35 = vpop.f32.mrb[136].mxu1 }
0x4d86   :  { %v6019_v37 = vadd.f32 %v6015_v35, %v5943_v47  ;;  %v7309_v40 = vpop.f32.mrb[137].mxu1 }
0x4d88   :  { %7829 = vtanh.f32 %v6019_v37  ;;  %v6550_v11 = vmul.f32 -1.442695, %v6019_v37 }
0x4d8a   :  { %7831 = vpow2.f32 %v6550_v11 }
0x4d92   :  { %v7830_v0 = vpop.eup %7829 }
0x4d93   :  { %6029 = vrot.lane.b32.xlu0 %v7830_v0, %s7895_s4 }
0x4d94   :  { %v7832_v43 = vpop.eup %7831 }
0x4d95   :  { %v6023_v5 = vadd.f32 1.0, %v7832_v43 }
0x4d97   :  { %7833 = vrcp.f32 %v6023_v5 }
0x4da1   :  { %v7834_v44 = vpop.eup %7833 }
0x4da2   :  { %v6027_v14 = vmul.f32 %v7834_v44, %v5935_v39 }
0x4e05   :  { %v6030_v48 = vpop.permute.xlu0 %6029 }
0x4e06   :  { %v6032_v53 = vmul.f32 %v7834_v44, %v6030_v48 }
0x4e08   :  { %6034 = vrot.lane.b32.xlu1 %v6032_v53, %s7896_s23 }
0x4e7a   :  { %v6035_v27 = vpop.permute.xlu1 %6034 }
0x4e7b   :  { %v6037_v24 = vadd.f32 %v6035_v27, %v6027_v14 }
0x4e7d   :  { %7835 = vtanh.f32 %v6037_v24 }
0x4e87   :  { %v7836_v56 = vpop.eup %7835 }
0x4e88   :  { %6040 = vrot.lane.b32.xlu0 %v7836_v56, %s7897_s0 }
0x4efa   :  { %v6041_v58 = vpop.permute.xlu0 %6040 }
0x4efb   :  { %v6043_v29 = vmul.f32 %v7834_v44, %v6041_v58 }
0x4efd   :  { %6047 = vrot.lane.b32.xlu1 %v6043_v29, %s7898_s2 }
0x4f6f   :  { %v6048_v30 = vpop.permute.xlu1 %6047 }
0x4f70   :  { %7315 = vmatmul.mubr.msk.f32.vlgmr.msra.gmra.mrb[126].mxu0 %vm2381_vm3, %v6048_v30 }
0x4f71   :  { %7326 = vmatprep.mubr.msk.f32.mxu0 %vm7893_vm1, %v7894_v57 }
0x5043   :  { %v6117_v59 = vpop.f32.mrb[126].mxu0 }
0x5044   :  { %v6121_v60 = vadd.f32 %v6117_v59, %v6045_v18  ;;  %v7316_v50 = vpop.f32.mrb[127].mxu0 }
0x5046   :  { %7837 = vtanh.f32 %v6121_v60  ;;  %v6552_v45 = vmul.f32 -1.442695, %v6121_v60 }
0x5048   :  { %7839 = vpow2.f32 %v6552_v45 }
0x5050   :  { %v7838_v61 = vpop.eup %7837 }
0x5051   :  { %6131 = vrot.lane.b32.xlu0 %v7838_v61, %s7895_s4 }
0x5052   :  { %v7840_v54 = vpop.eup %7839 }
0x5053   :  { %v6125_v62 = vadd.f32 1.0, %v7840_v54 }
0x5055   :  { %7841 = vrcp.f32 %v6125_v62 }
0x505f   :  { %v7842_v63 = vpop.eup %7841 }
0x5060   :  { %v6129_v10 = vmul.f32 %v7842_v63, %v6037_v24 }
0x50c3   :  { %v6132_v49 = vpop.permute.xlu0 %6131 }
0x50c4   :  { %v6134_v3 = vmul.f32 %v7842_v63, %v6132_v49 }
0x50c6   :  { %6136 = vrot.lane.b32.xlu1 %v6134_v3, %s7896_s23 }
0x5138   :  { %v6137_v57 = vpop.permute.xlu1 %6136 }
0x5139   :  { %v6139_v7 = vadd.f32 %v6137_v57, %v6129_v10 }
0x513b   :  { %7843 = vtanh.f32 %v6139_v7 }
0x513c   :  { %7845 = vtanh.f32 %v3979_v9 }
0x513d   :  { %7847 = vpow2.f32 %v6510_v46 }
0x5145   :  { %v7844_v33 = vpop.eup %7843 }
0x5146   :  { %6142 = vrot.lane.b32.xlu0 %v7844_v33, %s7897_s0  ;;  %v7846_v15 = vpop.eup %7845 }
0x5147   :  { %v7848_v38 = vpop.eup %7847 }
0x5148   :  { %v3983_v4 = vadd.f32 1.0, %v7848_v38 }
0x514a   :  { %7849 = vrcp.f32 %v3983_v4 }
0x5154   :  { %v7850_v41 = vpop.eup %7849 }
0x5155   :  { %v3987_v6 = vmul.f32 %v7850_v41, %v9067_v52 }
0x51b8   :  { %v6143_v1 = vpop.permute.xlu0 %6142 }
0x51b9   :  { %v6145_v12 = vmul.f32 %v7842_v63, %v6143_v1 }
0x51bb   :  { %6148 = vrot.lane.b32.xlu1 %v6145_v12, %s7898_s2 }
0x51bf   :  { %3989 = vrot.lane.b32.xlu1 %v7846_v15, %s7895_s4 }
0x522d   :  { %v6149_v36 = vpop.permute.xlu1 %6148 }
0x522e   :  { %7322 = vmatmul.mubr.msk.f32.vlgmr.msra.gmra.mrb[138].mxu1 %vm2381_vm3, %v6149_v36 }
0x5231   :  { %v3990_v17 = vpop.permute.xlu1 %3989 }
0x5232   :  { %v3992_v19 = vmul.f32 %v7850_v41, %v3990_v17 }
0x5234   :  { %3994 = vrot.lane.b32.xlu1 %v3992_v19, %s7896_s23 }
0x52a6   :  { %v3995_v20 = vpop.permute.xlu1 %3994 }
0x52a7   :  { %v3997_v22 = vadd.f32 %v3995_v20, %v3987_v6 }
0x52a9   :  { %7851 = vtanh.f32 %v3997_v22 }
0x52b3   :  { %v7852_v2 = vpop.eup %7851 }
0x52b4   :  { %4000 = vrot.lane.b32.xlu1 %v7852_v2, %s7897_s0 }
0x5301   :  { %v6218_v8 = vpop.f32.mrb[138].mxu1 }
0x5302   :  { %v6222_v25 = vadd.f32 %v6218_v8, %v6146_v21  ;;  %v7323_v23 = vpop.f32.mrb[139].mxu1 }
0x5304   :  { %7853 = vtanh.f32 %v6222_v25  ;;  %v6554_v28 = vmul.f32 -1.442695, %v6222_v25 }
0x5306   :  { %7855 = vpow2.f32 %v6554_v28 }
0x530e   :  { %v7854_v34 = vpop.eup %7853 }
0x530f   :  { %6232 = vrot.lane.b32.xlu0 %v7854_v34, %s7895_s4 }
0x5310   :  { %v7856_v52 = vpop.eup %7855 }
0x5311   :  { %v6226_v13 = vadd.f32 1.0, %v7856_v52 }
0x5313   :  { %7857 = vrcp.f32 %v6226_v13 }
0x531d   :  { %v7858_v39 = vpop.eup %7857 }
0x531e   :  { %v6230_v51 = vmul.f32 %v7858_v39, %v6139_v7 }
0x5326   :  { %v4001_v26 = vpop.permute.xlu1 %4000 }
0x5327   :  { %v4003_v55 = vmul.f32 %v7850_v41, %v4001_v26 }
0x5329   :  { %6248 = vrot.lane.b32.xlu1 %v4003_v55, %s7898_s2 }
0x5381   :  { %v6233_v42 = vpop.permute.xlu0 %6232 }
0x5382   :  { %v6235_v31 = vmul.f32 %v7858_v39, %v6233_v42 }
0x5384   :  { %6237 = vrot.lane.b32.xlu0 %v6235_v31, %s7896_s23 }
0x539b   :  { %v6249_v11 = vpop.permute.xlu1 %6248 }
0x53f6   :  { %v6238_v32 = vpop.permute.xlu0 %6237 }
0x53f7   :  { %v6240_v47 = vadd.f32 %v6238_v32, %v6230_v51 }
0x53f9   :  { %7859 = vtanh.f32 %v6240_v47 }
0x5403   :  { %v7860_v35 = vpop.eup %7859 }
0x5404   :  { %6243 = vrot.lane.b32.xlu0 %v7860_v35, %s7897_s0 }
0x5476   :  { %v6244_v37 = vpop.permute.xlu0 %6243 }
0x5477   :  { %v6246_v40 = vmul.f32 %v7858_v39, %v6244_v37 }
0x5479   :  { %6251 = vrot.lane.b32.xlu0 %v6246_v40, %s7898_s2 }
0x54eb   :  { %v6252_v0 = vpop.permute.xlu0 %6251 }
0x54ec   :  { %7325 = vmatpush3.xpose.msk.msra.mxu0 %vm2381_vm3, %v6252_v0 }
0x54ef   :  { %7327 = vmatmul.mubr.msk.f32.vlgmr.msra.gmra.mrb[128].mxu0 %vm2381_vm3, %v6249_v11 }
0x55c2   :  { %v6323_v43 = vpop.f32.mrb[128].mxu0 }
0x55c3   :  { %v7328_v5 = vpop.f32.mrb[129].mxu0  ;;  %v6328_v44 = vsel %vm6327_vm4, %v6323_v43, -inf }
0x55c4   :  { %6329 = vmax.xlane.f32.xlu0 %v6328_v44 }
0x5651   :  { %v6330_v48 = vpop.xlane.xlu0 %6329 }
0x5652   :  { %v6331_v53 = vsub.f32 %v6323_v43, %v6330_v48 }
0x5654   :  { %v6332_v14 = vmul.f32 1.442695, %v6331_v53 }
0x5656   :  { %7861 = vpow2.f32 %v6332_v14 }
0x5660   :  { %v7862_v27 = vpop.eup %7861 }
0x5661   :  { %v6334_v24 = vsel %vm6327_vm4, %v7862_v27, 0.0 }
0x5662   :  { %6335 = vadd.xlane.f32.xlu1 %v6334_v24 }
0x56ef   :  { %v6336_v56 = vpop.xlane.xlu1 %6335 }
0x56f0   :  { %7863 = vlog2.f32 %v6336_v56 }
0x56fa   :  { %v7864_v58 = vpop.eup %7863 }
0x56fb   :  { %v6338_v29 = vmul.f32 0.6931472, %v7864_v58 }
0x56fd   :  { %v6339_v30 = vsub.f32 %v6331_v53, %v6338_v29 }
0x56ff   :  { %v6341_v18 = vsel %vm6340_vm5, %v6339_v30, 0.0 }
0x5700   :  { %6342 = vst [vmem:[#allocation6] sm:$0x3] %v6341_v18 }
0x5701   :  { %7876 = shalt.err (!%p7873_p4)
}
0x5702   :  { %s7877_s28 = scalar_lea.hbm %s9308_s8, 32 }
0x5703   :  { %p7878_p5 = scmp.ne.s32.totalorder %s9308_s8, %s7877_s28  ;;  %p7881_p6 = scmp.lt.u32.totalorder %s7877_s28, %s9308_s8 }
0x5705   :  { %p7883_p7 = pnand %p7881_p6, %p7878_p5 }
0x5707   :  { %7886 = shalt.err (!%p7883_p7)
}
0x5708   :  { %6352 = dma.vmem_to_hbm [thread:$0]  %s6350_s24, 32, %s9308_s8, [#allocation7]  }
0x5709   :  { %7889 = dma.done.wait [#allocation7], 32  }
0x570a   :  { %7890 = vsyncadd [#allocation7], 4294967264 }
0x570b   :  { %6356 = vsyncpa [#allocation7], 1 }
0x570c   :  { %6357 = vsyncmov [#allocation5] }
0x570f   :  { %s6358_s13 = vpop.sfrf %6357 }
0x5710   :  { %p6557_p8 = scmp.ne.s32.totalorder %s6358_s13, 0 }
0x5712   :  { %6362 = shalt.err (%p6557_p8)  }

</bundles_post_ra>
